<compile_context>
chip_gen: v7x
topology: tpu7x:2x2x1
jax: 0.10.0
libtpu: 0.0.40
codegen_flags: <defaults>
</compile_context>

<pallas_src>
import functools

import jax
import jax.numpy as jnp
from jax.experimental import pallas as pl
from jax.experimental.pallas import tpu as pltpu


# ----------------------------------------------------------------------------
# Pallas kernel: full single-layer GRU (batch=1, h0=0), PyTorch gate order.
# ----------------------------------------------------------------------------
def _gru_kernel(x_ref, wih_ref, whh_hbm, bias_ref, bhn_ref, o_ref,
                whh_vmem, gx_ref, whh_sem, *, T, D):
    """x_ref:    (T, D)   f32   input sequence (flattened frames), VMEM
       wih_ref:  (D, 3D)  bf16  W_ih^T (gate order [r, z, n]), VMEM
       whh_hbm:  (D, 3D)  bf16  W_hh^T, left in HBM (pl.ANY) -> manual DMA
       bias_ref: (1, 3D)  f32   b_ih with b_hh[r, z] pre-folded in
       bhn_ref:  (1, D)   f32   b_hn (must stay inside r * (W_hn h + b_hn))
       o_ref:    (T, D)   f32   hidden states h_1 .. h_T
       whh_vmem: (D, 3D)  bf16  VMEM landing buffer for W_hh^T
       gx_ref:   (T, 3D)  f32   VMEM scratch: hoisted input projection
       whh_sem:  DMA semaphore for the W_hh fetch."""
    # Kick off the W_hh HBM -> VMEM fetch; it is only needed after the hoisted
    # input projection, so the DMA is hidden under the first MXU matmul.
    whh_cp = pltpu.make_async_copy(whh_hbm, whh_vmem, whh_sem)
    whh_cp.start()

    # Hoisted, time-invariant input projection: one big MXU matmul
    # (bf16 operands, f32 accumulation), staged in VMEM so it is not held live
    # in vregs across the unrolled time loop.
    gx_ref[...] = jnp.dot(x_ref[...].astype(jnp.bfloat16), wih_ref[...],
                          preferred_element_type=jnp.float32) + bias_ref[...]

    whh_cp.wait()                          # W_hh needed from here on

    b_hn = bhn_ref[...]                    # (1, D) broadcast, hoisted
    h = jnp.zeros((1, D), jnp.float32)     # h_0 = 0 (PyTorch default)
    for t in range(T):                     # T is small & static: fully unrolled
        gh = jnp.dot(h.astype(jnp.bfloat16), whh_vmem[...],
                     preferred_element_type=jnp.float32)          # (1, 3D)
        gx = gx_ref[t:t + 1, :]                                   # (1, 3D)
        r = jax.nn.sigmoid(gx[:, 0:D] + gh[:, 0:D])
        z = jax.nn.sigmoid(gx[:, D:2 * D] + gh[:, D:2 * D])
        n = jnp.tanh(gx[:, 2 * D:3 * D] + r * (gh[:, 2 * D:3 * D] + b_hn))
        h = (1.0 - z) * n + z * h
        o_ref[t:t + 1, :] = h


def gru_seq_pallas(x_seq, prep):
    """PyTorch nn.GRU(D, D, batch_first=True) forward for batch=1, h0=0.
    x_seq: (T, D) f32; prep: dict from prepare_gru_params. Returns (T, D) f32."""
    T, D = x_seq.shape
    flops = 4 * T * D * 3 * D                       # input proj + recurrence
    bytes_accessed = (4 * T * D * 2                 # x in + h out (f32)
                      + 2 * (2 * D * 3 * D)         # both weights (bf16)
                      + 4 * (3 * D + D))            # biases (f32)
    return pl.pallas_call(
        functools.partial(_gru_kernel, T=T, D=D),
        out_shape=jax.ShapeDtypeStruct((T, D), jnp.float32),
        in_specs=[
            pl.BlockSpec(memory_space=pltpu.MemorySpace.VMEM),   # x_seq
            pl.BlockSpec(memory_space=pltpu.MemorySpace.VMEM),   # W_ih^T
            pl.BlockSpec(memory_space=pl.ANY),                   # W_hh^T (HBM)
            pl.BlockSpec(memory_space=pltpu.MemorySpace.VMEM),   # fused bias
            pl.BlockSpec(memory_space=pltpu.MemorySpace.VMEM),   # b_hn
        ],
        out_specs=pl.BlockSpec(memory_space=pltpu.MemorySpace.VMEM),
        scratch_shapes=[
            pltpu.VMEM((D, 3 * D), jnp.bfloat16),   # W_hh landing buffer
            pltpu.VMEM((T, 3 * D), jnp.float32),    # hoisted pre-activations
            pltpu.SemaphoreType.DMA,                # W_hh DMA completion
        ],
        cost_estimate=pl.CostEstimate(flops=flops,
                                      transcendentals=3 * T * D,
                                      bytes_accessed=bytes_accessed),
    )(x_seq.astype(jnp.float32), prep["w_ih_t"], prep["w_hh_t"],
      prep["bias_fused"], prep["b_hn"])


# ----------------------------------------------------------------------------
# Glue mirroring the PyTorch module
# ----------------------------------------------------------------------------
def pad_crop(x, target_w, target_h, in_w, in_h, goal="pad"):
    # TODO(synk): pad_crop is defined outside the reference module; we assume it
    # zero-pads (goal='pad') / crops (goal='crop') the trailing two spatial dims
    # to (target_w, target_h), anchored at the top-left corner.
    x = x[..., :target_w, :target_h]
    pw = max(target_w - x.shape[-2], 0)
    ph = max(target_h - x.shape[-1], 0)
    pad = [(0, 0)] * (x.ndim - 2) + [(0, pw), (0, ph)]
    return jnp.pad(x, pad)


def init_params(key, D):
    ks = jax.random.split(key, 8)

    def u(rng, shape, bound):
        return jax.random.uniform(rng, shape, jnp.float32, -bound, bound)

    k = 1.0 / float(jnp.sqrt(jnp.float32(D)))
    ka = 1.0 / float(jnp.sqrt(jnp.float32(10)))
    return dict(
        # nn.GRU(D, D) parameters (PyTorch init: U(-1/sqrt(D), 1/sqrt(D))).
        w_ih=u(ks[0], (3 * D, D), k),
        w_hh=u(ks[1], (3 * D, D), k),
        b_ih=u(ks[2], (3 * D,), k),
        b_hh=u(ks[3], (3 * D,), k),
        # Attention(10, 10) parameters: kept for shape fidelity only — the
        # reference Attention.forward returns its input unchanged (dead code).
        att_linear_w=u(ks[4], (10, 10), ka),
        att_linear_b=u(ks[5], (10,), ka),
        att_full_w=u(ks[6], (1, 10), ka),
        att_full_b=u(ks[7], (1,), ka),
    )


def prepare_gru_params(params):
    """One-time prep: pre-transpose + pre-cast weights, fold b_hh[r,z] into the
    hoisted bias.  Done ONCE outside the per-call path (no per-forward XLA
    transpose/convert launches)."""
    D = params["w_ih"].shape[1]
    b_ih = params["b_ih"].astype(jnp.float32)
    b_hh = params["b_hh"].astype(jnp.float32)
    bias_fused = jnp.concatenate(
        [b_ih[:2 * D] + b_hh[:2 * D], b_ih[2 * D:]]).reshape(1, 3 * D)
    return dict(
        w_ih_t=jnp.transpose(params["w_ih"]).astype(jnp.bfloat16),   # (D, 3D)
        w_hh_t=jnp.transpose(params["w_hh"]).astype(jnp.bfloat16),   # (D, 3D)
        bias_fused=bias_fused,                                       # (1, 3D)
        b_hn=b_hh[2 * D:].reshape(1, D),                             # (1, D)
    )


def gru_t4_forward(prep, x, largest_w, largest_h, attention_value=1.0):
    """x: (ch=10, input_w, input_h) -> (1, 10, input_w, input_h)."""
    ch, input_w, input_h = x.shape
    D = largest_w * largest_h
    xp = pad_crop(x, largest_w, largest_h, input_w, input_h, goal="pad")
    x_seq = xp.reshape(ch, D)                                   # (10, D), batch=1
    out = gru_seq_pallas(x_seq, prep)                           # (10, D)
    y = out[None]                                               # (1, 10, D)
    if attention_value is not None:
        # torch.reshape(x, (1, D, 10)) -> Attention.forward (returns its input
        # unchanged) -> torch.reshape(..., (1, 10, W, H)).  Row-major flat
        # reinterpretations, so the data path is an identity.
        y = y.reshape(1, D, ch).reshape(1, ch, D)
    y = y.reshape(1, ch, largest_w, largest_h)
    y = pad_crop(y, input_w, input_h, largest_w, largest_h, goal="crop")
    return y


# ----------------------------------------------------------------------------
# Pure-JAX GRU references for sanity checks
# ----------------------------------------------------------------------------
def _gru_ref(x_seq, w_ih, w_hh, b_ih, b_hh, matmul_dtype=None):
    """matmul_dtype=None -> full f32 (HIGHEST precision); otherwise cast the
    matmul operands (matching the kernel's bf16-in / f32-accumulate scheme)."""
    T, D = x_seq.shape
    if matmul_dtype is None:
        def dot(a, b):
            return jnp.dot(a, b, precision=jax.lax.Precision.HIGHEST)
    else:
        def dot(a, b):
            return jnp.dot(a.astype(matmul_dtype), b.astype(matmul_dtype),
                           preferred_element_type=jnp.float32)
    wih_t, whh_t = w_ih.T, w_hh.T
    h = jnp.zeros((D,), jnp.float32)
    outs = []
    for t in range(T):
        gx = dot(x_seq[t], wih_t) + b_ih
        gh = dot(h, whh_t) + b_hh
        r = jax.nn.sigmoid(gx[0:D] + gh[0:D])
        z = jax.nn.sigmoid(gx[D:2 * D] + gh[D:2 * D])
        n = jnp.tanh(gx[2 * D:] + r * gh[2 * D:])
        h = (1.0 - z) * n + z * h
        outs.append(h)
    return jnp.stack(outs, axis=0)


if __name__ == "__main__":
    key = jax.random.PRNGKey(0)
    kx, kp = jax.random.split(key)

    largest_w = largest_h = 16          # GRU input/hidden size D = 256
    input_w = input_h = 14              # smaller input exercises pad then crop
    ch = 10
    D = largest_w * largest_h

    x = jax.random.normal(kx, (ch, input_w, input_h), jnp.float32)
    params = init_params(kp, D)
    prep = prepare_gru_params(params)   # one-time weight transpose/cast/fold

    y = gru_t4_forward(prep, x, largest_w, largest_h, attention_value=1.0)
    y = jax.block_until_ready(y)
    assert y.shape == (1, ch, input_w, input_h), y.shape

    xp = pad_crop(x, largest_w, largest_h, input_w, input_h, goal="pad")
    x_seq = xp.reshape(ch, D)

    def to_out(seq):
        return pad_crop(seq.reshape(1, ch, largest_w, largest_h),
                        input_w, input_h, largest_w, largest_h, goal="crop")

    # 1) Matched-precision reference (bf16 matmul operands, f32 accumulation):
    #    verifies the kernel implementation itself.
    ref_bf16 = to_out(_gru_ref(x_seq, params["w_ih"], params["w_hh"],
                               params["b_ih"], params["b_hh"],
                               matmul_dtype=jnp.bfloat16))
    err_bf16 = float(jnp.max(jnp.abs(y - ref_bf16)))
    assert jnp.allclose(y, ref_bf16, rtol=2e-3, atol=2e-3), err_bf16

    # 2) Full-f32 reference: verifies bf16 matmul inputs did not hurt accuracy
    #    of the overall forward beyond a loose bound.
    ref_f32 = to_out(_gru_ref(x_seq, params["w_ih"], params["w_hh"],
                              params["b_ih"], params["b_hh"]))
    err_f32 = float(jnp.max(jnp.abs(y - ref_f32)))
    assert jnp.allclose(y, ref_f32, rtol=5e-2, atol=5e-2), err_f32

    print("KERNEL_OK")
</pallas_src>

<mosaic_0001>
module attributes {stable_mosaic.version = 11 : i64} {
  func.func @_gru_kernel(%arg0: memref<10x256xf32, #tpu.memory_space<vmem>>, %arg1: memref<256x768xbf16, #tpu.memory_space<vmem>>, %arg2: memref<256x768xbf16, #tpu.memory_space<any>>, %arg3: memref<1x768xf32, #tpu.memory_space<vmem>>, %arg4: memref<1x256xf32, #tpu.memory_space<vmem>>, %arg5: memref<10x256xf32, #tpu.memory_space<vmem>>, %arg6: memref<256x768xbf16, #tpu.memory_space<vmem>>, %arg7: memref<10x768xf32, #tpu.memory_space<vmem>>, %arg8: memref<!tpu.dma_semaphore, #tpu.memory_space<semaphore_mem>>) attributes {dimension_semantics = [], scalar_prefetch = 0 : i64, scratch_operands = 3 : i64, tpu.core_type = #tpu.core_type<tc>} {
    tpu.enqueue_dma source(%arg2 : memref<256x768xbf16, #tpu.memory_space<any>>) target(%arg6 : memref<256x768xbf16, #tpu.memory_space<vmem>>) target_semaphore(%arg8 : memref<!tpu.dma_semaphore, #tpu.memory_space<semaphore_mem>>)
    %c0 = arith.constant 0 : index
    %c0_0 = arith.constant 0 : index
    %0 = vector.load %arg0[%c0, %c0_0] : memref<10x256xf32, #tpu.memory_space<vmem>>, vector<10x256xf32>
    %1 = arith.truncf %0 : vector<10x256xf32> to vector<10x256xbf16>
    %c0_1 = arith.constant 0 : index
    %c0_2 = arith.constant 0 : index
    %2 = vector.load %arg1[%c0_1, %c0_2] : memref<256x768xbf16, #tpu.memory_space<vmem>>, vector<256x768xbf16>
    %cst = arith.constant dense<0.000000e+00> : vector<10x768xf32>
    %3 = tpu.matmul %1, %2, %cst {dimension_numbers = #tpu.dot_dimension_numbers<[1], [0], [0], [1], [0, 0, 1, 1], [], []>} : vector<10x256xbf16>, vector<256x768xbf16>, vector<10x768xf32> -> vector<10x768xf32>
    %c0_3 = arith.constant 0 : index
    %c0_4 = arith.constant 0 : index
    %4 = vector.load %arg3[%c0_3, %c0_4] : memref<1x768xf32, #tpu.memory_space<vmem>>, vector<1x768xf32>
    %5 = vector.broadcast %4 : vector<1x768xf32> to vector<10x768xf32>
    %6 = arith.addf %3, %5 : vector<10x768xf32>
    %c0_5 = arith.constant 0 : index
    %c0_6 = arith.constant 0 : index
    %7 = vector.load %arg7[%c0_5, %c0_6] : memref<10x768xf32, #tpu.memory_space<vmem>>, vector<10x768xf32>
    tpu.vector_store %arg7[%c0_5, %c0_6], %6 {strides = array<i32>} : memref<10x768xf32, #tpu.memory_space<vmem>>, vector<10x768xf32>,
    tpu.wait_dma2 semaphore(%arg8 : memref<!tpu.dma_semaphore, #tpu.memory_space<semaphore_mem>>) src(%arg2 : memref<256x768xbf16, #tpu.memory_space<any>>) dst(%arg6 : memref<256x768xbf16, #tpu.memory_space<vmem>>)
    %c0_7 = arith.constant 0 : index
    %c0_8 = arith.constant 0 : index
    %8 = vector.load %arg4[%c0_7, %c0_8] : memref<1x256xf32, #tpu.memory_space<vmem>>, vector<1x256xf32>
    %cst_9 = arith.constant 0.000000e+00 : f32
    %9 = vector.broadcast %cst_9 : f32 to vector<1x256xf32>
    %10 = arith.truncf %9 : vector<1x256xf32> to vector<1x256xbf16>
    %c0_10 = arith.constant 0 : index
    %c0_11 = arith.constant 0 : index
    %11 = vector.load %arg6[%c0_10, %c0_11] : memref<256x768xbf16, #tpu.memory_space<vmem>>, vector<256x768xbf16>
    %cst_12 = arith.constant dense<0.000000e+00> : vector<1x768xf32>
    %12 = tpu.matmul %10, %11, %cst_12 {dimension_numbers = #tpu.dot_dimension_numbers<[1], [0], [0], [1], [0, 0, 1, 1], [], []>} : vector<1x256xbf16>, vector<256x768xbf16>, vector<1x768xf32> -> vector<1x768xf32>
    %c0_13 = arith.constant 0 : index
    %c0_14 = arith.constant 0 : index
    %13 = vector.load %arg7[%c0_13, %c0_14] : memref<10x768xf32, #tpu.memory_space<vmem>>, vector<1x768xf32>
    %14 = vector.extract_strided_slice %13 {offsets = [0, 0], sizes = [1, 256], strides = [1, 1]} : vector<1x768xf32> to vector<1x256xf32>
    %15 = vector.extract_strided_slice %12 {offsets = [0, 0], sizes = [1, 256], strides = [1, 1]} : vector<1x768xf32> to vector<1x256xf32>
    %16 = arith.addf %14, %15 : vector<1x256xf32>
    %17 = arith.negf %16 : vector<1x256xf32>
    %18 = math.exp %17 : vector<1x256xf32>
    %cst_15 = arith.constant 1.000000e+00 : f32
    %19 = vector.broadcast %cst_15 : f32 to vector<1x256xf32>
    %20 = arith.addf %19, %18 : vector<1x256xf32>
    %21 = arith.divf %19, %20 : vector<1x256xf32>
    %22 = vector.extract_strided_slice %13 {offsets = [0, 256], sizes = [1, 256], strides = [1, 1]} : vector<1x768xf32> to vector<1x256xf32>
    %23 = vector.extract_strided_slice %12 {offsets = [0, 256], sizes = [1, 256], strides = [1, 1]} : vector<1x768xf32> to vector<1x256xf32>
    %24 = arith.addf %22, %23 : vector<1x256xf32>
    %25 = arith.negf %24 : vector<1x256xf32>
    %26 = math.exp %25 : vector<1x256xf32>
    %cst_16 = arith.constant 1.000000e+00 : f32
    %27 = vector.broadcast %cst_16 : f32 to vector<1x256xf32>
    %28 = arith.addf %27, %26 : vector<1x256xf32>
    %29 = arith.divf %27, %28 : vector<1x256xf32>
    %30 = vector.extract_strided_slice %13 {offsets = [0, 512], sizes = [1, 256], strides = [1, 1]} : vector<1x768xf32> to vector<1x256xf32>
    %31 = vector.extract_strided_slice %12 {offsets = [0, 512], sizes = [1, 256], strides = [1, 1]} : vector<1x768xf32> to vector<1x256xf32>
    %32 = arith.addf %31, %8 : vector<1x256xf32>
    %33 = arith.mulf %21, %32 : vector<1x256xf32>
    %34 = arith.addf %30, %33 : vector<1x256xf32>
    %35 = math.tanh %34 : vector<1x256xf32>
    %cst_17 = arith.constant 1.000000e+00 : f32
    %36 = vector.broadcast %cst_17 : f32 to vector<1x256xf32>
    %37 = arith.subf %36, %29 : vector<1x256xf32>
    %38 = arith.mulf %37, %35 : vector<1x256xf32>
    %39 = arith.mulf %29, %9 : vector<1x256xf32>
    %40 = arith.addf %38, %39 : vector<1x256xf32>
    %c0_18 = arith.constant 0 : index
    %c0_19 = arith.constant 0 : index
    %41 = vector.load %arg5[%c0_18, %c0_19] : memref<10x256xf32, #tpu.memory_space<vmem>>, vector<1x256xf32>
    tpu.vector_store %arg5[%c0_18, %c0_19], %40 {strides = array<i32>} : memref<10x256xf32, #tpu.memory_space<vmem>>, vector<1x256xf32>,
    %42 = arith.truncf %40 : vector<1x256xf32> to vector<1x256xbf16>
    %c0_20 = arith.constant 0 : index
    %c0_21 = arith.constant 0 : index
    %43 = vector.load %arg6[%c0_20, %c0_21] : memref<256x768xbf16, #tpu.memory_space<vmem>>, vector<256x768xbf16>
    %cst_22 = arith.constant dense<0.000000e+00> : vector<1x768xf32>
    %44 = tpu.matmul %42, %43, %cst_22 {dimension_numbers = #tpu.dot_dimension_numbers<[1], [0], [0], [1], [0, 0, 1, 1], [], []>} : vector<1x256xbf16>, vector<256x768xbf16>, vector<1x768xf32> -> vector<1x768xf32>
    %c1 = arith.constant 1 : index
    %c0_23 = arith.constant 0 : index
    %45 = vector.load %arg7[%c1, %c0_23] : memref<10x768xf32, #tpu.memory_space<vmem>>, vector<1x768xf32>
    %46 = vector.extract_strided_slice %45 {offsets = [0, 0], sizes = [1, 256], strides = [1, 1]} : vector<1x768xf32> to vector<1x256xf32>
    %47 = vector.extract_strided_slice %44 {offsets = [0, 0], sizes = [1, 256], strides = [1, 1]} : vector<1x768xf32> to vector<1x256xf32>
    %48 = arith.addf %46, %47 : vector<1x256xf32>
    %49 = arith.negf %48 : vector<1x256xf32>
    %50 = math.exp %49 : vector<1x256xf32>
    %cst_24 = arith.constant 1.000000e+00 : f32
    %51 = vector.broadcast %cst_24 : f32 to vector<1x256xf32>
    %52 = arith.addf %51, %50 : vector<1x256xf32>
    %53 = arith.divf %51, %52 : vector<1x256xf32>
    %54 = vector.extract_strided_slice %45 {offsets = [0, 256], sizes = [1, 256], strides = [1, 1]} : vector<1x768xf32> to vector<1x256xf32>
    %55 = vector.extract_strided_slice %44 {offsets = [0, 256], sizes = [1, 256], strides = [1, 1]} : vector<1x768xf32> to vector<1x256xf32>
    %56 = arith.addf %54, %55 : vector<1x256xf32>
    %57 = arith.negf %56 : vector<1x256xf32>
    %58 = math.exp %57 : vector<1x256xf32>
    %cst_25 = arith.constant 1.000000e+00 : f32
    %59 = vector.broadcast %cst_25 : f32 to vector<1x256xf32>
    %60 = arith.addf %59, %58 : vector<1x256xf32>
    %61 = arith.divf %59, %60 : vector<1x256xf32>
    %62 = vector.extract_strided_slice %45 {offsets = [0, 512], sizes = [1, 256], strides = [1, 1]} : vector<1x768xf32> to vector<1x256xf32>
    %63 = vector.extract_strided_slice %44 {offsets = [0, 512], sizes = [1, 256], strides = [1, 1]} : vector<1x768xf32> to vector<1x256xf32>
    %64 = arith.addf %63, %8 : vector<1x256xf32>
    %65 = arith.mulf %53, %64 : vector<1x256xf32>
    %66 = arith.addf %62, %65 : vector<1x256xf32>
    %67 = math.tanh %66 : vector<1x256xf32>
    %cst_26 = arith.constant 1.000000e+00 : f32
    %68 = vector.broadcast %cst_26 : f32 to vector<1x256xf32>
    %69 = arith.subf %68, %61 : vector<1x256xf32>
    %70 = arith.mulf %69, %67 : vector<1x256xf32>
    %71 = arith.mulf %61, %40 : vector<1x256xf32>
    %72 = arith.addf %70, %71 : vector<1x256xf32>
    %c1_27 = arith.constant 1 : index
    %c0_28 = arith.constant 0 : index
    %73 = vector.load %arg5[%c1_27, %c0_28] : memref<10x256xf32, #tpu.memory_space<vmem>>, vector<1x256xf32>
    tpu.vector_store %arg5[%c1_27, %c0_28], %72 {strides = array<i32>} : memref<10x256xf32, #tpu.memory_space<vmem>>, vector<1x256xf32>,
    %74 = arith.truncf %72 : vector<1x256xf32> to vector<1x256xbf16>
    %c0_29 = arith.constant 0 : index
    %c0_30 = arith.constant 0 : index
    %75 = vector.load %arg6[%c0_29, %c0_30] : memref<256x768xbf16, #tpu.memory_space<vmem>>, vector<256x768xbf16>
    %cst_31 = arith.constant dense<0.000000e+00> : vector<1x768xf32>
    %76 = tpu.matmul %74, %75, %cst_31 {dimension_numbers = #tpu.dot_dimension_numbers<[1], [0], [0], [1], [0, 0, 1, 1], [], []>} : vector<1x256xbf16>, vector<256x768xbf16>, vector<1x768xf32> -> vector<1x768xf32>
    %c2 = arith.constant 2 : index
    %c0_32 = arith.constant 0 : index
    %77 = vector.load %arg7[%c2, %c0_32] : memref<10x768xf32, #tpu.memory_space<vmem>>, vector<1x768xf32>
    %78 = vector.extract_strided_slice %77 {offsets = [0, 0], sizes = [1, 256], strides = [1, 1]} : vector<1x768xf32> to vector<1x256xf32>
    %79 = vector.extract_strided_slice %76 {offsets = [0, 0], sizes = [1, 256], strides = [1, 1]} : vector<1x768xf32> to vector<1x256xf32>
    %80 = arith.addf %78, %79 : vector<1x256xf32>
    %81 = arith.negf %80 : vector<1x256xf32>
    %82 = math.exp %81 : vector<1x256xf32>
    %cst_33 = arith.constant 1.000000e+00 : f32
    %83 = vector.broadcast %cst_33 : f32 to vector<1x256xf32>
    %84 = arith.addf %83, %82 : vector<1x256xf32>
    %85 = arith.divf %83, %84 : vector<1x256xf32>
    %86 = vector.extract_strided_slice %77 {offsets = [0, 256], sizes = [1, 256], strides = [1, 1]} : vector<1x768xf32> to vector<1x256xf32>
    %87 = vector.extract_strided_slice %76 {offsets = [0, 256], sizes = [1, 256], strides = [1, 1]} : vector<1x768xf32> to vector<1x256xf32>
    %88 = arith.addf %86, %87 : vector<1x256xf32>
    %89 = arith.negf %88 : vector<1x256xf32>
    %90 = math.exp %89 : vector<1x256xf32>
    %cst_34 = arith.constant 1.000000e+00 : f32
    %91 = vector.broadcast %cst_34 : f32 to vector<1x256xf32>
    %92 = arith.addf %91, %90 : vector<1x256xf32>
    %93 = arith.divf %91, %92 : vector<1x256xf32>
    %94 = vector.extract_strided_slice %77 {offsets = [0, 512], sizes = [1, 256], strides = [1, 1]} : vector<1x768xf32> to vector<1x256xf32>
    %95 = vector.extract_strided_slice %76 {offsets = [0, 512], sizes = [1, 256], strides = [1, 1]} : vector<1x768xf32> to vector<1x256xf32>
    %96 = arith.addf %95, %8 : vector<1x256xf32>
    %97 = arith.mulf %85, %96 : vector<1x256xf32>
    %98 = arith.addf %94, %97 : vector<1x256xf32>
    %99 = math.tanh %98 : vector<1x256xf32>
    %cst_35 = arith.constant 1.000000e+00 : f32
    %100 = vector.broadcast %cst_35 : f32 to vector<1x256xf32>
    %101 = arith.subf %100, %93 : vector<1x256xf32>
    %102 = arith.mulf %101, %99 : vector<1x256xf32>
    %103 = arith.mulf %93, %72 : vector<1x256xf32>
    %104 = arith.addf %102, %103 : vector<1x256xf32>
    %c2_36 = arith.constant 2 : index
    %c0_37 = arith.constant 0 : index
    %105 = vector.load %arg5[%c2_36, %c0_37] : memref<10x256xf32, #tpu.memory_space<vmem>>, vector<1x256xf32>
    tpu.vector_store %arg5[%c2_36, %c0_37], %104 {strides = array<i32>} : memref<10x256xf32, #tpu.memory_space<vmem>>, vector<1x256xf32>,
    %106 = arith.truncf %104 : vector<1x256xf32> to vector<1x256xbf16>
    %c0_38 = arith.constant 0 : index
    %c0_39 = arith.constant 0 : index
    %107 = vector.load %arg6[%c0_38, %c0_39] : memref<256x768xbf16, #tpu.memory_space<vmem>>, vector<256x768xbf16>
    %cst_40 = arith.constant dense<0.000000e+00> : vector<1x768xf32>
    %108 = tpu.matmul %106, %107, %cst_40 {dimension_numbers = #tpu.dot_dimension_numbers<[1], [0], [0], [1], [0, 0, 1, 1], [], []>} : vector<1x256xbf16>, vector<256x768xbf16>, vector<1x768xf32> -> vector<1x768xf32>
    %c3 = arith.constant 3 : index
    %c0_41 = arith.constant 0 : index
    %109 = vector.load %arg7[%c3, %c0_41] : memref<10x768xf32, #tpu.memory_space<vmem>>, vector<1x768xf32>
    %110 = vector.extract_strided_slice %109 {offsets = [0, 0], sizes = [1, 256], strides = [1, 1]} : vector<1x768xf32> to vector<1x256xf32>
    %111 = vector.extract_strided_slice %108 {offsets = [0, 0], sizes = [1, 256], strides = [1, 1]} : vector<1x768xf32> to vector<1x256xf32>
    %112 = arith.addf %110, %111 : vector<1x256xf32>
    %113 = arith.negf %112 : vector<1x256xf32>
    %114 = math.exp %113 : vector<1x256xf32>
    %cst_42 = arith.constant 1.000000e+00 : f32
    %115 = vector.broadcast %cst_42 : f32 to vector<1x256xf32>
    %116 = arith.addf %115, %114 : vector<1x256xf32>
    %117 = arith.divf %115, %116 : vector<1x256xf32>
    %118 = vector.extract_strided_slice %109 {offsets = [0, 256], sizes = [1, 256], strides = [1, 1]} : vector<1x768xf32> to vector<1x256xf32>
    %119 = vector.extract_strided_slice %108 {offsets = [0, 256], sizes = [1, 256], strides = [1, 1]} : vector<1x768xf32> to vector<1x256xf32>
    %120 = arith.addf %118, %119 : vector<1x256xf32>
    %121 = arith.negf %120 : vector<1x256xf32>
    %122 = math.exp %121 : vector<1x256xf32>
    %cst_43 = arith.constant 1.000000e+00 : f32
    %123 = vector.broadcast %cst_43 : f32 to vector<1x256xf32>
    %124 = arith.addf %123, %122 : vector<1x256xf32>
    %125 = arith.divf %123, %124 : vector<1x256xf32>
    %126 = vector.extract_strided_slice %109 {offsets = [0, 512], sizes = [1, 256], strides = [1, 1]} : vector<1x768xf32> to vector<1x256xf32>
    %127 = vector.extract_strided_slice %108 {offsets = [0, 512], sizes = [1, 256], strides = [1, 1]} : vector<1x768xf32> to vector<1x256xf32>
    %128 = arith.addf %127, %8 : vector<1x256xf32>
    %129 = arith.mulf %117, %128 : vector<1x256xf32>
    %130 = arith.addf %126, %129 : vector<1x256xf32>
    %131 = math.tanh %130 : vector<1x256xf32>
    %cst_44 = arith.constant 1.000000e+00 : f32
    %132 = vector.broadcast %cst_44 : f32 to vector<1x256xf32>
    %133 = arith.subf %132, %125 : vector<1x256xf32>
    %134 = arith.mulf %133, %131 : vector<1x256xf32>
    %135 = arith.mulf %125, %104 : vector<1x256xf32>
    %136 = arith.addf %134, %135 : vector<1x256xf32>
    %c3_45 = arith.constant 3 : index
    %c0_46 = arith.constant 0 : index
    %137 = vector.load %arg5[%c3_45, %c0_46] : memref<10x256xf32, #tpu.memory_space<vmem>>, vector<1x256xf32>
    tpu.vector_store %arg5[%c3_45, %c0_46], %136 {strides = array<i32>} : memref<10x256xf32, #tpu.memory_space<vmem>>, vector<1x256xf32>,
    %138 = arith.truncf %136 : vector<1x256xf32> to vector<1x256xbf16>
    %c0_47 = arith.constant 0 : index
    %c0_48 = arith.constant 0 : index
    %139 = vector.load %arg6[%c0_47, %c0_48] : memref<256x768xbf16, #tpu.memory_space<vmem>>, vector<256x768xbf16>
    %cst_49 = arith.constant dense<0.000000e+00> : vector<1x768xf32>
    %140 = tpu.matmul %138, %139, %cst_49 {dimension_numbers = #tpu.dot_dimension_numbers<[1], [0], [0], [1], [0, 0, 1, 1], [], []>} : vector<1x256xbf16>, vector<256x768xbf16>, vector<1x768xf32> -> vector<1x768xf32>
    %c4 = arith.constant 4 : index
    %c0_50 = arith.constant 0 : index
    %141 = vector.load %arg7[%c4, %c0_50] : memref<10x768xf32, #tpu.memory_space<vmem>>, vector<1x768xf32>
    %142 = vector.extract_strided_slice %141 {offsets = [0, 0], sizes = [1, 256], strides = [1, 1]} : vector<1x768xf32> to vector<1x256xf32>
    %143 = vector.extract_strided_slice %140 {offsets = [0, 0], sizes = [1, 256], strides = [1, 1]} : vector<1x768xf32> to vector<1x256xf32>
    %144 = arith.addf %142, %143 : vector<1x256xf32>
    %145 = arith.negf %144 : vector<1x256xf32>
    %146 = math.exp %145 : vector<1x256xf32>
    %cst_51 = arith.constant 1.000000e+00 : f32
    %147 = vector.broadcast %cst_51 : f32 to vector<1x256xf32>
    %148 = arith.addf %147, %146 : vector<1x256xf32>
    %149 = arith.divf %147, %148 : vector<1x256xf32>
    %150 = vector.extract_strided_slice %141 {offsets = [0, 256], sizes = [1, 256], strides = [1, 1]} : vector<1x768xf32> to vector<1x256xf32>
    %151 = vector.extract_strided_slice %140 {offsets = [0, 256], sizes = [1, 256], strides = [1, 1]} : vector<1x768xf32> to vector<1x256xf32>
    %152 = arith.addf %150, %151 : vector<1x256xf32>
    %153 = arith.negf %152 : vector<1x256xf32>
    %154 = math.exp %153 : vector<1x256xf32>
    %cst_52 = arith.constant 1.000000e+00 : f32
    %155 = vector.broadcast %cst_52 : f32 to vector<1x256xf32>
    %156 = arith.addf %155, %154 : vector<1x256xf32>
    %157 = arith.divf %155, %156 : vector<1x256xf32>
    %158 = vector.extract_strided_slice %141 {offsets = [0, 512], sizes = [1, 256], strides = [1, 1]} : vector<1x768xf32> to vector<1x256xf32>
    %159 = vector.extract_strided_slice %140 {offsets = [0, 512], sizes = [1, 256], strides = [1, 1]} : vector<1x768xf32> to vector<1x256xf32>
    %160 = arith.addf %159, %8 : vector<1x256xf32>
    %161 = arith.mulf %149, %160 : vector<1x256xf32>
    %162 = arith.addf %158, %161 : vector<1x256xf32>
    %163 = math.tanh %162 : vector<1x256xf32>
    %cst_53 = arith.constant 1.000000e+00 : f32
    %164 = vector.broadcast %cst_53 : f32 to vector<1x256xf32>
    %165 = arith.subf %164, %157 : vector<1x256xf32>
    %166 = arith.mulf %165, %163 : vector<1x256xf32>
    %167 = arith.mulf %157, %136 : vector<1x256xf32>
    %168 = arith.addf %166, %167 : vector<1x256xf32>
    %c4_54 = arith.constant 4 : index
    %c0_55 = arith.constant 0 : index
    %169 = vector.load %arg5[%c4_54, %c0_55] : memref<10x256xf32, #tpu.memory_space<vmem>>, vector<1x256xf32>
    tpu.vector_store %arg5[%c4_54, %c0_55], %168 {strides = array<i32>} : memref<10x256xf32, #tpu.memory_space<vmem>>, vector<1x256xf32>,
    %170 = arith.truncf %168 : vector<1x256xf32> to vector<1x256xbf16>
    %c0_56 = arith.constant 0 : index
    %c0_57 = arith.constant 0 : index
    %171 = vector.load %arg6[%c0_56, %c0_57] : memref<256x768xbf16, #tpu.memory_space<vmem>>, vector<256x768xbf16>
    %cst_58 = arith.constant dense<0.000000e+00> : vector<1x768xf32>
    %172 = tpu.matmul %170, %171, %cst_58 {dimension_numbers = #tpu.dot_dimension_numbers<[1], [0], [0], [1], [0, 0, 1, 1], [], []>} : vector<1x256xbf16>, vector<256x768xbf16>, vector<1x768xf32> -> vector<1x768xf32>
    %c5 = arith.constant 5 : index
    %c0_59 = arith.constant 0 : index
    %173 = vector.load %arg7[%c5, %c0_59] : memref<10x768xf32, #tpu.memory_space<vmem>>, vector<1x768xf32>
    %174 = vector.extract_strided_slice %173 {offsets = [0, 0], sizes = [1, 256], strides = [1, 1]} : vector<1x768xf32> to vector<1x256xf32>
    %175 = vector.extract_strided_slice %172 {offsets = [0, 0], sizes = [1, 256], strides = [1, 1]} : vector<1x768xf32> to vector<1x256xf32>
    %176 = arith.addf %174, %175 : vector<1x256xf32>
    %177 = arith.negf %176 : vector<1x256xf32>
    %178 = math.exp %177 : vector<1x256xf32>
    %cst_60 = arith.constant 1.000000e+00 : f32
    %179 = vector.broadcast %cst_60 : f32 to vector<1x256xf32>
    %180 = arith.addf %179, %178 : vector<1x256xf32>
    %181 = arith.divf %179, %180 : vector<1x256xf32>
    %182 = vector.extract_strided_slice %173 {offsets = [0, 256], sizes = [1, 256], strides = [1, 1]} : vector<1x768xf32> to vector<1x256xf32>
    %183 = vector.extract_strided_slice %172 {offsets = [0, 256], sizes = [1, 256], strides = [1, 1]} : vector<1x768xf32> to vector<1x256xf32>
    %184 = arith.addf %182, %183 : vector<1x256xf32>
    %185 = arith.negf %184 : vector<1x256xf32>
    %186 = math.exp %185 : vector<1x256xf32>
    %cst_61 = arith.constant 1.000000e+00 : f32
    %187 = vector.broadcast %cst_61 : f32 to vector<1x256xf32>
    %188 = arith.addf %187, %186 : vector<1x256xf32>
    %189 = arith.divf %187, %188 : vector<1x256xf32>
    %190 = vector.extract_strided_slice %173 {offsets = [0, 512], sizes = [1, 256], strides = [1, 1]} : vector<1x768xf32> to vector<1x256xf32>
    %191 = vector.extract_strided_slice %172 {offsets = [0, 512], sizes = [1, 256], strides = [1, 1]} : vector<1x768xf32> to vector<1x256xf32>
    %192 = arith.addf %191, %8 : vector<1x256xf32>
    %193 = arith.mulf %181, %192 : vector<1x256xf32>
    %194 = arith.addf %190, %193 : vector<1x256xf32>
    %195 = math.tanh %194 : vector<1x256xf32>
    %cst_62 = arith.constant 1.000000e+00 : f32
    %196 = vector.broadcast %cst_62 : f32 to vector<1x256xf32>
    %197 = arith.subf %196, %189 : vector<1x256xf32>
    %198 = arith.mulf %197, %195 : vector<1x256xf32>
    %199 = arith.mulf %189, %168 : vector<1x256xf32>
    %200 = arith.addf %198, %199 : vector<1x256xf32>
    %c5_63 = arith.constant 5 : index
    %c0_64 = arith.constant 0 : index
    %201 = vector.load %arg5[%c5_63, %c0_64] : memref<10x256xf32, #tpu.memory_space<vmem>>, vector<1x256xf32>
    tpu.vector_store %arg5[%c5_63, %c0_64], %200 {strides = array<i32>} : memref<10x256xf32, #tpu.memory_space<vmem>>, vector<1x256xf32>,
    %202 = arith.truncf %200 : vector<1x256xf32> to vector<1x256xbf16>
    %c0_65 = arith.constant 0 : index
    %c0_66 = arith.constant 0 : index
    %203 = vector.load %arg6[%c0_65, %c0_66] : memref<256x768xbf16, #tpu.memory_space<vmem>>, vector<256x768xbf16>
    %cst_67 = arith.constant dense<0.000000e+00> : vector<1x768xf32>
    %204 = tpu.matmul %202, %203, %cst_67 {dimension_numbers = #tpu.dot_dimension_numbers<[1], [0], [0], [1], [0, 0, 1, 1], [], []>} : vector<1x256xbf16>, vector<256x768xbf16>, vector<1x768xf32> -> vector<1x768xf32>
    %c6 = arith.constant 6 : index
    %c0_68 = arith.constant 0 : index
    %205 = vector.load %arg7[%c6, %c0_68] : memref<10x768xf32, #tpu.memory_space<vmem>>, vector<1x768xf32>
    %206 = vector.extract_strided_slice %205 {offsets = [0, 0], sizes = [1, 256], strides = [1, 1]} : vector<1x768xf32> to vector<1x256xf32>
    %207 = vector.extract_strided_slice %204 {offsets = [0, 0], sizes = [1, 256], strides = [1, 1]} : vector<1x768xf32> to vector<1x256xf32>
    %208 = arith.addf %206, %207 : vector<1x256xf32>
    %209 = arith.negf %208 : vector<1x256xf32>
    %210 = math.exp %209 : vector<1x256xf32>
    %cst_69 = arith.constant 1.000000e+00 : f32
    %211 = vector.broadcast %cst_69 : f32 to vector<1x256xf32>
    %212 = arith.addf %211, %210 : vector<1x256xf32>
    %213 = arith.divf %211, %212 : vector<1x256xf32>
    %214 = vector.extract_strided_slice %205 {offsets = [0, 256], sizes = [1, 256], strides = [1, 1]} : vector<1x768xf32> to vector<1x256xf32>
    %215 = vector.extract_strided_slice %204 {offsets = [0, 256], sizes = [1, 256], strides = [1, 1]} : vector<1x768xf32> to vector<1x256xf32>
    %216 = arith.addf %214, %215 : vector<1x256xf32>
    %217 = arith.negf %216 : vector<1x256xf32>
    %218 = math.exp %217 : vector<1x256xf32>
    %cst_70 = arith.constant 1.000000e+00 : f32
    %219 = vector.broadcast %cst_70 : f32 to vector<1x256xf32>
    %220 = arith.addf %219, %218 : vector<1x256xf32>
    %221 = arith.divf %219, %220 : vector<1x256xf32>
    %222 = vector.extract_strided_slice %205 {offsets = [0, 512], sizes = [1, 256], strides = [1, 1]} : vector<1x768xf32> to vector<1x256xf32>
    %223 = vector.extract_strided_slice %204 {offsets = [0, 512], sizes = [1, 256], strides = [1, 1]} : vector<1x768xf32> to vector<1x256xf32>
    %224 = arith.addf %223, %8 : vector<1x256xf32>
    %225 = arith.mulf %213, %224 : vector<1x256xf32>
    %226 = arith.addf %222, %225 : vector<1x256xf32>
    %227 = math.tanh %226 : vector<1x256xf32>
    %cst_71 = arith.constant 1.000000e+00 : f32
    %228 = vector.broadcast %cst_71 : f32 to vector<1x256xf32>
    %229 = arith.subf %228, %221 : vector<1x256xf32>
    %230 = arith.mulf %229, %227 : vector<1x256xf32>
    %231 = arith.mulf %221, %200 : vector<1x256xf32>
    %232 = arith.addf %230, %231 : vector<1x256xf32>
    %c6_72 = arith.constant 6 : index
    %c0_73 = arith.constant 0 : index
    %233 = vector.load %arg5[%c6_72, %c0_73] : memref<10x256xf32, #tpu.memory_space<vmem>>, vector<1x256xf32>
    tpu.vector_store %arg5[%c6_72, %c0_73], %232 {strides = array<i32>} : memref<10x256xf32, #tpu.memory_space<vmem>>, vector<1x256xf32>,
    %234 = arith.truncf %232 : vector<1x256xf32> to vector<1x256xbf16>
    %c0_74 = arith.constant 0 : index
    %c0_75 = arith.constant 0 : index
    %235 = vector.load %arg6[%c0_74, %c0_75] : memref<256x768xbf16, #tpu.memory_space<vmem>>, vector<256x768xbf16>
    %cst_76 = arith.constant dense<0.000000e+00> : vector<1x768xf32>
    %236 = tpu.matmul %234, %235, %cst_76 {dimension_numbers = #tpu.dot_dimension_numbers<[1], [0], [0], [1], [0, 0, 1, 1], [], []>} : vector<1x256xbf16>, vector<256x768xbf16>, vector<1x768xf32> -> vector<1x768xf32>
    %c7 = arith.constant 7 : index
    %c0_77 = arith.constant 0 : index
    %237 = vector.load %arg7[%c7, %c0_77] : memref<10x768xf32, #tpu.memory_space<vmem>>, vector<1x768xf32>
    %238 = vector.extract_strided_slice %237 {offsets = [0, 0], sizes = [1, 256], strides = [1, 1]} : vector<1x768xf32> to vector<1x256xf32>
    %239 = vector.extract_strided_slice %236 {offsets = [0, 0], sizes = [1, 256], strides = [1, 1]} : vector<1x768xf32> to vector<1x256xf32>
    %240 = arith.addf %238, %239 : vector<1x256xf32>
    %241 = arith.negf %240 : vector<1x256xf32>
    %242 = math.exp %241 : vector<1x256xf32>
    %cst_78 = arith.constant 1.000000e+00 : f32
    %243 = vector.broadcast %cst_78 : f32 to vector<1x256xf32>
    %244 = arith.addf %243, %242 : vector<1x256xf32>
    %245 = arith.divf %243, %244 : vector<1x256xf32>
    %246 = vector.extract_strided_slice %237 {offsets = [0, 256], sizes = [1, 256], strides = [1, 1]} : vector<1x768xf32> to vector<1x256xf32>
    %247 = vector.extract_strided_slice %236 {offsets = [0, 256], sizes = [1, 256], strides = [1, 1]} : vector<1x768xf32> to vector<1x256xf32>
    %248 = arith.addf %246, %247 : vector<1x256xf32>
    %249 = arith.negf %248 : vector<1x256xf32>
    %250 = math.exp %249 : vector<1x256xf32>
    %cst_79 = arith.constant 1.000000e+00 : f32
    %251 = vector.broadcast %cst_79 : f32 to vector<1x256xf32>
    %252 = arith.addf %251, %250 : vector<1x256xf32>
    %253 = arith.divf %251, %252 : vector<1x256xf32>
    %254 = vector.extract_strided_slice %237 {offsets = [0, 512], sizes = [1, 256], strides = [1, 1]} : vector<1x768xf32> to vector<1x256xf32>
    %255 = vector.extract_strided_slice %236 {offsets = [0, 512], sizes = [1, 256], strides = [1, 1]} : vector<1x768xf32> to vector<1x256xf32>
    %256 = arith.addf %255, %8 : vector<1x256xf32>
    %257 = arith.mulf %245, %256 : vector<1x256xf32>
    %258 = arith.addf %254, %257 : vector<1x256xf32>
    %259 = math.tanh %258 : vector<1x256xf32>
    %cst_80 = arith.constant 1.000000e+00 : f32
    %260 = vector.broadcast %cst_80 : f32 to vector<1x256xf32>
    %261 = arith.subf %260, %253 : vector<1x256xf32>
    %262 = arith.mulf %261, %259 : vector<1x256xf32>
    %263 = arith.mulf %253, %232 : vector<1x256xf32>
    %264 = arith.addf %262, %263 : vector<1x256xf32>
    %c7_81 = arith.constant 7 : index
    %c0_82 = arith.constant 0 : index
    %265 = vector.load %arg5[%c7_81, %c0_82] : memref<10x256xf32, #tpu.memory_space<vmem>>, vector<1x256xf32>
    tpu.vector_store %arg5[%c7_81, %c0_82], %264 {strides = array<i32>} : memref<10x256xf32, #tpu.memory_space<vmem>>, vector<1x256xf32>,
    %266 = arith.truncf %264 : vector<1x256xf32> to vector<1x256xbf16>
    %c0_83 = arith.constant 0 : index
    %c0_84 = arith.constant 0 : index
    %267 = vector.load %arg6[%c0_83, %c0_84] : memref<256x768xbf16, #tpu.memory_space<vmem>>, vector<256x768xbf16>
    %cst_85 = arith.constant dense<0.000000e+00> : vector<1x768xf32>
    %268 = tpu.matmul %266, %267, %cst_85 {dimension_numbers = #tpu.dot_dimension_numbers<[1], [0], [0], [1], [0, 0, 1, 1], [], []>} : vector<1x256xbf16>, vector<256x768xbf16>, vector<1x768xf32> -> vector<1x768xf32>
    %c8 = arith.constant 8 : index
    %c0_86 = arith.constant 0 : index
    %269 = vector.load %arg7[%c8, %c0_86] : memref<10x768xf32, #tpu.memory_space<vmem>>, vector<1x768xf32>
    %270 = vector.extract_strided_slice %269 {offsets = [0, 0], sizes = [1, 256], strides = [1, 1]} : vector<1x768xf32> to vector<1x256xf32>
    %271 = vector.extract_strided_slice %268 {offsets = [0, 0], sizes = [1, 256], strides = [1, 1]} : vector<1x768xf32> to vector<1x256xf32>
    %272 = arith.addf %270, %271 : vector<1x256xf32>
    %273 = arith.negf %272 : vector<1x256xf32>
    %274 = math.exp %273 : vector<1x256xf32>
    %cst_87 = arith.constant 1.000000e+00 : f32
    %275 = vector.broadcast %cst_87 : f32 to vector<1x256xf32>
    %276 = arith.addf %275, %274 : vector<1x256xf32>
    %277 = arith.divf %275, %276 : vector<1x256xf32>
    %278 = vector.extract_strided_slice %269 {offsets = [0, 256], sizes = [1, 256], strides = [1, 1]} : vector<1x768xf32> to vector<1x256xf32>
    %279 = vector.extract_strided_slice %268 {offsets = [0, 256], sizes = [1, 256], strides = [1, 1]} : vector<1x768xf32> to vector<1x256xf32>
    %280 = arith.addf %278, %279 : vector<1x256xf32>
    %281 = arith.negf %280 : vector<1x256xf32>
    %282 = math.exp %281 : vector<1x256xf32>
    %cst_88 = arith.constant 1.000000e+00 : f32
    %283 = vector.broadcast %cst_88 : f32 to vector<1x256xf32>
    %284 = arith.addf %283, %282 : vector<1x256xf32>
    %285 = arith.divf %283, %284 : vector<1x256xf32>
    %286 = vector.extract_strided_slice %269 {offsets = [0, 512], sizes = [1, 256], strides = [1, 1]} : vector<1x768xf32> to vector<1x256xf32>
    %287 = vector.extract_strided_slice %268 {offsets = [0, 512], sizes = [1, 256], strides = [1, 1]} : vector<1x768xf32> to vector<1x256xf32>
    %288 = arith.addf %287, %8 : vector<1x256xf32>
    %289 = arith.mulf %277, %288 : vector<1x256xf32>
    %290 = arith.addf %286, %289 : vector<1x256xf32>
    %291 = math.tanh %290 : vector<1x256xf32>
    %cst_89 = arith.constant 1.000000e+00 : f32
    %292 = vector.broadcast %cst_89 : f32 to vector<1x256xf32>
    %293 = arith.subf %292, %285 : vector<1x256xf32>
    %294 = arith.mulf %293, %291 : vector<1x256xf32>
    %295 = arith.mulf %285, %264 : vector<1x256xf32>
    %296 = arith.addf %294, %295 : vector<1x256xf32>
    %c8_90 = arith.constant 8 : index
    %c0_91 = arith.constant 0 : index
    %297 = vector.load %arg5[%c8_90, %c0_91] : memref<10x256xf32, #tpu.memory_space<vmem>>, vector<1x256xf32>
    tpu.vector_store %arg5[%c8_90, %c0_91], %296 {strides = array<i32>} : memref<10x256xf32, #tpu.memory_space<vmem>>, vector<1x256xf32>,
    %298 = arith.truncf %296 : vector<1x256xf32> to vector<1x256xbf16>
    %c0_92 = arith.constant 0 : index
    %c0_93 = arith.constant 0 : index
    %299 = vector.load %arg6[%c0_92, %c0_93] : memref<256x768xbf16, #tpu.memory_space<vmem>>, vector<256x768xbf16>
    %cst_94 = arith.constant dense<0.000000e+00> : vector<1x768xf32>
    %300 = tpu.matmul %298, %299, %cst_94 {dimension_numbers = #tpu.dot_dimension_numbers<[1], [0], [0], [1], [0, 0, 1, 1], [], []>} : vector<1x256xbf16>, vector<256x768xbf16>, vector<1x768xf32> -> vector<1x768xf32>
    %c9 = arith.constant 9 : index
    %c0_95 = arith.constant 0 : index
    %301 = vector.load %arg7[%c9, %c0_95] : memref<10x768xf32, #tpu.memory_space<vmem>>, vector<1x768xf32>
    %302 = vector.extract_strided_slice %301 {offsets = [0, 0], sizes = [1, 256], strides = [1, 1]} : vector<1x768xf32> to vector<1x256xf32>
    %303 = vector.extract_strided_slice %300 {offsets = [0, 0], sizes = [1, 256], strides = [1, 1]} : vector<1x768xf32> to vector<1x256xf32>
    %304 = arith.addf %302, %303 : vector<1x256xf32>
    %305 = arith.negf %304 : vector<1x256xf32>
    %306 = math.exp %305 : vector<1x256xf32>
    %cst_96 = arith.constant 1.000000e+00 : f32
    %307 = vector.broadcast %cst_96 : f32 to vector<1x256xf32>
    %308 = arith.addf %307, %306 : vector<1x256xf32>
    %309 = arith.divf %307, %308 : vector<1x256xf32>
    %310 = vector.extract_strided_slice %301 {offsets = [0, 256], sizes = [1, 256], strides = [1, 1]} : vector<1x768xf32> to vector<1x256xf32>
    %311 = vector.extract_strided_slice %300 {offsets = [0, 256], sizes = [1, 256], strides = [1, 1]} : vector<1x768xf32> to vector<1x256xf32>
    %312 = arith.addf %310, %311 : vector<1x256xf32>
    %313 = arith.negf %312 : vector<1x256xf32>
    %314 = math.exp %313 : vector<1x256xf32>
    %cst_97 = arith.constant 1.000000e+00 : f32
    %315 = vector.broadcast %cst_97 : f32 to vector<1x256xf32>
    %316 = arith.addf %315, %314 : vector<1x256xf32>
    %317 = arith.divf %315, %316 : vector<1x256xf32>
    %318 = vector.extract_strided_slice %301 {offsets = [0, 512], sizes = [1, 256], strides = [1, 1]} : vector<1x768xf32> to vector<1x256xf32>
    %319 = vector.extract_strided_slice %300 {offsets = [0, 512], sizes = [1, 256], strides = [1, 1]} : vector<1x768xf32> to vector<1x256xf32>
    %320 = arith.addf %319, %8 : vector<1x256xf32>
    %321 = arith.mulf %309, %320 : vector<1x256xf32>
    %322 = arith.addf %318, %321 : vector<1x256xf32>
    %323 = math.tanh %322 : vector<1x256xf32>
    %cst_98 = arith.constant 1.000000e+00 : f32
    %324 = vector.broadcast %cst_98 : f32 to vector<1x256xf32>
    %325 = arith.subf %324, %317 : vector<1x256xf32>
    %326 = arith.mulf %325, %323 : vector<1x256xf32>
    %327 = arith.mulf %317, %296 : vector<1x256xf32>
    %328 = arith.addf %326, %327 : vector<1x256xf32>
    %c9_99 = arith.constant 9 : index
    %c0_100 = arith.constant 0 : index
    %329 = vector.load %arg5[%c9_99, %c0_100] : memref<10x256xf32, #tpu.memory_space<vmem>>, vector<1x256xf32>
    tpu.vector_store %arg5[%c9_99, %c0_100], %328 {strides = array<i32>} : memref<10x256xf32, #tpu.memory_space<vmem>>, vector<1x256xf32>,
    return
  }
}

</mosaic_0001>

<bundles_post_ra>
// kernel: tpu_custom_call.1
= control target key start
LH: loop header
LB: loop body
LE: loop exit
PB: predicated region body
PF: predicated region fallthrough
CT: control target
= control target key end

     0   :  { %10 = vsyncpa [#allocation6], 0  ;;  %s6409_s0 = inlined_call_operand.hbm [shape: f32[10,256], index: 0, kind: input, shape index: {}]   ;;  %s6410_s1 = inlined_call_operand.hbm [shape: bf16[256,768], index: 1, kind: input, shape index: {}]   ;;  %s6411_s2 = inlined_call_operand.hbm [shape: bf16[256,768], index: 2, kind: input, shape index: {}]   ;;  %s6412_s3 = inlined_call_operand.vmem [shape: f32[1,768], index: 3, kind: input, shape index: {}]   ;;  %s6413_s4 = inlined_call_operand.vmem [shape: f32[1,256], index: 4, kind: input, shape index: {}]   ;;  %s6414_s5 = inlined_call_operand.hbm [shape: f32[10,256], index: 5, kind: output, shape index: {}]  }
   0x1   :  { %11 = vsyncpa [#allocation9], 0 }
   0x2   :  { %12 = vsyncpa [#allocation7], 0  ;;  %s4532_s18 = smov [#allocation5]   ;;  %s4458_s22 = scalar_lea.hbm %s6409_s0, 512 }
   0x3   :  { %s18_s19 = sshll.u32 %s4532_s18, 4  ;;  %p4459_p0 = scmp.ne.s32.totalorder %s6409_s0, %s4458_s22  ;;  %s19_s19 = int_to_ptr.vmem [resolvable:$true] %s18_s19 }
   0x4   :  { %p4462_p1 = scmp.lt.u32.totalorder %s4458_s22, %s6409_s0 }
   0x6   :  { %p4464_p2 = pnand %p4462_p1, %p4459_p0 }
   0x8   :  { %4467 = shalt.err (!%p4464_p2)
}
   0x9   :  { %s4468_s27 = scalar_lea.vmem %s19_s19, 512  ;;  %p4473_p4 = scmp.lt.s32.totalorder %s19_s19, %s19_s19 }
   0xa   :  { %p4469_p3 = scmp.ne.s32.totalorder %s19_s19, %s4468_s27  ;;  %p4474_p5 = scmp.lt.s32.totalorder %s4468_s27, %s4468_s27 }
   0xc   :  { %p4475_p6 = por %p4474_p5, %p4473_p4 }
   0xe   :  { %p4476_p7 = pnand %p4475_p6, %p4469_p3 }
  0x10   :  { %4479 = shalt.err (!%p4476_p7)
}
  0x11   :  { %s4533_s28 = smov 256   ;;  %s4534_s29 = smov 16  }
  0x12   :  { %24 = dma.hbm_to_vmem [thread:$0]  %s6409_s0, 512, %s19_s19, [#allocation6], %s4533_s28, %s4533_s28, %s4534_s29  }
  0x13   :  { %s4535_s7 = smov [#allocation8]   ;;  %s4480_s11 = scalar_lea.hbm %s6410_s1, 12288 }
  0x14   :  { %s30_s8 = sshll.u32 %s4535_s7, 4  ;;  %p4481_p8 = scmp.ne.s32.totalorder %s6410_s1, %s4480_s11  ;;  %s31_s8 = int_to_ptr.vmem [resolvable:$true] %s30_s8 }
  0x15   :  { %p4484_p9 = scmp.lt.u32.totalorder %s4480_s11, %s6410_s1 }
  0x17   :  { %p4486_p10 = pnand %p4484_p9, %p4481_p8 }
  0x19   :  { %4489 = shalt.err (!%p4486_p10)
}
  0x1a   :  { %s4490_s16 = scalar_lea.vmem %s31_s8, 12288  ;;  %p4495_p12 = scmp.lt.s32.totalorder %s31_s8, %s31_s8 }
  0x1b   :  { %p4491_p11 = scmp.ne.s32.totalorder %s31_s8, %s4490_s16  ;;  %p4496_p13 = scmp.lt.s32.totalorder %s4490_s16, %s4490_s16 }
  0x1d   :  { %p4497_p0 = por %p4496_p13, %p4495_p12 }
  0x1f   :  { %p4498_p1 = pnand %p4497_p0, %p4491_p11 }
  0x21   :  { %4501 = shalt.err (!%p4498_p1)
}
  0x22   :  { %s4536_s0 = smov 384   ;;  %s4537_s17 = smov 24  }
  0x23   :  { %36 = dma.hbm_to_vmem [thread:$0]  %s6410_s1, 12288, %s31_s8, [#allocation9], %s4536_s0, %s4536_s0, %s4537_s17  }
  0x24   :  { %4524 = dma.done.wait [#allocation6], 512  }
  0x25   :  { %4525 = vsyncadd [#allocation6], 4294966784 }
  0x26   :  { %4526 = dma.done.wait [#allocation9], 12288  }
  0x27   :  { %4527 = vsyncadd [#allocation9], 4294955008  ;;  %s52_s20 = sld [smem:[#allocation0]]   ;;  %s4538_s21 = smov 768  }
  0x28   :  { %64 = sst [smem:[#allocation12]] %s4538_s21  ;;  %s4539_s22 = smov 6  }
  0x29   :  { %66 = sst [smem:[#allocation12 + $0x1]] %s4538_s21  ;;  %s4540_s23 = smov 64  }
  0x2a   :  { %68 = sst [smem:[#allocation12 + $0x2]] %s4539_s22  ;;  %s4541_s24 = smov 128  }
  0x2b   :  { %70 = sst [smem:[#allocation12 + $0x3]] %s4540_s23  ;;  %s4542_s25 = smov 2  }
  0x2c   :  { %72 = sst [smem:[#allocation12 + $0x4]] %s4541_s24  ;;  %s4543_s1 = smov 4  }
  0x2d   :  { %74 = sst [smem:[#allocation12 + $0x5]] %s4542_s25  ;;  %s4077_s26 = sshll.u32 %s52_s20, 26 }
  0x2e   :  { %76 = sst [smem:[#allocation12 + $0x6]] %s4536_s0  ;;  %s4078_s27 = sadd.s32 134217728, %s4077_s26 }
  0x2f   :  { %78 = sst [smem:[#allocation12 + $0x7]] %s4540_s23  ;;  %s4544_s30 = smov [#allocation2]  }
  0x30   :  { %80 = sst [smem:[#allocation12 + $0x8]] %s4543_s1  ;;  %s60_s6 = sshll.u32 %s4544_s30, 4  ;;  %s61_s6 = int_to_ptr.vmem [resolvable:$true] %s60_s6 }
  0x31   :  { %s4545_s7 = smov [#allocation4]   ;;  %s4546_s8 = smov [#allocation11]  }
  0x32   :  { %82 = dma.general %s6411_s2, 12288, %s61_s6, %s4545_s7, %s4546_s8, [#allocation12], %s4078_s27, 0  }
  0x33   :  { %v4214_v0 = vld [vmem:[#allocation8 + $0x4] ss:$24 sps:$4 sm:$0xff]   ;;  %v4216_v1 = vld [vmem:[#allocation8] ss:$24 sps:$4 sm:$0xff]   ;;  %v4217_v2 = vld [vmem:[#allocation8 + $0x34] ss:$24 sps:$4 sm:$0xff]  }
  0x34   :  { %697 = vmatprep.subr.bf16.mxu0 %v4214_v0  ;;  %v4219_v3 = vld [vmem:[#allocation8 + $0x30] ss:$24 sps:$4 sm:$0xff]   ;;  %v4220_v4 = vld [vmem:[#allocation8 + $0x64] ss:$24 sps:$4 sm:$0xff]   ;;  %v4222_v5 = vld [vmem:[#allocation8 + $0x60] ss:$24 sps:$4 sm:$0xff]  }
  0x35   :  { %698 = vmatpush1.bf16.msra.mxu0 %v4216_v1  ;;  %v4223_v6 = vld [vmem:[#allocation8 + $0x94] ss:$24 sps:$4 sm:$0xff]   ;;  %v4225_v7 = vld [vmem:[#allocation8 + $0x90] ss:$24 sps:$4 sm:$0xff]   ;;  %v4226_v8 = vld [vmem:[#allocation8 + $0xc4] ss:$24 sps:$4 sm:$0xff]  }
  0x36   :  { %699 = vmatprep.subr.bf16.mxu0 %v4217_v2  ;;  %v4228_v9 = vld [vmem:[#allocation8 + $0xc0] ss:$24 sps:$4 sm:$0xff]   ;;  %v4229_v10 = vld [vmem:[#allocation8 + $0xf4] ss:$24 sps:$4 sm:$0xff]   ;;  %v4231_v11 = vld [vmem:[#allocation8 + $0xf0] ss:$24 sps:$4 sm:$0xff]  }
  0x37   :  { %v4232_v12 = vld [vmem:[#allocation8 + $0x124] ss:$24 sps:$4 sm:$0xff]   ;;  %v4264_v14 = vld [vmem:[#allocation8 + $0x8] ss:$24 sps:$4 sm:$0xff]   ;;  %v86_v17 = vld [vmem:[#allocation5 + $0x18] sm:$0x3] }
  0x38   :  { %v4262_v13 = vld [vmem:[#allocation8 + $0xc] ss:$24 sps:$4 sm:$0xff]   ;;  %v4234_v16 = vld [vmem:[#allocation8 + $0x120] ss:$24 sps:$4 sm:$0xff]   ;;  %v4268_v20 = vld [vmem:[#allocation8 + $0x3c] ss:$24 sps:$4 sm:$0xff]  }
  0x39   :  { %700 = vmatpush1.bf16.msra.mxu0 %v4219_v3  ;;  %v84_v15 = vld [vmem:[#allocation5 + $0x8] sm:$0xff]  ;;  %740 = vmatprep.subr.bf16.mxu1 %v4262_v13  ;;  %v4270_v21 = vld [vmem:[#allocation8 + $0x38] ss:$24 sps:$4 sm:$0xff]   ;;  %v4238_v23 = vld [vmem:[#allocation8 + $0x184] ss:$24 sps:$4 sm:$0xff]  }
  0x3a   :  { %701 = vmatprep.subr.bf16.mxu0 %v4220_v4  ;;  %v4235_v18 = vld [vmem:[#allocation8 + $0x154] ss:$24 sps:$4 sm:$0xff]   ;;  %v4610_v19 = vpack.c.bf16 %v86_v17, %v84_v15  ;;  %741 = vmatpush1.bf16.msra.mxu1 %v4264_v14  ;;  %v4237_v22 = vld [vmem:[#allocation8 + $0x150] ss:$24 sps:$4 sm:$0xff]   ;;  %v4240_v26 = vld [vmem:[#allocation8 + $0x180] ss:$24 sps:$4 sm:$0xff]  }
  0x3b   :  { %742 = vmatprep.subr.bf16.mxu1 %v4268_v20  ;;  %v4274_v24 = vld [vmem:[#allocation8 + $0x6c] ss:$24 sps:$4 sm:$0xff]   ;;  %v4276_v25 = vld [vmem:[#allocation8 + $0x68] ss:$24 sps:$4 sm:$0xff]   ;;  %v4280_v27 = vld [vmem:[#allocation8 + $0x9c] ss:$24 sps:$4 sm:$0xff]  }
  0x3c   :  { %729 = vmatprep.mubr.bf16.mxu0 %v4610_v19  ;;  %772 = vmatprep.mubr.bf16.mxu1 %v4610_v19  ;;  %v4241_v28 = vld [vmem:[#allocation8 + $0x1b4] ss:$24 sps:$4 sm:$0xff]   ;;  %v4282_v29 = vld [vmem:[#allocation8 + $0x98] ss:$24 sps:$4 sm:$0xff]   ;;  %v4244_v32 = vld [vmem:[#allocation8 + $0x1e4] ss:$24 sps:$4 sm:$0xff]  }
  0x3d   :  { %702 = vmatpush1.bf16.msra.mxu0 %v4222_v5  ;;  %v4286_v30 = vld [vmem:[#allocation8 + $0xcc] ss:$24 sps:$4 sm:$0xff]   ;;  %v4243_v31 = vld [vmem:[#allocation8 + $0x1b0] ss:$24 sps:$4 sm:$0xff]   ;;  %v4292_v34 = vld [vmem:[#allocation8 + $0xfc] ss:$24 sps:$4 sm:$0xff]  }
  0x3e   :  { %703 = vmatprep.subr.bf16.mxu0 %v4223_v6  ;;  %743 = vmatpush1.bf16.msra.mxu1 %v4270_v21  ;;  %v4288_v33 = vld [vmem:[#allocation8 + $0xc8] ss:$24 sps:$4 sm:$0xff]   ;;  %v4247_v36 = vld [vmem:[#allocation8 + $0x214] ss:$24 sps:$4 sm:$0xff]   ;;  %v4294_v37 = vld [vmem:[#allocation8 + $0xf8] ss:$24 sps:$4 sm:$0xff]  }
  0x3f   :  { %744 = vmatprep.subr.bf16.mxu1 %v4274_v24  ;;  %v4246_v35 = vld [vmem:[#allocation8 + $0x1e0] ss:$24 sps:$4 sm:$0xff]   ;;  %v4298_v38 = vld [vmem:[#allocation8 + $0x12c] ss:$24 sps:$4 sm:$0xff]   ;;  %v4249_v39 = vld [vmem:[#allocation8 + $0x210] ss:$24 sps:$4 sm:$0xff]  }
  0x40   :  { %v4250_v40 = vld [vmem:[#allocation8 + $0x244] ss:$24 sps:$4 sm:$0xff]   ;;  %v4300_v41 = vld [vmem:[#allocation8 + $0x128] ss:$24 sps:$4 sm:$0xff]   ;;  %v4253_v44 = vld [vmem:[#allocation8 + $0x274] ss:$24 sps:$4 sm:$0xff]  }
  0x41   :  { %704 = vmatpush1.bf16.msra.mxu0 %v4225_v7  ;;  %v4304_v42 = vld [vmem:[#allocation8 + $0x15c] ss:$24 sps:$4 sm:$0xff]   ;;  %v4252_v43 = vld [vmem:[#allocation8 + $0x240] ss:$24 sps:$4 sm:$0xff]   ;;  %v4310_v46 = vld [vmem:[#allocation8 + $0x18c] ss:$24 sps:$4 sm:$0xff]  }
  0x42   :  { %705 = vmatprep.subr.bf16.mxu0 %v4226_v8  ;;  %745 = vmatpush1.bf16.msra.mxu1 %v4276_v25  ;;  %v4306_v45 = vld [vmem:[#allocation8 + $0x158] ss:$24 sps:$4 sm:$0xff]   ;;  %v4256_v48 = vld [vmem:[#allocation8 + $0x2a4] ss:$24 sps:$4 sm:$0xff]   ;;  %v4312_v49 = vld [vmem:[#allocation8 + $0x188] ss:$24 sps:$4 sm:$0xff]  }
  0x43   :  { %746 = vmatprep.subr.bf16.mxu1 %v4280_v27  ;;  %v4255_v47 = vld [vmem:[#allocation8 + $0x270] ss:$24 sps:$4 sm:$0xff]   ;;  %v4316_v50 = vld [vmem:[#allocation8 + $0x1bc] ss:$24 sps:$4 sm:$0xff]   ;;  %v4258_v51 = vld [vmem:[#allocation8 + $0x2a0] ss:$24 sps:$4 sm:$0xff]  }
  0x44   :  { %v4259_v52 = vld [vmem:[#allocation8 + $0x2d4] ss:$24 sps:$4 sm:$0xff]   ;;  %v4318_v53 = vld [vmem:[#allocation8 + $0x1b8] ss:$24 sps:$4 sm:$0xff]   ;;  %v83_v56 = vld [vmem:[#allocation5] sm:$0xff] }
  0x45   :  { %706 = vmatpush1.bf16.msra.mxu0 %v4228_v9  ;;  %v4261_v54 = vld [vmem:[#allocation8 + $0x2d0] ss:$24 sps:$4 sm:$0xff]   ;;  %v4322_v55 = vld [vmem:[#allocation8 + $0x1ec] ss:$24 sps:$4 sm:$0xff]   ;;  %v4328_v61 = vld [vmem:[#allocation8 + $0x21c] ss:$24 sps:$4 sm:$0xff]  }
  0x46   :  { %707 = vmatprep.subr.bf16.mxu0 %v4229_v10  ;;  %747 = vmatpush1.bf16.msra.mxu1 %v4282_v29  ;;  %v85_v57 = vld [vmem:[#allocation5 + $0x10] sm:$0x3]  ;;  %v4267_v58 = vld [vmem:[#allocation8 + $0x14] ss:$24 sps:$4 sm:$0xff]   ;;  %v4324_v59 = vld [vmem:[#allocation8 + $0x1e8] ss:$24 sps:$4 sm:$0xff]  }
  0x47   :  { %748 = vmatprep.subr.bf16.mxu1 %v4286_v30  ;;  %v4614_v60 = vpack.c.bf16 %v85_v57, %v83_v56  ;;  %v4265_v62 = vld [vmem:[#allocation8 + $0x10] ss:$24 sps:$4 sm:$0xff]   ;;  %v4273_v63 = vld [vmem:[#allocation8 + $0x44] ss:$24 sps:$4 sm:$0xff]   ;;  %v4271_v2 = vld [vmem:[#allocation8 + $0x40] ss:$24 sps:$4 sm:$0xff]  }
  0x48   :  { %v4330_v0 = vld [vmem:[#allocation8 + $0x218] ss:$24 sps:$4 sm:$0xff]   ;;  %v4334_v1 = vld [vmem:[#allocation8 + $0x24c] ss:$24 sps:$4 sm:$0xff]   ;;  %v4336_v4 = vld [vmem:[#allocation8 + $0x248] ss:$24 sps:$4 sm:$0xff]  }
  0x49   :  { %708 = vmatpush1.bf16.msra.mxu0 %v4231_v11  ;;  %v4279_v3 = vld [vmem:[#allocation8 + $0x74] ss:$24 sps:$4 sm:$0xff]   ;;  %v4277_v6 = vld [vmem:[#allocation8 + $0x70] ss:$24 sps:$4 sm:$0xff]   ;;  %v4285_v7 = vld [vmem:[#allocation8 + $0xa4] ss:$24 sps:$4 sm:$0xff]  }
  0x4a   :  { %709 = vmatprep.subr.bf16.mxu0 %v4232_v12  ;;  %749 = vmatpush1.bf16.msra.mxu1 %v4288_v33  ;;  %v4340_v5 = vld [vmem:[#allocation8 + $0x27c] ss:$24 sps:$4 sm:$0xff]   ;;  %v4342_v8 = vld [vmem:[#allocation8 + $0x278] ss:$24 sps:$4 sm:$0xff]   ;;  %v4346_v9 = vld [vmem:[#allocation8 + $0x2ac] ss:$24 sps:$4 sm:$0xff]  }
  0x4b   :  { %750 = vmatprep.subr.bf16.mxu1 %v4292_v34  ;;  %v4283_v10 = vld [vmem:[#allocation8 + $0xa0] ss:$24 sps:$4 sm:$0xff]   ;;  %v4291_v11 = vld [vmem:[#allocation8 + $0xd4] ss:$24 sps:$4 sm:$0xff]   ;;  %v4289_v14 = vld [vmem:[#allocation8 + $0xd0] ss:$24 sps:$4 sm:$0xff]  }
  0x4c   :  { %v4348_v12 = vld [vmem:[#allocation8 + $0x2a8] ss:$24 sps:$4 sm:$0xff]   ;;  %v4352_v13 = vld [vmem:[#allocation8 + $0x2dc] ss:$24 sps:$4 sm:$0xff]  }
  0x4d   :  { %710 = vmatpush1.bf16.msra.mxu0 %v4234_v16  ;;  %v4297_v15 = vld [vmem:[#allocation8 + $0x104] ss:$24 sps:$4 sm:$0xff]   ;;  %v4354_v16 = vld [vmem:[#allocation8 + $0x2d8] ss:$24 sps:$4 sm:$0xff]   ;;  %v4339_v30 = vld [vmem:[#allocation8 + $0x254] ss:$24 sps:$4 sm:$0xff]  }
  0x4e   :  { %711 = vmatprep.subr.bf16.mxu0 %v4235_v18  ;;  %751 = vmatpush1.bf16.msra.mxu1 %v4294_v37  ;;  %v4295_v17 = vld [vmem:[#allocation8 + $0x100] ss:$24 sps:$4 sm:$0xff]   ;;  %v4303_v18 = vld [vmem:[#allocation8 + $0x134] ss:$24 sps:$4 sm:$0xff]   ;;  %v4309_v20 = vld [vmem:[#allocation8 + $0x164] ss:$24 sps:$4 sm:$0xff]  }
  0x4f   :  { %752 = vmatprep.subr.bf16.mxu1 %v4298_v38  ;;  %v4307_v21 = vld [vmem:[#allocation8 + $0x160] ss:$24 sps:$4 sm:$0xff]   ;;  %v4321_v24 = vld [vmem:[#allocation8 + $0x1c4] ss:$24 sps:$4 sm:$0xff]   ;;  %v4325_v27 = vld [vmem:[#allocation8 + $0x1f0] ss:$24 sps:$4 sm:$0xff]   ;;  %v6415_v38 = vlaneseq }
  0x50   :  { %v4319_v25 = vld [vmem:[#allocation8 + $0x1c0] ss:$24 sps:$4 sm:$0xff]   ;;  %v4351_v34 = vld [vmem:[#allocation8 + $0x2b4] ss:$24 sps:$4 sm:$0xff]  }
  0x51   :  { %712 = vmatpush1.bf16.msra.mxu0 %v4237_v22  ;;  %v4315_v22 = vld [vmem:[#allocation8 + $0x194] ss:$24 sps:$4 sm:$0xff]   ;;  %v4331_v29 = vld [vmem:[#allocation8 + $0x220] ss:$24 sps:$4 sm:$0xff]  }
  0x52   :  { %713 = vmatprep.subr.bf16.mxu0 %v4238_v23  ;;  %753 = vmatpush1.bf16.msra.mxu1 %v4300_v41  ;;  %v4313_v23 = vld [vmem:[#allocation8 + $0x190] ss:$24 sps:$4 sm:$0xff]   ;;  %v4343_v33 = vld [vmem:[#allocation8 + $0x280] ss:$24 sps:$4 sm:$0xff]  }
  0x53   :  { %754 = vmatprep.subr.bf16.mxu1 %v4304_v42  ;;  %v4355_v37 = vld [vmem:[#allocation8 + $0x2e0] ss:$24 sps:$4 sm:$0xff]  }
  0x54   :  { %v185_v41 = vld [vmem:[%s6412_s3] sm:$0x3f] }
  0x55   :  { %714 = vmatpush1.bf16.msra.mxu0 %v4240_v26  ;;  %v4327_v26 = vld [vmem:[#allocation8 + $0x1f4] ss:$24 sps:$4 sm:$0xff]  }
  0x56   :  { %715 = vmatprep.subr.bf16.mxu0 %v4241_v28  ;;  %755 = vmatpush1.bf16.msra.mxu1 %v4306_v45  ;;  %v4333_v28 = vld [vmem:[#allocation8 + $0x224] ss:$24 sps:$4 sm:$0xff]  }
  0x57   :  { %756 = vmatprep.subr.bf16.mxu1 %v4310_v46 }
  0x59   :  { %716 = vmatpush1.bf16.msra.mxu0 %v4243_v31  ;;  %v4337_v31 = vld [vmem:[#allocation8 + $0x250] ss:$24 sps:$4 sm:$0xff]  }
  0x5a   :  { %717 = vmatprep.subr.bf16.mxu0 %v4244_v32  ;;  %757 = vmatpush1.bf16.msra.mxu1 %v4312_v49  ;;  %v4345_v32 = vld [vmem:[#allocation8 + $0x284] ss:$24 sps:$4 sm:$0xff]  }
  0x5b   :  { %758 = vmatprep.subr.bf16.mxu1 %v4316_v50 }
  0x5d   :  { %718 = vmatpush1.bf16.msra.mxu0 %v4246_v35  ;;  %v4349_v35 = vld [vmem:[#allocation8 + $0x2b0] ss:$24 sps:$4 sm:$0xff]  }
  0x5e   :  { %719 = vmatprep.subr.bf16.mxu0 %v4247_v36  ;;  %759 = vmatpush1.bf16.msra.mxu1 %v4318_v53  ;;  %v4357_v36 = vld [vmem:[#allocation8 + $0x2e4] ss:$24 sps:$4 sm:$0xff]  }
  0x5f   :  { %760 = vmatprep.subr.bf16.mxu1 %v4322_v55 }
  0x61   :  { %720 = vmatpush1.bf16.msra.mxu0 %v4249_v39  ;;  %v4621_v39 = vshrl.u32 %v6415_v38, 7 }
  0x62   :  { %721 = vmatprep.subr.bf16.mxu0 %v4250_v40  ;;  %761 = vmatpush1.bf16.msra.mxu1 %v4324_v59 }
  0x63   :  { %762 = vmatprep.subr.bf16.mxu1 %v4328_v61  ;;  %6669 = vst [vmem:[#allocation17_spill] sm:$0xff] %v4621_v39  ;;  %v4624_v40 = vsub.s32 0, %v4621_v39  ;;  %v4630_v42 = vsub.s32 1, %v4621_v39  ;;  %v197_v53 = vsub.s32 2, %v4621_v39 }
  0x65   :  { %722 = vmatpush1.bf16.msra.mxu0 %v4252_v43  ;;  %6670 = vst [vmem:[#allocation18_spill] sm:$0xff] %v4624_v40  ;;  %6671 = vst [vmem:[#allocation19_spill] sm:$0xff] %v4630_v42  ;;  %v190_v43 = vrot.slane %v185_v41, %v4624_v40  ;;  %v198_v55 = vrot.slane %v185_v41, %v197_v53 }
  0x66   :  { %723 = vmatprep.subr.bf16.mxu0 %v4253_v44  ;;  %763 = vmatpush1.bf16.msra.mxu1 %v4330_v0  ;;  %v194_v44 = vrot.slane %v185_v41, %v4630_v42 }
  0x67   :  { %764 = vmatprep.subr.bf16.mxu1 %v4334_v1  ;;  %v205_v1 = vsub.s32 4, %v4621_v39 }
  0x69   :  { %724 = vmatpush1.bf16.msra.mxu0 %v4255_v47 }
  0x6a   :  { %725 = vmatprep.subr.bf16.mxu0 %v4256_v48  ;;  %765 = vmatpush1.bf16.msra.mxu1 %v4336_v4 }
  0x6b   :  { %766 = vmatprep.subr.bf16.mxu1 %v4340_v5 }
  0x6d   :  { %726 = vmatpush1.bf16.msra.mxu0 %v4258_v51 }
  0x6e   :  { %727 = vmatprep.subr.bf16.mxu0 %v4259_v52  ;;  %767 = vmatpush1.bf16.msra.mxu1 %v4342_v8 }
  0x6f   :  { %768 = vmatprep.subr.bf16.mxu1 %v4346_v9 }
  0x71   :  { %728 = vmatpush1.bf16.msra.mxu0 %v4261_v54  ;;  %v201_v54 = vsub.s32 3, %v4621_v39 }
  0x72   :  { %783 = vmatprep.subr.bf16.mxu0 %v4267_v58  ;;  %769 = vmatpush1.bf16.msra.mxu1 %v4348_v12 }
  0x73   :  { %770 = vmatprep.subr.bf16.mxu1 %v4352_v13  ;;  %v202_v56 = vrot.slane %v185_v41, %v201_v54 }
  0x74   :  { %730 = vmatmul.mubr.bf16.vlgmr.msra.gmra.mrb[0].mxu0 %v4614_v60 }
  0x75   :  { %784 = vmatpush1.bf16.msra.mxu0 %v4265_v62  ;;  %815 = vmatprep.mubr.bf16.mxu0 %v4610_v19  ;;  %v4301_v19 = vld [vmem:[#allocation8 + $0x130] ss:$24 sps:$4 sm:$0xff]  }
  0x76   :  { %785 = vmatprep.subr.bf16.mxu0 %v4273_v63  ;;  %771 = vmatpush1.bf16.msra.mxu1 %v4354_v16 }
  0x79   :  { %786 = vmatpush1.bf16.msra.mxu0 %v4271_v2  ;;  %773 = vmatmul.mubr.bf16.vlgmr.msra.gmra.mrb[0].mxu1 %v4614_v60  ;;  %v209_v2 = vsub.s32 5, %v4621_v39 }
  0x7a   :  { %787 = vmatprep.subr.bf16.mxu0 %v4279_v3  ;;  %v206_v3 = vrot.slane %v185_v41, %v205_v1 }
  0x7b   :  { %v210_v4 = vrot.slane %v185_v41, %v209_v2 }
  0x7d   :  { %788 = vmatpush1.bf16.msra.mxu0 %v4277_v6 }
  0x7e   :  { %789 = vmatprep.subr.bf16.mxu0 %v4285_v7 }
  0x81   :  { %790 = vmatpush1.bf16.msra.mxu0 %v4283_v10 }
  0x82   :  { %791 = vmatprep.subr.bf16.mxu0 %v4291_v11 }
  0x85   :  { %792 = vmatpush1.bf16.msra.mxu0 %v4289_v14 }
  0x86   :  { %793 = vmatprep.subr.bf16.mxu0 %v4297_v15 }
  0x89   :  { %794 = vmatpush1.bf16.msra.mxu0 %v4295_v17 }
  0x8a   :  { %795 = vmatprep.subr.bf16.mxu0 %v4303_v18 }
  0x8d   :  { %796 = vmatpush1.bf16.msra.mxu0 %v4301_v19 }
  0x8e   :  { %797 = vmatprep.subr.bf16.mxu0 %v4309_v20 }
  0x91   :  { %798 = vmatpush1.bf16.msra.mxu0 %v4307_v21 }
  0x92   :  { %799 = vmatprep.subr.bf16.mxu0 %v4315_v22 }
  0x95   :  { %800 = vmatpush1.bf16.msra.mxu0 %v4313_v23 }
  0x96   :  { %801 = vmatprep.subr.bf16.mxu0 %v4321_v24 }
  0x99   :  { %802 = vmatpush1.bf16.msra.mxu0 %v4319_v25 }
  0x9a   :  { %803 = vmatprep.subr.bf16.mxu0 %v4327_v26 }
  0x9d   :  { %804 = vmatpush1.bf16.msra.mxu0 %v4325_v27 }
  0x9e   :  { %805 = vmatprep.subr.bf16.mxu0 %v4333_v28 }
  0xa1   :  { %806 = vmatpush1.bf16.msra.mxu0 %v4331_v29 }
  0xa2   :  { %807 = vmatprep.subr.bf16.mxu0 %v4339_v30 }
  0xa5   :  { %808 = vmatpush1.bf16.msra.mxu0 %v4337_v31 }
  0xa6   :  { %809 = vmatprep.subr.bf16.mxu0 %v4345_v32 }
  0xa9   :  { %810 = vmatpush1.bf16.msra.mxu0 %v4343_v33 }
  0xaa   :  { %811 = vmatprep.subr.bf16.mxu0 %v4351_v34 }
  0xad   :  { %812 = vmatpush1.bf16.msra.mxu0 %v4349_v35 }
  0xae   :  { %813 = vmatprep.subr.bf16.mxu0 %v4357_v36 }
  0xb1   :  { %814 = vmatpush1.bf16.msra.mxu0 %v4355_v37 }
  0xb4   :  { %816 = vmatmul.mubr.bf16.vlgmr.msra.gmra.mrb[4].mxu0 %v4614_v60 }
 0x147   :  { %v731_v45 = vpop.f32.mrb[0].mxu0 }
 0x148   :  { %v732_v46 = vadd.f32 %v731_v45, %v190_v43  ;;  %v733_v47 = vpop.f32.mrb[1].mxu0 }
 0x149   :  { %v734_v48 = vadd.f32 %v733_v47, %v194_v44  ;;  %v735_v49 = vpop.f32.mrb[2].mxu0 }
 0x14a   :  { %826 = vst [vmem:[#allocation3] sm:$0xff] %v732_v46  ;;  %v736_v50 = vadd.f32 %v735_v49, %v190_v43  ;;  %v737_v51 = vpop.f32.mrb[3].mxu0 }
 0x14b   :  { %827 = vst [vmem:[#allocation3 + $0x8] sm:$0xff] %v734_v48  ;;  %v738_v52 = vadd.f32 %v737_v51, %v194_v44 }
 0x14c   :  { %832 = vst [vmem:[#allocation3 + $0x30] sm:$0x3] %v736_v50  ;;  %v774_v57 = vpop.f32.mrb[0].mxu1 }
 0x14d   :  { %833 = vst [vmem:[#allocation3 + $0x38] sm:$0x3] %v738_v52  ;;  %v775_v58 = vadd.f32 %v774_v57, %v198_v55  ;;  %v776_v59 = vpop.f32.mrb[1].mxu1 }
 0x14e   :  { %v777_v60 = vadd.f32 %v776_v59, %v202_v56  ;;  %v778_v61 = vpop.f32.mrb[2].mxu1 }
 0x14f   :  { %828 = vst [vmem:[#allocation3 + $0x10] sm:$0xff] %v775_v58  ;;  %v779_v62 = vadd.f32 %v778_v61, %v198_v55  ;;  %v780_v63 = vpop.f32.mrb[3].mxu1 }
 0x150   :  { %829 = vst [vmem:[#allocation3 + $0x18] sm:$0xff] %v777_v60  ;;  %v781_v0 = vadd.f32 %v780_v63, %v202_v56 }
 0x151   :  { %834 = vst [vmem:[#allocation3 + $0x40] sm:$0x3] %v779_v62 }
 0x152   :  { %835 = vst [vmem:[#allocation3 + $0x48] sm:$0x3] %v781_v0 }
 0x187   :  { %v817_v5 = vpop.f32.mrb[4].mxu0 }
 0x188   :  { %v818_v6 = vadd.f32 %v817_v5, %v206_v3  ;;  %v819_v7 = vpop.f32.mrb[5].mxu0 }
 0x189   :  { %v820_v8 = vadd.f32 %v819_v7, %v210_v4  ;;  %v821_v9 = vpop.f32.mrb[6].mxu0 }
 0x18a   :  { %830 = vst [vmem:[#allocation3 + $0x20] sm:$0xff] %v818_v6  ;;  %v822_v10 = vadd.f32 %v821_v9, %v206_v3  ;;  %v823_v11 = vpop.f32.mrb[7].mxu0 }
 0x18b   :  { %831 = vst [vmem:[#allocation3 + $0x28] sm:$0xff] %v820_v8  ;;  %v824_v12 = vadd.f32 %v823_v11, %v210_v4 }
 0x18c   :  { %836 = vst [vmem:[#allocation3 + $0x50] sm:$0x3] %v822_v10 }
 0x18d   :  { %837 = vst [vmem:[#allocation3 + $0x58] sm:$0x3] %v824_v12 }
 0x18e   :  { %4528 = dma.done.wait [#allocation4], 12288 }
 0x18f   :  { %4529 = vsyncadd [#allocation4], 4294955008  ;;  %v6416_v13 = vmov 0   ;;  %v4640_v14 = vld [vmem:[#allocation2 + $0x8] sm:$0xff]  ;;  %v4642_v15 = vld [vmem:[#allocation2] sm:$0xff] }
 0x190   :  { %971 = vmatprep.mubr.bf16.mxu1 %v6416_v13  ;;  %1012 = vmatprep.mubr.bf16.mxu0 %v6416_v13  ;;  %v4644_v16 = vld [vmem:[#allocation2 + $0x38] sm:$0xff]  ;;  %v4649_v17 = vld [vmem:[#allocation2 + $0x30] sm:$0xff]  ;;  %v4651_v18 = vld [vmem:[#allocation2 + $0x68] sm:$0xff] }
 0x191   :  { %939 = vmatprep.subr.bf16.mxu1 %v4640_v14  ;;  %v4655_v19 = vld [vmem:[#allocation2 + $0x60] sm:$0xff]  ;;  %v4657_v20 = vld [vmem:[#allocation2 + $0x98] sm:$0xff]  ;;  %v4662_v22 = vld [vmem:[#allocation2 + $0x10] sm:$0xff] }
 0x192   :  { %940 = vmatpush1.bf16.msra.mxu1 %v4642_v15  ;;  %v4659_v21 = vld [vmem:[#allocation2 + $0x18] sm:$0xff]  ;;  %v4664_v23 = vld [vmem:[#allocation2 + $0x48] sm:$0xff]  ;;  %v4669_v24 = vld [vmem:[#allocation2 + $0x90] sm:$0xff] }
 0x193   :  { %941 = vmatprep.subr.bf16.mxu1 %v4644_v16  ;;  %980 = vmatprep.subr.bf16.mxu0 %v4659_v21  ;;  %v4672_v25 = vld [vmem:[#allocation2 + $0x40] sm:$0xff]  ;;  %v4674_v26 = vld [vmem:[#allocation2 + $0xc8] sm:$0xff]  ;;  %v4676_v27 = vld [vmem:[#allocation2 + $0x78] sm:$0xff] }
 0x194   :  { %981 = vmatpush1.bf16.msra.mxu0 %v4662_v22  ;;  %v4681_v28 = vld [vmem:[#allocation2 + $0xc0] sm:$0xff]  ;;  %v4684_v29 = vld [vmem:[#allocation2 + $0x70] sm:$0xff]  ;;  %v4686_v30 = vld [vmem:[#allocation2 + $0xf8] sm:$0xff] }
 0x195   :  { %982 = vmatprep.subr.bf16.mxu0 %v4664_v23  ;;  %v4688_v31 = vld [vmem:[#allocation2 + $0xa8] sm:$0xff]  ;;  %v4693_v32 = vld [vmem:[#allocation2 + $0xf0] sm:$0xff]  ;;  %v4696_v33 = vld [vmem:[#allocation2 + $0xa0] sm:$0xff] }
 0x196   :  { %942 = vmatpush1.bf16.msra.mxu1 %v4649_v17  ;;  %v4698_v34 = vld [vmem:[#allocation2 + $0x128] sm:$0xff]  ;;  %v4700_v35 = vld [vmem:[#allocation2 + $0xd8] sm:$0xff]  ;;  %v4705_v36 = vld [vmem:[#allocation2 + $0x120] sm:$0xff] }
 0x197   :  { %943 = vmatprep.subr.bf16.mxu1 %v4651_v18  ;;  %v4708_v37 = vld [vmem:[#allocation2 + $0xd0] sm:$0xff]  ;;  %v4710_v41 = vld [vmem:[#allocation2 + $0x158] sm:$0xff]  ;;  %v4712_v43 = vld [vmem:[#allocation2 + $0x108] sm:$0xff] }
 0x198   :  { %983 = vmatpush1.bf16.msra.mxu0 %v4672_v25  ;;  %v4717_v44 = vld [vmem:[#allocation2 + $0x150] sm:$0xff]  ;;  %v4720_v45 = vld [vmem:[#allocation2 + $0x100] sm:$0xff]  ;;  %v4722_v46 = vld [vmem:[#allocation2 + $0x188] sm:$0xff] }
 0x199   :  { %984 = vmatprep.subr.bf16.mxu0 %v4676_v27  ;;  %v4724_v47 = vld [vmem:[#allocation2 + $0x138] sm:$0xff]  ;;  %v4729_v48 = vld [vmem:[#allocation2 + $0x180] sm:$0xff]  ;;  %v4732_v49 = vld [vmem:[#allocation2 + $0x130] sm:$0xff] }
 0x19a   :  { %944 = vmatpush1.bf16.msra.mxu1 %v4655_v19  ;;  %v4734_v50 = vld [vmem:[#allocation2 + $0x1b8] sm:$0xff]  ;;  %v4736_v51 = vld [vmem:[#allocation2 + $0x168] sm:$0xff]  ;;  %v4741_v52 = vld [vmem:[#allocation2 + $0x1b0] sm:$0xff] }
 0x19b   :  { %945 = vmatprep.subr.bf16.mxu1 %v4657_v20  ;;  %6672 = vst [vmem:[#allocation20_spill] sm:$0xff] %v4736_v51  ;;  %v4744_v53 = vld [vmem:[#allocation2 + $0x160] sm:$0xff]  ;;  %v4746_v54 = vld [vmem:[#allocation2 + $0x1e8] sm:$0xff]  ;;  %v4748_v55 = vld [vmem:[#allocation2 + $0x198] sm:$0xff] }
 0x19c   :  { %985 = vmatpush1.bf16.msra.mxu0 %v4684_v29  ;;  %6673 = vst [vmem:[#allocation21_spill] sm:$0xff] %v4744_v53  ;;  %6674 = vst [vmem:[#allocation22_spill] sm:$0xff] %v4748_v55  ;;  %v4753_v56 = vld [vmem:[#allocation2 + $0x1e0] sm:$0xff]  ;;  %v4756_v57 = vld [vmem:[#allocation2 + $0x190] sm:$0xff] }
 0x19d   :  { %986 = vmatprep.subr.bf16.mxu0 %v4688_v31  ;;  %6675 = vst [vmem:[#allocation23_spill] sm:$0xff] %v4756_v57  ;;  %v4758_v58 = vld [vmem:[#allocation2 + $0x218] sm:$0xff]  ;;  %v4760_v59 = vld [vmem:[#allocation2 + $0x1c8] sm:$0xff]  ;;  %v4765_v60 = vld [vmem:[#allocation2 + $0x210] sm:$0xff] }
 0x19e   :  { %946 = vmatpush1.bf16.msra.mxu1 %v4669_v24  ;;  %6676 = vst [vmem:[#allocation24_spill] sm:$0xff] %v4760_v59  ;;  %v4768_v61 = vld [vmem:[#allocation2 + $0x1c0] sm:$0xff]  ;;  %v4770_v62 = vld [vmem:[#allocation2 + $0x248] sm:$0xff]  ;;  %v4772_v63 = vld [vmem:[#allocation2 + $0x1f8] sm:$0xff] }
 0x19f   :  { %947 = vmatprep.subr.bf16.mxu1 %v4674_v26  ;;  %6677 = vst [vmem:[#allocation25_spill] sm:$0xff] %v4768_v61  ;;  %6678 = vst [vmem:[#allocation26_spill] sm:$0xff] %v4772_v63  ;;  %v4777_v0 = vld [vmem:[#allocation2 + $0x240] sm:$0xff]  ;;  %v4780_v1 = vld [vmem:[#allocation2 + $0x1f0] sm:$0xff] }
 0x1a0   :  { %987 = vmatpush1.bf16.msra.mxu0 %v4696_v33  ;;  %6679 = vst [vmem:[#allocation27_spill] sm:$0xff] %v4780_v1  ;;  %v4782_v2 = vld [vmem:[#allocation2 + $0x278] sm:$0xff]  ;;  %v4784_v3 = vld [vmem:[#allocation2 + $0x228] sm:$0xff]  ;;  %v4789_v4 = vld [vmem:[#allocation2 + $0x270] sm:$0xff] }
 0x1a1   :  { %988 = vmatprep.subr.bf16.mxu0 %v4700_v35  ;;  %6680 = vst [vmem:[#allocation28_spill] sm:$0xff] %v4784_v3  ;;  %v4792_v5 = vld [vmem:[#allocation2 + $0x220] sm:$0xff]  ;;  %v4794_v6 = vld [vmem:[#allocation2 + $0x2a8] sm:$0xff]  ;;  %v4796_v7 = vld [vmem:[#allocation2 + $0x258] sm:$0xff] }
 0x1a2   :  { %948 = vmatpush1.bf16.msra.mxu1 %v4681_v28  ;;  %6681 = vst [vmem:[#allocation29_spill] sm:$0xff] %v4792_v5  ;;  %6682 = vst [vmem:[#allocation30_spill] sm:$0xff] %v4796_v7  ;;  %v4801_v8 = vld [vmem:[#allocation2 + $0x2a0] sm:$0xff]  ;;  %v4804_v9 = vld [vmem:[#allocation2 + $0x250] sm:$0xff] }
 0x1a3   :  { %949 = vmatprep.subr.bf16.mxu1 %v4686_v30  ;;  %6683 = vst [vmem:[#allocation31_spill] sm:$0xff] %v4804_v9  ;;  %v4806_v10 = vld [vmem:[#allocation2 + $0x2d8] sm:$0xff]  ;;  %v4808_v11 = vld [vmem:[#allocation2 + $0x288] sm:$0xff]  ;;  %v4813_v12 = vld [vmem:[#allocation2 + $0x2d0] sm:$0xff] }
 0x1a4   :  { %989 = vmatpush1.bf16.msra.mxu0 %v4708_v37  ;;  %6684 = vst [vmem:[#allocation32_spill] sm:$0xff] %v4808_v11  ;;  %v4816_v38 = vld [vmem:[#allocation2 + $0x280] sm:$0xff]  ;;  %v4818_v13 = vld [vmem:[#allocation2 + $0x28] sm:$0xff]  ;;  %v4820_v42 = vld [vmem:[#allocation2 + $0x2b8] sm:$0xff] }
 0x1a5   :  { %990 = vmatprep.subr.bf16.mxu0 %v4712_v43  ;;  %6685 = vst [vmem:[#allocation33_spill] sm:$0xff] %v4816_v38  ;;  %6686 = vst [vmem:[#allocation34_spill] sm:$0xff] %v4820_v42  ;;  %v4825_v40 = vld [vmem:[#allocation2 + $0x20] sm:$0xff]  ;;  %v4828_v39 = vld [vmem:[#allocation2 + $0x2b0] sm:$0xff] }
 0x1a6   :  { %950 = vmatpush1.bf16.msra.mxu1 %v4693_v32  ;;  %6687 = vst [vmem:[#allocation35_spill] sm:$0xff] %v4825_v40  ;;  %6688 = vst [vmem:[#allocation36_spill] sm:$0xff] %v4828_v39 }
 0x1a7   :  { %951 = vmatprep.subr.bf16.mxu1 %v4698_v34 }
 0x1a8   :  { %991 = vmatpush1.bf16.msra.mxu0 %v4720_v45 }
 0x1a9   :  { %992 = vmatprep.subr.bf16.mxu0 %v4724_v47 }
 0x1aa   :  { %952 = vmatpush1.bf16.msra.mxu1 %v4705_v36 }
 0x1ab   :  { %953 = vmatprep.subr.bf16.mxu1 %v4710_v41 }
 0x1ac   :  { %993 = vmatpush1.bf16.msra.mxu0 %v4732_v49 }
 0x1ad   :  { %994 = vmatprep.subr.bf16.mxu0 %v4736_v51 }
 0x1ae   :  { %954 = vmatpush1.bf16.msra.mxu1 %v4717_v44 }
 0x1af   :  { %955 = vmatprep.subr.bf16.mxu1 %v4722_v46 }
 0x1b0   :  { %995 = vmatpush1.bf16.msra.mxu0 %v4744_v53 }
 0x1b1   :  { %996 = vmatprep.subr.bf16.mxu0 %v4748_v55 }
 0x1b2   :  { %956 = vmatpush1.bf16.msra.mxu1 %v4729_v48 }
 0x1b3   :  { %957 = vmatprep.subr.bf16.mxu1 %v4734_v50 }
 0x1b4   :  { %997 = vmatpush1.bf16.msra.mxu0 %v4756_v57 }
 0x1b5   :  { %998 = vmatprep.subr.bf16.mxu0 %v4760_v59 }
 0x1b6   :  { %958 = vmatpush1.bf16.msra.mxu1 %v4741_v52 }
 0x1b7   :  { %959 = vmatprep.subr.bf16.mxu1 %v4746_v54 }
 0x1b8   :  { %999 = vmatpush1.bf16.msra.mxu0 %v4768_v61 }
 0x1b9   :  { %1000 = vmatprep.subr.bf16.mxu0 %v4772_v63 }
 0x1ba   :  { %960 = vmatpush1.bf16.msra.mxu1 %v4753_v56 }
 0x1bb   :  { %961 = vmatprep.subr.bf16.mxu1 %v4758_v58 }
 0x1bc   :  { %1001 = vmatpush1.bf16.msra.mxu0 %v4780_v1 }
 0x1bd   :  { %1002 = vmatprep.subr.bf16.mxu0 %v4784_v3 }
 0x1be   :  { %962 = vmatpush1.bf16.msra.mxu1 %v4765_v60 }
 0x1bf   :  { %963 = vmatprep.subr.bf16.mxu1 %v4770_v62 }
 0x1c0   :  { %1003 = vmatpush1.bf16.msra.mxu0 %v4792_v5  ;;  %v4841_v5 = vld [vmem:[#allocation2 + $0x2e0] sm:$0xff] }
 0x1c1   :  { %1004 = vmatprep.subr.bf16.mxu0 %v4796_v7  ;;  %v6691_v7 = vmov 0   ;;  %6693 = vst [vmem:[#allocation40_spill] sm:$0xff] %v4841_v5 }
 0x1c2   :  { %964 = vmatpush1.bf16.msra.mxu1 %v4777_v0 }
 0x1c3   :  { %965 = vmatprep.subr.bf16.mxu1 %v4782_v2 }
 0x1c4   :  { %1005 = vmatpush1.bf16.msra.mxu0 %v4804_v9  ;;  %v4830_v9 = vld [vmem:[#allocation2 + $0x58] sm:$0xff] }
 0x1c5   :  { %1006 = vmatprep.subr.bf16.mxu0 %v4808_v11  ;;  %6689 = vst [vmem:[#allocation37_spill] sm:$0xff] %v4830_v9  ;;  %v4832_v11 = vld [vmem:[#allocation2 + $0x2e8] sm:$0xff] }
 0x1c6   :  { %966 = vmatpush1.bf16.msra.mxu1 %v4789_v4  ;;  %6690 = vst [vmem:[#allocation38_spill] sm:$0xff] %v4832_v11 }
 0x1c7   :  { %967 = vmatprep.subr.bf16.mxu1 %v4794_v6 }
 0x1c8   :  { %1007 = vmatpush1.bf16.msra.mxu0 %v4816_v38  ;;  %v4838_v38 = vld [vmem:[#allocation2 + $0x50] sm:$0xff] }
 0x1c9   :  { %1008 = vmatprep.subr.bf16.mxu0 %v4820_v42  ;;  %6692 = vst [vmem:[#allocation39_spill] sm:$0xff] %v4838_v38  ;;  %v4843_v42 = vld [vmem:[#allocation2 + $0x88] sm:$0xff] }
 0x1ca   :  { %968 = vmatpush1.bf16.msra.mxu1 %v4801_v8  ;;  %6694 = vst [vmem:[#allocation41_spill] sm:$0xff] %v4843_v42 }
 0x1cb   :  { %969 = vmatprep.subr.bf16.mxu1 %v4806_v10 }
 0x1cc   :  { %1009 = vmatpush1.bf16.msra.mxu0 %v4828_v39 }
 0x1cd   :  { %1010 = vmatprep.subr.bf16.mxu0 %v4832_v11  ;;  %v4858_v11 = vld [vmem:[#allocation2 + $0xb0] sm:$0xff] }
 0x1ce   :  { %970 = vmatpush1.bf16.msra.mxu1 %v4813_v12  ;;  %6697 = vst [vmem:[#allocation44_spill] sm:$0xff] %v4858_v11 }
 0x1cf   :  { %1021 = vmatprep.subr.bf16.mxu1 %v4818_v13 }
 0x1d0   :  { %1011 = vmatpush1.bf16.msra.mxu0 %v4841_v5 }
 0x1d1   :  { %972 = vmatmul.mubr.bf16.vlgmr.msra.gmra.mrb[4].mxu1 %v6691_v7  ;;  %1273 = vmatprep.subr.bf16.mxu0 %v4640_v14 }
 0x1d2   :  { %1022 = vmatpush1.bf16.msra.mxu1 %v4825_v40  ;;  %1053 = vmatprep.mubr.bf16.mxu1 %v6691_v7  ;;  %v4849_v40 = vld [vmem:[#allocation2 + $0x80] sm:$0xff] }
 0x1d3   :  { %1023 = vmatprep.subr.bf16.mxu1 %v4830_v9  ;;  %6695 = vst [vmem:[#allocation42_spill] sm:$0xff] %v4849_v40  ;;  %v4852_v9 = vld [vmem:[#allocation2 + $0xb8] sm:$0xff]  ;;  %1013 = vmatmul.mubr.bf16.vlgmr.msra.gmra.mrb[8].mxu0 %v6691_v7 }
 0x1d4   :  { %6696 = vst [vmem:[#allocation43_spill] sm:$0xff] %v4852_v9  ;;  %1274 = vmatpush1.bf16.msra.mxu0 %v4642_v15 }
 0x1d5   :  { %1275 = vmatprep.subr.bf16.mxu0 %v4644_v16 }
 0x1d6   :  { %1024 = vmatpush1.bf16.msra.mxu1 %v4838_v38  ;;  %v4861_v38 = vld [vmem:[#allocation2 + $0xe8] sm:$0xff] }
 0x1d7   :  { %1025 = vmatprep.subr.bf16.mxu1 %v4843_v42  ;;  %6698 = vst [vmem:[#allocation45_spill] sm:$0xff] %v4861_v38  ;;  %v4866_v42 = vld [vmem:[#allocation2 + $0xe0] sm:$0xff] }
 0x1d8   :  { %1276 = vmatpush1.bf16.msra.mxu0 %v4649_v17  ;;  %6699 = vst [vmem:[#allocation46_spill] sm:$0xff] %v4866_v42 }
 0x1d9   :  { %1277 = vmatprep.subr.bf16.mxu0 %v4651_v18 }
 0x1da   :  { %1026 = vmatpush1.bf16.msra.mxu1 %v4849_v40  ;;  %v4869_v40 = vld [vmem:[#allocation2 + $0x118] sm:$0xff] }
 0x1db   :  { %1027 = vmatprep.subr.bf16.mxu1 %v4852_v9  ;;  %6700 = vst [vmem:[#allocation47_spill] sm:$0xff] %v4869_v40  ;;  %v4874_v9 = vld [vmem:[#allocation2 + $0x110] sm:$0xff] }
 0x1dc   :  { %1278 = vmatpush1.bf16.msra.mxu0 %v4655_v19  ;;  %6701 = vst [vmem:[#allocation48_spill] sm:$0xff] %v4874_v9 }
 0x1dd   :  { %1279 = vmatprep.subr.bf16.mxu0 %v4657_v20 }
 0x1de   :  { %1028 = vmatpush1.bf16.msra.mxu1 %v4858_v11  ;;  %v4877_v11 = vld [vmem:[#allocation2 + $0x148] sm:$0xff] }
 0x1df   :  { %1029 = vmatprep.subr.bf16.mxu1 %v4861_v38  ;;  %6702 = vst [vmem:[#allocation49_spill] sm:$0xff] %v4877_v11  ;;  %v4882_v38 = vld [vmem:[#allocation2 + $0x140] sm:$0xff] }
 0x1e0   :  { %1280 = vmatpush1.bf16.msra.mxu0 %v4669_v24  ;;  %6703 = vst [vmem:[#allocation50_spill] sm:$0xff] %v4882_v38 }
 0x1e1   :  { %1281 = vmatprep.subr.bf16.mxu0 %v4674_v26 }
 0x1e2   :  { %1030 = vmatpush1.bf16.msra.mxu1 %v4866_v42  ;;  %v4885_v42 = vld [vmem:[#allocation2 + $0x178] sm:$0xff] }
 0x1e3   :  { %1031 = vmatprep.subr.bf16.mxu1 %v4869_v40  ;;  %6704 = vst [vmem:[#allocation51_spill] sm:$0xff] %v4885_v42  ;;  %v4890_v40 = vld [vmem:[#allocation2 + $0x170] sm:$0xff] }
 0x1e4   :  { %1282 = vmatpush1.bf16.msra.mxu0 %v4681_v28  ;;  %6705 = vst [vmem:[#allocation52_spill] sm:$0xff] %v4890_v40 }
 0x1e5   :  { %1283 = vmatprep.subr.bf16.mxu0 %v4686_v30 }
 0x1e6   :  { %1032 = vmatpush1.bf16.msra.mxu1 %v4874_v9  ;;  %v4893_v9 = vld [vmem:[#allocation2 + $0x1a8] sm:$0xff] }
 0x1e7   :  { %1033 = vmatprep.subr.bf16.mxu1 %v4877_v11  ;;  %6706 = vst [vmem:[#allocation53_spill] sm:$0xff] %v4893_v9  ;;  %v4898_v11 = vld [vmem:[#allocation2 + $0x1a0] sm:$0xff] }
 0x1e8   :  { %1284 = vmatpush1.bf16.msra.mxu0 %v4693_v32  ;;  %6707 = vst [vmem:[#allocation54_spill] sm:$0xff] %v4898_v11 }
 0x1e9   :  { %1285 = vmatprep.subr.bf16.mxu0 %v4698_v34 }
 0x1ea   :  { %1034 = vmatpush1.bf16.msra.mxu1 %v4882_v38  ;;  %v4901_v38 = vld [vmem:[#allocation2 + $0x1d8] sm:$0xff] }
 0x1eb   :  { %1035 = vmatprep.subr.bf16.mxu1 %v4885_v42  ;;  %6708 = vst [vmem:[#allocation55_spill] sm:$0xff] %v4901_v38  ;;  %v4906_v42 = vld [vmem:[#allocation2 + $0x1d0] sm:$0xff] }
 0x1ec   :  { %1286 = vmatpush1.bf16.msra.mxu0 %v4705_v36  ;;  %6709 = vst [vmem:[#allocation56_spill] sm:$0xff] %v4906_v42 }
 0x1ed   :  { %1287 = vmatprep.subr.bf16.mxu0 %v4710_v41 }
 0x1ee   :  { %1036 = vmatpush1.bf16.msra.mxu1 %v4890_v40  ;;  %v4909_v40 = vld [vmem:[#allocation2 + $0x208] sm:$0xff] }
 0x1ef   :  { %1037 = vmatprep.subr.bf16.mxu1 %v4893_v9  ;;  %v4914_v9 = vld [vmem:[#allocation2 + $0x200] sm:$0xff] }
 0x1f0   :  { %1288 = vmatpush1.bf16.msra.mxu0 %v4717_v44  ;;  %6710 = vst [vmem:[#allocation57_spill] sm:$0xff] %v4914_v9 }
 0x1f1   :  { %1289 = vmatprep.subr.bf16.mxu0 %v4722_v46  ;;  %v4930_v46 = vld [vmem:[#allocation2 + $0x260] sm:$0xff] }
 0x1f2   :  { %1038 = vmatpush1.bf16.msra.mxu1 %v4898_v11  ;;  %v4917_v11 = vld [vmem:[#allocation2 + $0x238] sm:$0xff] }
 0x1f3   :  { %1039 = vmatprep.subr.bf16.mxu1 %v4901_v38  ;;  %v4922_v38 = vld [vmem:[#allocation2 + $0x230] sm:$0xff] }
 0x1f4   :  { %1290 = vmatpush1.bf16.msra.mxu0 %v4729_v48  ;;  %v4938_v48 = vld [vmem:[#allocation2 + $0x290] sm:$0xff] }
 0x1f5   :  { %1291 = vmatprep.subr.bf16.mxu0 %v4734_v50  ;;  %v4941_v50 = vld [vmem:[#allocation2 + $0x2c8] sm:$0xff] }
 0x1f6   :  { %1040 = vmatpush1.bf16.msra.mxu1 %v4906_v42  ;;  %v4925_v42 = vld [vmem:[#allocation2 + $0x268] sm:$0xff] }
 0x1f7   :  { %1041 = vmatprep.subr.bf16.mxu1 %v4909_v40 }
 0x1f8   :  { %1292 = vmatpush1.bf16.msra.mxu0 %v4741_v52  ;;  %v4946_v52 = vld [vmem:[#allocation2 + $0x2c0] sm:$0xff] }
 0x1f9   :  { %1293 = vmatprep.subr.bf16.mxu0 %v4746_v54  ;;  %v4949_v54 = vld [vmem:[#allocation2 + $0x2f8] sm:$0xff] }
 0x1fa   :  { %1042 = vmatpush1.bf16.msra.mxu1 %v4914_v9  ;;  %v4933_v9 = vld [vmem:[#allocation2 + $0x298] sm:$0xff] }
 0x1fb   :  { %1043 = vmatprep.subr.bf16.mxu1 %v4917_v11 }
 0x1fc   :  { %1294 = vmatpush1.bf16.msra.mxu0 %v4753_v56  ;;  %v4954_v56 = vld [vmem:[#allocation2 + $0x2f0] sm:$0xff] }
 0x1fd   :  { %1295 = vmatprep.subr.bf16.mxu0 %v4758_v58  ;;  %v6712_v58 = vld [vmem:[#allocation30_spill] sm:$0xff] }
 0x1fe   :  { %1044 = vmatpush1.bf16.msra.mxu1 %v4922_v38 }
 0x1ff   :  { %1045 = vmatprep.subr.bf16.mxu1 %v4925_v42 }
 0x200   :  { %1296 = vmatpush1.bf16.msra.mxu0 %v4765_v60  ;;  %v6713_v60 = vld [vmem:[#allocation31_spill] sm:$0xff] }
 0x201   :  { %1297 = vmatprep.subr.bf16.mxu0 %v4770_v62  ;;  %v6714_v62 = vld [vmem:[#allocation32_spill] sm:$0xff] }
 0x202   :  { %1046 = vmatpush1.bf16.msra.mxu1 %v4930_v46 }
 0x203   :  { %1047 = vmatprep.subr.bf16.mxu1 %v4933_v9 }
 0x204   :  { %1298 = vmatpush1.bf16.msra.mxu0 %v4777_v0  ;;  %v6715_v0 = vld [vmem:[#allocation33_spill] sm:$0xff] }
 0x205   :  { %1299 = vmatprep.subr.bf16.mxu0 %v4782_v2  ;;  %v6716_v2 = vld [vmem:[#allocation34_spill] sm:$0xff] }
 0x206   :  { %1048 = vmatpush1.bf16.msra.mxu1 %v4938_v48 }
 0x207   :  { %1049 = vmatprep.subr.bf16.mxu1 %v4941_v50 }
 0x208   :  { %1300 = vmatpush1.bf16.msra.mxu0 %v4789_v4  ;;  %v6717_v4 = vld [vmem:[#allocation38_spill] sm:$0xff] }
 0x209   :  { %1301 = vmatprep.subr.bf16.mxu0 %v4794_v6 }
 0x20a   :  { %1050 = vmatpush1.bf16.msra.mxu1 %v4946_v52 }
 0x20b   :  { %1051 = vmatprep.subr.bf16.mxu1 %v4949_v54 }
 0x20c   :  { %1302 = vmatpush1.bf16.msra.mxu0 %v4801_v8 }
 0x20d   :  { %1303 = vmatprep.subr.bf16.mxu0 %v4806_v10 }
 0x20e   :  { %1052 = vmatpush1.bf16.msra.mxu1 %v4954_v56 }
 0x20f   :  { %1314 = vmatprep.subr.bf16.mxu1 %v4659_v21 }
 0x210   :  { %1304 = vmatpush1.bf16.msra.mxu0 %v4813_v12 }
 0x211   :  { %1054 = vmatmul.mubr.bf16.vlgmr.msra.gmra.mrb[8].mxu1 %v6691_v7  ;;  %1355 = vmatprep.subr.bf16.mxu0 %v4818_v13  ;;  %v6711_v13 = vld [vmem:[#allocation29_spill] sm:$0xff] }
 0x212   :  { %1315 = vmatpush1.bf16.msra.mxu1 %v4662_v22 }
 0x213   :  { %1316 = vmatprep.subr.bf16.mxu1 %v4664_v23 }
 0x216   :  { %1317 = vmatpush1.bf16.msra.mxu1 %v4672_v25 }
 0x217   :  { %1318 = vmatprep.subr.bf16.mxu1 %v4676_v27 }
 0x21a   :  { %1319 = vmatpush1.bf16.msra.mxu1 %v4684_v29 }
 0x21b   :  { %1320 = vmatprep.subr.bf16.mxu1 %v4688_v31 }
 0x21e   :  { %1321 = vmatpush1.bf16.msra.mxu1 %v4696_v33 }
 0x21f   :  { %1322 = vmatprep.subr.bf16.mxu1 %v4700_v35 }
 0x222   :  { %1323 = vmatpush1.bf16.msra.mxu1 %v4708_v37 }
 0x223   :  { %1324 = vmatprep.subr.bf16.mxu1 %v4712_v43 }
 0x226   :  { %1325 = vmatpush1.bf16.msra.mxu1 %v4720_v45 }
 0x227   :  { %1326 = vmatprep.subr.bf16.mxu1 %v4724_v47 }
 0x22a   :  { %1327 = vmatpush1.bf16.msra.mxu1 %v4732_v49 }
 0x22b   :  { %1328 = vmatprep.subr.bf16.mxu1 %v4736_v51 }
 0x22e   :  { %1329 = vmatpush1.bf16.msra.mxu1 %v4744_v53 }
 0x22f   :  { %1330 = vmatprep.subr.bf16.mxu1 %v4748_v55 }
 0x232   :  { %1331 = vmatpush1.bf16.msra.mxu1 %v4756_v57 }
 0x233   :  { %1332 = vmatprep.subr.bf16.mxu1 %v4760_v59 }
 0x236   :  { %1333 = vmatpush1.bf16.msra.mxu1 %v4768_v61 }
 0x237   :  { %1334 = vmatprep.subr.bf16.mxu1 %v4772_v63 }
 0x23a   :  { %1335 = vmatpush1.bf16.msra.mxu1 %v4780_v1 }
 0x23b   :  { %1336 = vmatprep.subr.bf16.mxu1 %v4784_v3  ;;  %v4548_v3 = vmov 1966171168  }
 0x23e   :  { %1337 = vmatpush1.bf16.msra.mxu1 %v6711_v13 }
 0x23f   :  { %1338 = vmatprep.subr.bf16.mxu1 %v6712_v58 }
 0x242   :  { %1339 = vmatpush1.bf16.msra.mxu1 %v6713_v60 }
 0x243   :  { %1340 = vmatprep.subr.bf16.mxu1 %v6714_v62 }
 0x246   :  { %1341 = vmatpush1.bf16.msra.mxu1 %v6715_v0 }
 0x247   :  { %1342 = vmatprep.subr.bf16.mxu1 %v6716_v2  ;;  %v1069_v2 = vunpack.c.l.s4 %v4548_v3 }
 0x249   :  { %v1070_v1 = vunpack.c.0.s8 %v1069_v2  ;;  %v6719_v2 = vld [vmem:[#allocation18_spill] sm:$0xff] }
 0x24a   :  { %1343 = vmatpush1.bf16.msra.mxu1 %v4828_v39  ;;  %v6718_v39 = vld [vmem:[#allocation17_spill] sm:$0xff] }
 0x24b   :  { %1344 = vmatprep.subr.bf16.mxu1 %v6717_v4  ;;  %v4999_v63 = vsub.s32 %v1070_v1, %v6718_v39  ;;  %v1062_v4 = vld [vmem:[#allocation3] ss:$8 sm:$0xf] }
 0x24c   :  { %v842_v1 = vld [vmem:[%s6413_s4] sm:$0x3]  ;;  %s4549_s4 = smov [#allocation10]  }
 0x24d   :  { %s4058_s13 = sshll.u32 %s4549_s4, 4  ;;  %s4059_s13 = int_to_ptr.vmem [resolvable:$true] %s4058_s13 }
 0x24e   :  { %1345 = vmatpush1.bf16.msra.mxu1 %v4841_v5  ;;  %s4502_s14 = scalar_lea.vmem %s4059_s13, 512  ;;  %p4507_p3 = scmp.lt.s32.totalorder %s4059_s13, %s4059_s13 }
 0x24f   :  { %1594 = vmatprep.subr.bf16.mxu1 %v4640_v14  ;;  %v1063_v14 = vld [vmem:[#allocation3] ss:$8 sm:$0x30]  ;;  %p4503_p2 = scmp.ne.s32.totalorder %s4059_s13, %s4502_s14  ;;  %p4508_p4 = scmp.lt.s32.totalorder %s4502_s14, %s4502_s14 }
 0x250   :  { %v1064_v61 = vor.u32 %v1063_v14, %v1062_v4  ;;  %v5009_v4 = vrot.slane %v842_v1, %v6719_v2 }
 0x251   :  { %p4509_p5 = por %p4508_p4, %p4507_p3 }
 0x252   :  { %6720 = vst [vmem:[#allocation17_spill] sm:$0xff] %v5009_v4  ;;  %v1150_v59 = vrot.slane %v1064_v61, 4 }
 0x253   :  { %p4510_p6 = pnand %p4509_p5, %p4503_p2 }
 0x2a4   :  { %v973_v6 = vpop.f32.mrb[4].mxu1 }
 0x2a5   :  { %v975_v7 = vpop.f32.mrb[5].mxu1 }
 0x2a6   :  { %v1067_v8 = vcombine.low %v973_v6, %v975_v7  ;;  %v977_v10 = vpop.f32.mrb[6].mxu1  ;;  %v1014_v60 = vpop.f32.mrb[8].mxu0 }
 0x2a7   :  { %v978_v12 = vpop.f32.mrb[7].mxu1  ;;  %v1016_v58 = vpop.f32.mrb[9].mxu0 }
 0x2a8   :  { %v1095_v62 = vcombine.low %v1014_v60, %v1016_v58  ;;  %v1018_v13 = vpop.f32.mrb[10].mxu0  ;;  %v1074_v5 = vrot.slane %v1067_v8, %v4999_v63  ;;  %v1091_v58 = vrot.slane %v1064_v61, 2 }
 0x2a9   :  { %v1019_v0 = vpop.f32.mrb[11].mxu0 }
 0x2aa   :  { %v1081_v6 = vrot.slane %v1074_v5, %v4999_v63  ;;  %v1102_v10 = vrot.slane %v1095_v62, %v4999_v63  ;;  %v6721_v5 = vld [vmem:[#allocation19_spill] sm:$0xff] }
 0x2ab   :  { %v5012_v8 = vrot.slane %v842_v1, %v6721_v5 }
 0x2ac   :  { %v1083_v7 = vadd.f32 %v1081_v6, %v1064_v61  ;;  %v1109_v13 = vrot.slane %v1102_v10, %v4999_v63 }
 0x2ae   :  { %v4175_v12 = vmul.f32 -1.442695, %v1083_v7  ;;  %v1111_v3 = vadd.f32 %v1109_v13, %v1091_v58 }
 0x2b0   :  { %4358 = vpow2.f32 %v4175_v12  ;;  %v4176_v60 = vmul.f32 -1.442695, %v1111_v3 }
 0x2b2   :  { %4360 = vpow2.f32 %v4176_v60 }
 0x2ba   :  { %v4359_v39 = vpop.eup %4358 }
 0x2bb   :  { %v1087_v0 = vadd.f32 1.0, %v4359_v39 }
 0x2bc   :  { %v4361_v14 = vpop.eup %4360 }
 0x2bd   :  { %4362 = vrcp.f32 %v1087_v0  ;;  %v1115_v13 = vadd.f32 1.0, %v4361_v14 }
 0x2bf   :  { %4364 = vrcp.f32 %v1115_v13  ;;  %v6731_v13 = vld [vmem:[#allocation44_spill] sm:$0xff] }
 0x2c7   :  { %v4363_v1 = vpop.eup %4362 }
 0x2c9   :  { %v4365_v55 = vpop.eup %4364 }
 0x2ca   :  { %v1154_v53 = vsub.f32 1.0, %v4365_v55  ;;  %v1156_v51 = vmul.f32 0.0, %v4365_v55  ;;  %v6725_v55 = vld [vmem:[#allocation35_spill] sm:$0xff] }
 0x2e4   :  { %v1055_v62 = vpop.f32.mrb[8].mxu1 }
 0x2e5   :  { %v1129_v6 = vadd.f32 %v5009_v4, %v1055_v62  ;;  %v1057_v7 = vpop.f32.mrb[9].mxu1 }
 0x2e6   :  { %v1130_v10 = vadd.f32 %v5012_v8, %v1057_v7  ;;  %v1059_v12 = vpop.f32.mrb[10].mxu1  ;;  %v6722_v7 = vlaneseq }
 0x2e7   :  { %v1060_v58 = vpop.f32.mrb[11].mxu1 }
 0x2e8   :  { %v1133_v3 = vcombine.low %v1129_v6, %v1130_v10  ;;  %vm5019_vm0 = vcmp.lt.s32.totalorder %v6722_v7, 256  ;;  %v6728_v6 = vld [vmem:[#allocation41_spill] sm:$0xff]  ;;  %v6729_v10 = vld [vmem:[#allocation42_spill] sm:$0xff]  ;;  %v6730_v58 = vld [vmem:[#allocation43_spill] sm:$0xff] }
 0x2e9   :  { %v5125_v7 = vld [vmem:[#allocation2 + $0x1e0] sm:$0xff] }
 0x2ea   :  { %v1140_v60 = vrot.slane %v1133_v3, %v4999_v63  ;;  %v6742_v3 = vld [vmem:[#allocation55_spill] sm:$0xff]  ;;  %6765 = vst [vmem:[#allocation35_spill] sm:$0xff] %v5125_v7 }
 0x2ec   :  { %v1147_v39 = vrot.slane %v1140_v60, %v4999_v63  ;;  %v5110_v60 = vld [vmem:[#allocation2 + $0x188] sm:$0xff] }
 0x2ee   :  { %v1149_v57 = vmul.f32 %v4363_v1, %v1147_v39  ;;  %v5113_v39 = vld [vmem:[#allocation2 + $0x180] sm:$0xff]  ;;  %v5116_v1 = vld [vmem:[#allocation2 + $0x1b8] sm:$0xff] }
 0x2f0   :  { %v1152_v0 = vadd.f32 %v1150_v59, %v1149_v57 }
 0x2f2   :  { %4366 = vtanh.f32 %v1152_v0  ;;  %v5119_v0 = vld [vmem:[#allocation2 + $0x1b0] sm:$0xff] }
 0x2f3   :  { %6763 = vst [vmem:[#allocation18_spill] sm:$0xff] %v5119_v0 }
 0x2fc   :  { %v4367_v62 = vpop.eup %4366 }
 0x2fd   :  { %v1155_v4 = vmul.f32 %v4367_v62, %v1154_v53  ;;  %v5122_v62 = vld [vmem:[#allocation2 + $0x1e8] sm:$0xff] }
 0x2fe   :  { %6764 = vst [vmem:[#allocation19_spill] sm:$0xff] %v5122_v62 }
 0x2ff   :  { %v5023_v14 = vadd.f32 %v1156_v51, %v1155_v4  ;;  %v6726_v51 = vld [vmem:[#allocation37_spill] sm:$0xff]  ;;  %v6727_v4 = vld [vmem:[#allocation39_spill] sm:$0xff] }
 0x301   :  { %1162 = vst.msk [vmem:[#allocation10] ss:$8 sm:$0x3] %vm5019_vm0, %v5023_v14  ;;  %v1172_v57 = vrot.slane %v5023_v14, %v6721_v5  ;;  %v1168_v59 = vrot.slane %v5023_v14, %v6719_v2 }
 0x303   :  { %v1176_v61 = vpack.c.bf16 %v1172_v57, %v1172_v57  ;;  %v1175_v53 = vpack.c.bf16 %v1168_v59, %v1168_v59  ;;  %v5128_v57 = vld [vmem:[#allocation2 + $0x218] sm:$0xff]  ;;  %v5131_v59 = vld [vmem:[#allocation2 + $0x210] sm:$0xff] }
 0x304   :  { %6766 = vst [vmem:[#allocation37_spill] sm:$0xff] %v5128_v57  ;;  %6767 = vst [vmem:[#allocation39_spill] sm:$0xff] %v5131_v59 }
 0x305   :  { %1305 = vmatprep.mubr.bf16.mxu0 %v1176_v61  ;;  %1346 = vmatprep.mubr.bf16.mxu1 %v1176_v61 }
 0x306   :  { %1306 = vmatmul.mubr.bf16.vlgmr.msra.gmra.mrb[12].mxu0 %v1175_v53  ;;  %1347 = vmatmul.mubr.bf16.vlgmr.msra.gmra.mrb[12].mxu1 %v1175_v53 }
 0x307   :  { %1356 = vmatpush1.bf16.msra.mxu0 %v6725_v55  ;;  %1387 = vmatprep.mubr.bf16.mxu0 %v1176_v61  ;;  %v5134_v61 = vld [vmem:[#allocation2 + $0x248] sm:$0xff]  ;;  %v5139_v55 = vld [vmem:[#allocation2 + $0x278] sm:$0xff] }
 0x308   :  { %1357 = vmatprep.subr.bf16.mxu0 %v6726_v51  ;;  %1595 = vmatpush1.bf16.msra.mxu1 %v4642_v15  ;;  %v6732_v15 = vld [vmem:[#allocation45_spill] sm:$0xff]  ;;  %6768 = vst [vmem:[#allocation41_spill] sm:$0xff] %v5134_v61  ;;  %6770 = vst [vmem:[#allocation43_spill] sm:$0xff] %v5139_v55  ;;  %v5143_v51 = vld [vmem:[#allocation2 + $0x270] sm:$0xff] }
 0x309   :  { %1596 = vmatprep.subr.bf16.mxu1 %v4644_v16  ;;  %v6733_v16 = vld [vmem:[#allocation46_spill] sm:$0xff]  ;;  %6771 = vst [vmem:[#allocation44_spill] sm:$0xff] %v5143_v51 }
 0x30b   :  { %1358 = vmatpush1.bf16.msra.mxu0 %v6727_v4  ;;  %v5145_v4 = vld [vmem:[#allocation2 + $0x2a8] sm:$0xff] }
 0x30c   :  { %1359 = vmatprep.subr.bf16.mxu0 %v6728_v6  ;;  %1597 = vmatpush1.bf16.msra.mxu1 %v4649_v17  ;;  %v6734_v17 = vld [vmem:[#allocation47_spill] sm:$0xff]  ;;  %6772 = vst [vmem:[#allocation45_spill] sm:$0xff] %v5145_v4  ;;  %v5149_v6 = vld [vmem:[#allocation2 + $0x2a0] sm:$0xff] }
 0x30d   :  { %1598 = vmatprep.subr.bf16.mxu1 %v4651_v18  ;;  %v6735_v18 = vld [vmem:[#allocation48_spill] sm:$0xff]  ;;  %6773 = vst [vmem:[#allocation46_spill] sm:$0xff] %v5149_v6 }
 0x30f   :  { %1360 = vmatpush1.bf16.msra.mxu0 %v6729_v10  ;;  %v5151_v10 = vld [vmem:[#allocation2 + $0x2d8] sm:$0xff] }
 0x310   :  { %1361 = vmatprep.subr.bf16.mxu0 %v6730_v58  ;;  %1599 = vmatpush1.bf16.msra.mxu1 %v4655_v19  ;;  %v6736_v19 = vld [vmem:[#allocation49_spill] sm:$0xff]  ;;  %6774 = vst [vmem:[#allocation47_spill] sm:$0xff] %v5151_v10  ;;  %v5155_v58 = vld [vmem:[#allocation2 + $0x2d0] sm:$0xff] }
 0x311   :  { %1600 = vmatprep.subr.bf16.mxu1 %v4657_v20  ;;  %v6737_v20 = vld [vmem:[#allocation50_spill] sm:$0xff]  ;;  %6775 = vst [vmem:[#allocation48_spill] sm:$0xff] %v5155_v58 }
 0x313   :  { %1362 = vmatpush1.bf16.msra.mxu0 %v6731_v13  ;;  %v5158_v13 = vld [vmem:[#allocation2 + $0x28] sm:$0xff] }
 0x314   :  { %1363 = vmatprep.subr.bf16.mxu0 %v6732_v15  ;;  %1601 = vmatpush1.bf16.msra.mxu1 %v4669_v24  ;;  %v6738_v24 = vld [vmem:[#allocation51_spill] sm:$0xff]  ;;  %6776 = vst [vmem:[#allocation49_spill] sm:$0xff] %v5158_v13 }
 0x315   :  { %1602 = vmatprep.subr.bf16.mxu1 %v4674_v26  ;;  %v6739_v26 = vld [vmem:[#allocation52_spill] sm:$0xff] }
 0x317   :  { %1364 = vmatpush1.bf16.msra.mxu0 %v6733_v16 }
 0x318   :  { %1365 = vmatprep.subr.bf16.mxu0 %v6734_v17  ;;  %1603 = vmatpush1.bf16.msra.mxu1 %v4681_v28  ;;  %v6740_v28 = vld [vmem:[#allocation53_spill] sm:$0xff] }
 0x319   :  { %1604 = vmatprep.subr.bf16.mxu1 %v4686_v30  ;;  %v6741_v30 = vld [vmem:[#allocation54_spill] sm:$0xff] }
 0x31b   :  { %1366 = vmatpush1.bf16.msra.mxu0 %v6735_v18 }
 0x31c   :  { %1367 = vmatprep.subr.bf16.mxu0 %v6736_v19  ;;  %1605 = vmatpush1.bf16.msra.mxu1 %v4693_v32  ;;  %v6743_v32 = vld [vmem:[#allocation56_spill] sm:$0xff] }
 0x31d   :  { %1606 = vmatprep.subr.bf16.mxu1 %v4698_v34  ;;  %v6744_v34 = vld [vmem:[#allocation57_spill] sm:$0xff] }
 0x31f   :  { %1368 = vmatpush1.bf16.msra.mxu0 %v6737_v20 }
 0x320   :  { %1369 = vmatprep.subr.bf16.mxu0 %v6738_v24  ;;  %1607 = vmatpush1.bf16.msra.mxu1 %v4705_v36  ;;  %v6755_v36 = vld [vmem:[#allocation30_spill] sm:$0xff] }
 0x321   :  { %1608 = vmatprep.subr.bf16.mxu1 %v4710_v41  ;;  %v6757_v41 = vld [vmem:[#allocation32_spill] sm:$0xff] }
 0x323   :  { %1370 = vmatpush1.bf16.msra.mxu0 %v6739_v26 }
 0x324   :  { %1371 = vmatprep.subr.bf16.mxu0 %v6740_v28  ;;  %1609 = vmatpush1.bf16.msra.mxu1 %v4717_v44  ;;  %v6759_v44 = vld [vmem:[#allocation34_spill] sm:$0xff] }
 0x325   :  { %1610 = vmatprep.subr.bf16.mxu1 %v5110_v60 }
 0x327   :  { %1372 = vmatpush1.bf16.msra.mxu0 %v6741_v30 }
 0x328   :  { %1373 = vmatprep.subr.bf16.mxu0 %v6742_v3  ;;  %1611 = vmatpush1.bf16.msra.mxu1 %v5113_v39 }
 0x329   :  { %1612 = vmatprep.subr.bf16.mxu1 %v5116_v1 }
 0x32b   :  { %1374 = vmatpush1.bf16.msra.mxu0 %v6743_v32  ;;  %v1397_v32 = vld [vmem:[#allocation3 + $0x1] ss:$8 sm:$0xf] }
 0x32c   :  { %1375 = vmatprep.subr.bf16.mxu0 %v4909_v40  ;;  %v6745_v40 = vld [vmem:[#allocation20_spill] sm:$0xff]  ;;  %1613 = vmatpush1.bf16.msra.mxu1 %v5119_v0 }
 0x32d   :  { %1614 = vmatprep.subr.bf16.mxu1 %v5122_v62 }
 0x32f   :  { %1376 = vmatpush1.bf16.msra.mxu0 %v6744_v34 }
 0x330   :  { %1377 = vmatprep.subr.bf16.mxu0 %v4917_v11  ;;  %1615 = vmatpush1.bf16.msra.mxu1 %v5125_v7 }
 0x331   :  { %1616 = vmatprep.subr.bf16.mxu1 %v5128_v57 }
 0x333   :  { %1378 = vmatpush1.bf16.msra.mxu0 %v4922_v38 }
 0x334   :  { %1379 = vmatprep.subr.bf16.mxu0 %v4925_v42  ;;  %1617 = vmatpush1.bf16.msra.mxu1 %v5131_v59 }
 0x335   :  { %1618 = vmatprep.subr.bf16.mxu1 %v5134_v61 }
 0x337   :  { %1380 = vmatpush1.bf16.msra.mxu0 %v4930_v46 }
 0x338   :  { %1381 = vmatprep.subr.bf16.mxu0 %v4933_v9 }
 0x33b   :  { %1382 = vmatpush1.bf16.msra.mxu0 %v4938_v48 }
 0x33c   :  { %1383 = vmatprep.subr.bf16.mxu0 %v4941_v50 }
 0x33f   :  { %1384 = vmatpush1.bf16.msra.mxu0 %v4946_v52 }
 0x340   :  { %1385 = vmatprep.subr.bf16.mxu0 %v4949_v54 }
 0x343   :  { %1386 = vmatpush1.bf16.msra.mxu0 %v4954_v56 }
 0x344   :  { %1635 = vmatprep.subr.bf16.mxu0 %v4659_v21  ;;  %v6746_v21 = vld [vmem:[#allocation21_spill] sm:$0xff] }
 0x346   :  { %1388 = vmatmul.mubr.bf16.vlgmr.msra.gmra.mrb[16].mxu0 %v1175_v53  ;;  %v5137_v53 = vld [vmem:[#allocation2 + $0x240] sm:$0xff] }
 0x347   :  { %1636 = vmatpush1.bf16.msra.mxu0 %v4662_v22  ;;  %v6747_v22 = vld [vmem:[#allocation22_spill] sm:$0xff]  ;;  %6769 = vst [vmem:[#allocation42_spill] sm:$0xff] %v5137_v53  ;;  %1619 = vmatpush1.bf16.msra.mxu1 %v5137_v53 }
 0x348   :  { %1637 = vmatprep.subr.bf16.mxu0 %v4664_v23  ;;  %v6748_v23 = vld [vmem:[#allocation23_spill] sm:$0xff]  ;;  %1620 = vmatprep.subr.bf16.mxu1 %v5139_v55 }
 0x34b   :  { %1638 = vmatpush1.bf16.msra.mxu0 %v4672_v25  ;;  %v6749_v25 = vld [vmem:[#allocation24_spill] sm:$0xff]  ;;  %1621 = vmatpush1.bf16.msra.mxu1 %v5143_v51 }
 0x34c   :  { %1639 = vmatprep.subr.bf16.mxu0 %v4676_v27  ;;  %v6750_v27 = vld [vmem:[#allocation25_spill] sm:$0xff]  ;;  %1622 = vmatprep.subr.bf16.mxu1 %v5145_v4 }
 0x34f   :  { %1640 = vmatpush1.bf16.msra.mxu0 %v4684_v29  ;;  %v6751_v29 = vld [vmem:[#allocation26_spill] sm:$0xff]  ;;  %1623 = vmatpush1.bf16.msra.mxu1 %v5149_v6 }
 0x350   :  { %1641 = vmatprep.subr.bf16.mxu0 %v4688_v31  ;;  %v6752_v31 = vld [vmem:[#allocation27_spill] sm:$0xff]  ;;  %1624 = vmatprep.subr.bf16.mxu1 %v5151_v10 }
 0x353   :  { %1642 = vmatpush1.bf16.msra.mxu0 %v4696_v33  ;;  %v6753_v33 = vld [vmem:[#allocation28_spill] sm:$0xff]  ;;  %1625 = vmatpush1.bf16.msra.mxu1 %v5155_v58 }
 0x354   :  { %1643 = vmatprep.subr.bf16.mxu0 %v4700_v35  ;;  %v6754_v35 = vld [vmem:[#allocation29_spill] sm:$0xff]  ;;  %1676 = vmatprep.subr.bf16.mxu1 %v5158_v13 }
 0x357   :  { %1644 = vmatpush1.bf16.msra.mxu0 %v4708_v37  ;;  %v6756_v37 = vld [vmem:[#allocation31_spill] sm:$0xff] }
 0x358   :  { %1645 = vmatprep.subr.bf16.mxu0 %v4712_v43  ;;  %v6758_v43 = vld [vmem:[#allocation33_spill] sm:$0xff] }
 0x35b   :  { %1646 = vmatpush1.bf16.msra.mxu0 %v4720_v45  ;;  %v6760_v45 = vld [vmem:[#allocation36_spill] sm:$0xff] }
 0x35c   :  { %1647 = vmatprep.subr.bf16.mxu0 %v4724_v47  ;;  %v6761_v47 = vld [vmem:[#allocation38_spill] sm:$0xff] }
 0x35f   :  { %1648 = vmatpush1.bf16.msra.mxu0 %v4732_v49  ;;  %v6762_v49 = vld [vmem:[#allocation40_spill] sm:$0xff] }
 0x360   :  { %1649 = vmatprep.subr.bf16.mxu0 %v6745_v40  ;;  %v1398_v40 = vld [vmem:[#allocation3 + $0x1] ss:$8 sm:$0x30] }
 0x363   :  { %1650 = vmatpush1.bf16.msra.mxu0 %v6746_v21 }
 0x364   :  { %1651 = vmatprep.subr.bf16.mxu0 %v6747_v22  ;;  %v1399_v22 = vor.u32 %v1398_v40, %v1397_v32 }
 0x367   :  { %1652 = vmatpush1.bf16.msra.mxu0 %v6748_v23 }
 0x368   :  { %1653 = vmatprep.subr.bf16.mxu0 %v6749_v25 }
 0x36b   :  { %1654 = vmatpush1.bf16.msra.mxu0 %v6750_v27 }
 0x36c   :  { %1655 = vmatprep.subr.bf16.mxu0 %v6751_v29  ;;  %v1426_v29 = vrot.slane %v1399_v22, 2 }
 0x36f   :  { %1656 = vmatpush1.bf16.msra.mxu0 %v6752_v31 }
 0x370   :  { %1657 = vmatprep.subr.bf16.mxu0 %v6753_v33 }
 0x373   :  { %1658 = vmatpush1.bf16.msra.mxu0 %v6754_v35 }
 0x374   :  { %1659 = vmatprep.subr.bf16.mxu0 %v6755_v36 }
 0x377   :  { %1660 = vmatpush1.bf16.msra.mxu0 %v6756_v37 }
 0x378   :  { %1661 = vmatprep.subr.bf16.mxu0 %v6757_v41 }
 0x37b   :  { %1662 = vmatpush1.bf16.msra.mxu0 %v6758_v43  ;;  %v6777_v43 = vld [vmem:[#allocation17_spill] sm:$0xff] }
 0x37c   :  { %1663 = vmatprep.subr.bf16.mxu0 %v6759_v44 }
 0x37f   :  { %1664 = vmatpush1.bf16.msra.mxu0 %v6760_v45 }
 0x380   :  { %1665 = vmatprep.subr.bf16.mxu0 %v6761_v47 }
 0x383   :  { %1666 = vmatpush1.bf16.msra.mxu0 %v6762_v49 }
 0x3d9   :  { %v1307_v15 = vpop.f32.mrb[12].mxu0  ;;  %v1348_v16 = vpop.f32.mrb[12].mxu1 }
 0x3da   :  { %v1309_v17 = vpop.f32.mrb[13].mxu0  ;;  %v1350_v18 = vpop.f32.mrb[13].mxu1 }
 0x3db   :  { %v1402_v19 = vcombine.low %v1307_v15, %v1309_v17  ;;  %v1430_v20 = vcombine.low %v1348_v16, %v1350_v18  ;;  %v1311_v24 = vpop.f32.mrb[14].mxu0  ;;  %v1352_v26 = vpop.f32.mrb[14].mxu1 }
 0x3dc   :  { %v1312_v28 = vpop.f32.mrb[15].mxu0  ;;  %v1353_v30 = vpop.f32.mrb[15].mxu1  ;;  %v1474_v24 = vrot.slane %v1399_v22, 4 }
 0x3dd   :  { %v1409_v3 = vrot.slane %v1402_v19, %v4999_v63  ;;  %v1437_v25 = vrot.slane %v1430_v20, %v4999_v63 }
 0x3df   :  { %v1416_v21 = vrot.slane %v1409_v3, %v4999_v63  ;;  %v1444_v31 = vrot.slane %v1437_v25, %v4999_v63 }
 0x3e1   :  { %v1418_v23 = vadd.f32 %v1416_v21, %v1399_v22  ;;  %v1446_v33 = vadd.f32 %v1444_v31, %v1426_v29 }
 0x3e3   :  { %v4177_v27 = vmul.f32 -1.442695, %v1418_v23  ;;  %v4178_v35 = vmul.f32 -1.442695, %v1446_v33  ;;  %v5179_v33 = vld [vmem:[#allocation2 + $0x20] sm:$0xff] }
 0x3e5   :  { %4368 = vpow2.f32 %v4177_v27 }
 0x3e6   :  { %4370 = vpow2.f32 %v4178_v35  ;;  %v5181_v35 = vld [vmem:[#allocation2 + $0x58] sm:$0xff] }
 0x3ef   :  { %v4369_v36 = vpop.eup %4368 }
 0x3f0   :  { %v1422_v37 = vadd.f32 1.0, %v4369_v36  ;;  %v4371_v15 = vpop.eup %4370  ;;  %v5187_v36 = vld [vmem:[#allocation2 + $0x88] sm:$0xff] }
 0x3f1   :  { %v1450_v18 = vadd.f32 1.0, %v4371_v15  ;;  %v5209_v15 = vld [vmem:[#allocation2 + $0x110] sm:$0xff] }
 0x3f2   :  { %4372 = vrcp.f32 %v1422_v37  ;;  %v5191_v37 = vld [vmem:[#allocation2 + $0x80] sm:$0xff] }
 0x3f3   :  { %4374 = vrcp.f32 %v1450_v18  ;;  %v5217_v18 = vld [vmem:[#allocation2 + $0x178] sm:$0xff] }
 0x3fc   :  { %v4373_v26 = vpop.eup %4372 }
 0x3fd   :  { %v4375_v3 = vpop.eup %4374 }
 0x3fe   :  { %v1478_v32 = vsub.f32 1.0, %v4375_v3  ;;  %v1480_v23 = vmul.f32 %v4375_v3, %v5023_v14  ;;  %v5185_v14 = vld [vmem:[#allocation2 + $0x50] sm:$0xff] }
 0x3ff   :  { %v5282_v3 = vld [vmem:[#allocation2 + $0x70] sm:$0xff] }
 0x400   :  { %6785 = vst [vmem:[#allocation57_spill] sm:$0xff] %v5282_v3 }
 0x419   :  { %v1389_v41 = vpop.f32.mrb[16].mxu0 }
 0x41a   :  { %v1453_v44 = vadd.f32 %v1389_v41, %v6777_v43  ;;  %v1391_v45 = vpop.f32.mrb[17].mxu0  ;;  %v5193_v41 = vld [vmem:[#allocation2 + $0xb8] sm:$0xff] }
 0x41b   :  { %v1454_v47 = vadd.f32 %v1391_v45, %v5012_v8  ;;  %v1393_v49 = vpop.f32.mrb[18].mxu0  ;;  %v5199_v45 = vld [vmem:[#allocation2 + $0xe8] sm:$0xff] }
 0x41c   :  { %v1394_v16 = vpop.f32.mrb[19].mxu0  ;;  %v5205_v49 = vld [vmem:[#allocation2 + $0x118] sm:$0xff] }
 0x41d   :  { %v1457_v17 = vcombine.low %v1453_v44, %v1454_v47  ;;  %v5197_v44 = vld [vmem:[#allocation2 + $0xb0] sm:$0xff]  ;;  %v5203_v47 = vld [vmem:[#allocation2 + $0xe0] sm:$0xff]  ;;  %v5211_v16 = vld [vmem:[#allocation2 + $0x148] sm:$0xff] }
 0x41f   :  { %v1464_v19 = vrot.slane %v1457_v17, %v4999_v63  ;;  %v5215_v17 = vld [vmem:[#allocation2 + $0x140] sm:$0xff] }
 0x421   :  { %v1471_v20 = vrot.slane %v1464_v19, %v4999_v63  ;;  %v5221_v19 = vld [vmem:[#allocation2 + $0x170] sm:$0xff] }
 0x423   :  { %v1473_v28 = vmul.f32 %v4373_v26, %v1471_v20  ;;  %v5223_v20 = vld [vmem:[#allocation2 + $0x1a8] sm:$0xff]  ;;  %v5229_v26 = vld [vmem:[#allocation2 + $0x1d8] sm:$0xff] }
 0x425   :  { %v1476_v30 = vadd.f32 %v1474_v24, %v1473_v28  ;;  %v5227_v24 = vld [vmem:[#allocation2 + $0x1a0] sm:$0xff]  ;;  %v5233_v28 = vld [vmem:[#allocation2 + $0x1d0] sm:$0xff] }
 0x427   :  { %4376 = vtanh.f32 %v1476_v30  ;;  %v5235_v30 = vld [vmem:[#allocation2 + $0x208] sm:$0xff] }
 0x428   :  { %6778 = vst [vmem:[#allocation50_spill] sm:$0xff] %v5235_v30 }
 0x431   :  { %v4377_v40 = vpop.eup %4376 }
 0x432   :  { %v1479_v21 = vmul.f32 %v4377_v40, %v1478_v32  ;;  %v5284_v32 = vld [vmem:[#allocation2 + $0x98] sm:$0xff]  ;;  %v5286_v40 = vld [vmem:[#allocation2 + $0xa8] sm:$0xff] }
 0x433   :  { %6786 = vst [vmem:[#allocation20_spill] sm:$0xff] %v5286_v40 }
 0x434   :  { %v5170_v25 = vadd.f32 %v1480_v23, %v1479_v21  ;;  %v5291_v21 = vld [vmem:[#allocation2 + $0x90] sm:$0xff]  ;;  %v5294_v23 = vld [vmem:[#allocation2 + $0xa0] sm:$0xff] }
 0x435   :  { %6787 = vst [vmem:[#allocation21_spill] sm:$0xff] %v5294_v23 }
 0x436   :  { %1483 = vst.msk [vmem:[#allocation10 + $0x1] ss:$8 sm:$0x3] %vm5019_vm0, %v5170_v25  ;;  %v1493_v22 = vrot.slane %v5170_v25, %v6721_v5  ;;  %v1489_v27 = vrot.slane %v5170_v25, %v6719_v2 }
 0x438   :  { %v1497_v29 = vpack.c.bf16 %v1493_v22, %v1493_v22  ;;  %v1496_v31 = vpack.c.bf16 %v1489_v27, %v1489_v27  ;;  %v5296_v22 = vld [vmem:[#allocation2 + $0xc8] sm:$0xff]  ;;  %v5298_v27 = vld [vmem:[#allocation2 + $0xd8] sm:$0xff] }
 0x439   :  { %6788 = vst [vmem:[#allocation22_spill] sm:$0xff] %v5298_v27 }
 0x43a   :  { %1626 = vmatprep.mubr.bf16.mxu1 %v1497_v29  ;;  %1667 = vmatprep.mubr.bf16.mxu0 %v1497_v29 }
 0x43b   :  { %1627 = vmatmul.mubr.bf16.vlgmr.msra.gmra.mrb[16].mxu1 %v1496_v31  ;;  %1668 = vmatmul.mubr.bf16.vlgmr.msra.gmra.mrb[20].mxu0 %v1496_v31 }
 0x43c   :  { %1677 = vmatpush1.bf16.msra.mxu1 %v5179_v33  ;;  %1708 = vmatprep.mubr.bf16.mxu1 %v1497_v29  ;;  %v5303_v29 = vld [vmem:[#allocation2 + $0xc0] sm:$0xff] }
 0x43d   :  { %1678 = vmatprep.subr.bf16.mxu1 %v5181_v35 }
 0x440   :  { %1679 = vmatpush1.bf16.msra.mxu1 %v5185_v14 }
 0x441   :  { %1680 = vmatprep.subr.bf16.mxu1 %v5187_v36 }
 0x444   :  { %1681 = vmatpush1.bf16.msra.mxu1 %v5191_v37 }
 0x445   :  { %1682 = vmatprep.subr.bf16.mxu1 %v5193_v41 }
 0x448   :  { %1683 = vmatpush1.bf16.msra.mxu1 %v5197_v44 }
 0x449   :  { %1684 = vmatprep.subr.bf16.mxu1 %v5199_v45 }
 0x44c   :  { %1685 = vmatpush1.bf16.msra.mxu1 %v5203_v47 }
 0x44d   :  { %1686 = vmatprep.subr.bf16.mxu1 %v5205_v49 }
 0x450   :  { %1687 = vmatpush1.bf16.msra.mxu1 %v5209_v15 }
 0x451   :  { %1688 = vmatprep.subr.bf16.mxu1 %v5211_v16 }
 0x454   :  { %1689 = vmatpush1.bf16.msra.mxu1 %v5215_v17 }
 0x455   :  { %1690 = vmatprep.subr.bf16.mxu1 %v5217_v18 }
 0x458   :  { %1691 = vmatpush1.bf16.msra.mxu1 %v5221_v19 }
 0x459   :  { %1692 = vmatprep.subr.bf16.mxu1 %v5223_v20 }
 0x45c   :  { %1693 = vmatpush1.bf16.msra.mxu1 %v5227_v24 }
 0x45d   :  { %1694 = vmatprep.subr.bf16.mxu1 %v5229_v26 }
 0x460   :  { %1695 = vmatpush1.bf16.msra.mxu1 %v5233_v28 }
 0x461   :  { %1696 = vmatprep.subr.bf16.mxu1 %v5235_v30 }
 0x464   :  { %1697 = vmatpush1.bf16.msra.mxu1 %v6744_v34  ;;  %v5279_v34 = vld [vmem:[#allocation2 + $0x60] sm:$0xff] }
 0x465   :  { %1698 = vmatprep.subr.bf16.mxu1 %v4917_v11  ;;  %v5250_v11 = vld [vmem:[#allocation2 + $0x8] sm:$0xff] }
 0x466   :  { %6779 = vst [vmem:[#allocation51_spill] sm:$0xff] %v5250_v11  ;;  %1915 = vmatprep.subr.bf16.mxu0 %v5250_v11 }
 0x468   :  { %1699 = vmatpush1.bf16.msra.mxu1 %v4922_v38  ;;  %v5252_v38 = vld [vmem:[#allocation2] sm:$0xff] }
 0x469   :  { %1700 = vmatprep.subr.bf16.mxu1 %v4925_v42  ;;  %v5254_v42 = vld [vmem:[#allocation2 + $0x18] sm:$0xff]  ;;  %1916 = vmatpush1.bf16.msra.mxu0 %v5252_v38 }
 0x46a   :  { %6780 = vst [vmem:[#allocation52_spill] sm:$0xff] %v5254_v42 }
 0x46c   :  { %1701 = vmatpush1.bf16.msra.mxu1 %v4930_v46  ;;  %v5260_v46 = vld [vmem:[#allocation2 + $0x38] sm:$0xff] }
 0x46d   :  { %1702 = vmatprep.subr.bf16.mxu1 %v4933_v9  ;;  %v5258_v9 = vld [vmem:[#allocation2 + $0x10] sm:$0xff]  ;;  %1917 = vmatprep.subr.bf16.mxu0 %v5260_v46 }
 0x46e   :  { %6781 = vst [vmem:[#allocation53_spill] sm:$0xff] %v5258_v9 }
 0x470   :  { %1703 = vmatpush1.bf16.msra.mxu1 %v4938_v48  ;;  %v5264_v48 = vld [vmem:[#allocation2 + $0x48] sm:$0xff] }
 0x471   :  { %1704 = vmatprep.subr.bf16.mxu1 %v4941_v50  ;;  %6782 = vst [vmem:[#allocation54_spill] sm:$0xff] %v5264_v48  ;;  %v5267_v50 = vld [vmem:[#allocation2 + $0x30] sm:$0xff] }
 0x472   :  { %1918 = vmatpush1.bf16.msra.mxu0 %v5267_v50 }
 0x474   :  { %1705 = vmatpush1.bf16.msra.mxu1 %v4946_v52  ;;  %v5270_v52 = vld [vmem:[#allocation2 + $0x40] sm:$0xff] }
 0x475   :  { %1706 = vmatprep.subr.bf16.mxu1 %v4949_v54  ;;  %6783 = vst [vmem:[#allocation55_spill] sm:$0xff] %v5270_v52  ;;  %v5272_v54 = vld [vmem:[#allocation2 + $0x68] sm:$0xff] }
 0x476   :  { %1919 = vmatprep.subr.bf16.mxu0 %v5272_v54 }
 0x477   :  { %1920 = vmatpush1.bf16.msra.mxu0 %v5279_v34 }
 0x478   :  { %1707 = vmatpush1.bf16.msra.mxu1 %v4954_v56  ;;  %v5274_v56 = vld [vmem:[#allocation2 + $0x78] sm:$0xff]  ;;  %1921 = vmatprep.subr.bf16.mxu0 %v5284_v32 }
 0x479   :  { %1956 = vmatprep.subr.bf16.mxu1 %v5254_v42  ;;  %6784 = vst [vmem:[#allocation56_spill] sm:$0xff] %v5274_v56  ;;  %v5339_v42 = vld [vmem:[#allocation2 + $0x150] sm:$0xff] }
 0x47b   :  { %1709 = vmatmul.mubr.bf16.vlgmr.msra.gmra.mrb[20].mxu1 %v1496_v31  ;;  %1922 = vmatpush1.bf16.msra.mxu0 %v5291_v21  ;;  %v5306_v31 = vld [vmem:[#allocation2 + $0xd0] sm:$0xff] }
 0x47c   :  { %1957 = vmatpush1.bf16.msra.mxu1 %v5258_v9  ;;  %1923 = vmatprep.subr.bf16.mxu0 %v5296_v22  ;;  %6789 = vst [vmem:[#allocation23_spill] sm:$0xff] %v5306_v31  ;;  %v5332_v9 = vld [vmem:[#allocation2 + $0x158] sm:$0xff] }
 0x47d   :  { %1958 = vmatprep.subr.bf16.mxu1 %v5264_v48  ;;  %v5327_v48 = vld [vmem:[#allocation2 + $0x120] sm:$0xff] }
 0x47f   :  { %1924 = vmatpush1.bf16.msra.mxu0 %v5303_v29 }
 0x480   :  { %1959 = vmatpush1.bf16.msra.mxu1 %v5270_v52  ;;  %v5320_v52 = vld [vmem:[#allocation2 + $0x128] sm:$0xff] }
 0x481   :  { %1960 = vmatprep.subr.bf16.mxu1 %v5274_v56  ;;  %v5315_v56 = vld [vmem:[#allocation2 + $0xf0] sm:$0xff] }
 0x484   :  { %1961 = vmatpush1.bf16.msra.mxu1 %v5282_v3  ;;  %v5308_v3 = vld [vmem:[#allocation2 + $0xf8] sm:$0xff] }
 0x485   :  { %1962 = vmatprep.subr.bf16.mxu1 %v5286_v40  ;;  %v5310_v40 = vld [vmem:[#allocation2 + $0x108] sm:$0xff]  ;;  %1925 = vmatprep.subr.bf16.mxu0 %v5308_v3 }
 0x486   :  { %6790 = vst [vmem:[#allocation24_spill] sm:$0xff] %v5310_v40  ;;  %1926 = vmatpush1.bf16.msra.mxu0 %v5315_v56 }
 0x487   :  { %1927 = vmatprep.subr.bf16.mxu0 %v5320_v52 }
 0x488   :  { %1963 = vmatpush1.bf16.msra.mxu1 %v5294_v23  ;;  %v5318_v23 = vld [vmem:[#allocation2 + $0x100] sm:$0xff] }
 0x489   :  { %1964 = vmatprep.subr.bf16.mxu1 %v5298_v27  ;;  %6791 = vst [vmem:[#allocation25_spill] sm:$0xff] %v5318_v23  ;;  %v5322_v27 = vld [vmem:[#allocation2 + $0x138] sm:$0xff] }
 0x48a   :  { %6792 = vst [vmem:[#allocation26_spill] sm:$0xff] %v5322_v27  ;;  %1928 = vmatpush1.bf16.msra.mxu0 %v5327_v48 }
 0x48b   :  { %1929 = vmatprep.subr.bf16.mxu0 %v5332_v9 }
 0x48c   :  { %1965 = vmatpush1.bf16.msra.mxu1 %v5306_v31  ;;  %v5330_v31 = vld [vmem:[#allocation2 + $0x130] sm:$0xff] }
 0x48d   :  { %1966 = vmatprep.subr.bf16.mxu1 %v5310_v40  ;;  %6793 = vst [vmem:[#allocation27_spill] sm:$0xff] %v5330_v31  ;;  %v5334_v40 = vld [vmem:[#allocation2 + $0x168] sm:$0xff] }
 0x48e   :  { %6794 = vst [vmem:[#allocation28_spill] sm:$0xff] %v5334_v40  ;;  %1930 = vmatpush1.bf16.msra.mxu0 %v5339_v42 }
 0x48f   :  { %1931 = vmatprep.subr.bf16.mxu0 %v5110_v60 }
 0x490   :  { %1967 = vmatpush1.bf16.msra.mxu1 %v5318_v23  ;;  %v5342_v23 = vld [vmem:[#allocation2 + $0x160] sm:$0xff] }
 0x491   :  { %1968 = vmatprep.subr.bf16.mxu1 %v5322_v27  ;;  %6795 = vst [vmem:[#allocation29_spill] sm:$0xff] %v5342_v23  ;;  %v5362_v27 = vld [vmem:[#allocation2 + $0x1c0] sm:$0xff] }
 0x492   :  { %1932 = vmatpush1.bf16.msra.mxu0 %v5113_v39  ;;  %6799 = vst [vmem:[#allocation33_spill] sm:$0xff] %v5362_v27 }
 0x493   :  { %1933 = vmatprep.subr.bf16.mxu0 %v5116_v1 }
 0x494   :  { %1969 = vmatpush1.bf16.msra.mxu1 %v5330_v31  ;;  %v5350_v31 = vld [vmem:[#allocation2 + $0x198] sm:$0xff] }
 0x495   :  { %1970 = vmatprep.subr.bf16.mxu1 %v5334_v40  ;;  %6796 = vst [vmem:[#allocation30_spill] sm:$0xff] %v5350_v31  ;;  %v5354_v40 = vld [vmem:[#allocation2 + $0x190] sm:$0xff] }
 0x496   :  { %1934 = vmatpush1.bf16.msra.mxu0 %v5119_v0  ;;  %6797 = vst [vmem:[#allocation31_spill] sm:$0xff] %v5354_v40 }
 0x497   :  { %1935 = vmatprep.subr.bf16.mxu0 %v5122_v62  ;;  %v5366_v62 = vld [vmem:[#allocation2 + $0x1f8] sm:$0xff] }
 0x498   :  { %1971 = vmatpush1.bf16.msra.mxu1 %v5342_v23  ;;  %v5358_v23 = vld [vmem:[#allocation2 + $0x1c8] sm:$0xff]  ;;  %6800 = vst [vmem:[#allocation34_spill] sm:$0xff] %v5366_v62 }
 0x499   :  { %1972 = vmatprep.subr.bf16.mxu1 %v5350_v31  ;;  %6798 = vst [vmem:[#allocation32_spill] sm:$0xff] %v5358_v23  ;;  %v5374_v31 = vld [vmem:[#allocation2 + $0x228] sm:$0xff] }
 0x49a   :  { %1936 = vmatpush1.bf16.msra.mxu0 %v5125_v7  ;;  %6802 = vst [vmem:[#allocation38_spill] sm:$0xff] %v5374_v31 }
 0x49b   :  { %1937 = vmatprep.subr.bf16.mxu0 %v5128_v57 }
 0x49c   :  { %1973 = vmatpush1.bf16.msra.mxu1 %v5354_v40  ;;  %v5370_v40 = vld [vmem:[#allocation2 + $0x1f0] sm:$0xff] }
 0x49d   :  { %1974 = vmatprep.subr.bf16.mxu1 %v5358_v23  ;;  %6801 = vst [vmem:[#allocation36_spill] sm:$0xff] %v5370_v40  ;;  %v5380_v23 = vld [vmem:[#allocation2 + $0x258] sm:$0xff] }
 0x49e   :  { %1938 = vmatpush1.bf16.msra.mxu0 %v5131_v59  ;;  %6804 = vst [vmem:[#allocation17_spill] sm:$0xff] %v5380_v23 }
 0x49f   :  { %1939 = vmatprep.subr.bf16.mxu0 %v5134_v61  ;;  %v1718_v61 = vld [vmem:[#allocation3 + $0x2] ss:$8 sm:$0xf] }
 0x4a0   :  { %1975 = vmatpush1.bf16.msra.mxu1 %v5362_v27  ;;  %v5378_v27 = vld [vmem:[#allocation2 + $0x220] sm:$0xff] }
 0x4a1   :  { %1976 = vmatprep.subr.bf16.mxu1 %v5366_v62  ;;  %6803 = vst [vmem:[#allocation40_spill] sm:$0xff] %v5378_v27  ;;  %v5384_v62 = vld [vmem:[#allocation2 + $0x250] sm:$0xff] }
 0x4a2   :  { %1940 = vmatpush1.bf16.msra.mxu0 %v5137_v53  ;;  %6805 = vst [vmem:[#allocation58_spill] sm:$0xff] %v5384_v62 }
 0x4a3   :  { %1941 = vmatprep.subr.bf16.mxu0 %v5139_v55  ;;  %v5395_v55 = vld [vmem:[#allocation2 + $0x2b8] sm:$0xff] }
 0x4a4   :  { %1977 = vmatpush1.bf16.msra.mxu1 %v5370_v40  ;;  %v5387_v40 = vld [vmem:[#allocation2 + $0x288] sm:$0xff]  ;;  %6808 = vst [vmem:[#allocation61_spill] sm:$0xff] %v5395_v55 }
 0x4a5   :  { %1978 = vmatprep.subr.bf16.mxu1 %v5374_v31  ;;  %6806 = vst [vmem:[#allocation59_spill] sm:$0xff] %v5387_v40  ;;  %v5392_v31 = vld [vmem:[#allocation2 + $0x280] sm:$0xff] }
 0x4a6   :  { %1942 = vmatpush1.bf16.msra.mxu0 %v5143_v51  ;;  %6807 = vst [vmem:[#allocation60_spill] sm:$0xff] %v5392_v31 }
 0x4a7   :  { %1943 = vmatprep.subr.bf16.mxu0 %v5145_v4 }
 0x4a8   :  { %1979 = vmatpush1.bf16.msra.mxu1 %v5378_v27  ;;  %v5403_v27 = vld [vmem:[#allocation2 + $0x2e8] sm:$0xff] }
 0x4a9   :  { %1980 = vmatprep.subr.bf16.mxu1 %v5380_v23  ;;  %v5400_v23 = vld [vmem:[#allocation2 + $0x2b0] sm:$0xff]  ;;  %6810 = vst [vmem:[#allocation63_spill] sm:$0xff] %v5403_v27 }
 0x4aa   :  { %1944 = vmatpush1.bf16.msra.mxu0 %v5149_v6  ;;  %6809 = vst [vmem:[#allocation62_spill] sm:$0xff] %v5400_v23 }
 0x4ab   :  { %1945 = vmatprep.subr.bf16.mxu0 %v5151_v10 }
 0x4ac   :  { %1981 = vmatpush1.bf16.msra.mxu1 %v5384_v62 }
 0x4ad   :  { %1982 = vmatprep.subr.bf16.mxu1 %v5387_v40  ;;  %v5408_v40 = vld [vmem:[#allocation2 + $0x2e0] sm:$0xff] }
 0x4ae   :  { %1946 = vmatpush1.bf16.msra.mxu0 %v5155_v58  ;;  %6811 = vst [vmem:[#allocation64_spill] sm:$0xff] %v5408_v40 }
 0x4af   :  { %1997 = vmatprep.subr.bf16.mxu0 %v5158_v13 }
 0x4b0   :  { %1983 = vmatpush1.bf16.msra.mxu1 %v5392_v31 }
 0x4b1   :  { %1984 = vmatprep.subr.bf16.mxu1 %v5395_v55 }
 0x4b4   :  { %1985 = vmatpush1.bf16.msra.mxu1 %v5400_v23 }
 0x4b5   :  { %1986 = vmatprep.subr.bf16.mxu1 %v5403_v27  ;;  %v1719_v27 = vld [vmem:[#allocation3 + $0x2] ss:$8 sm:$0x30] }
 0x4b6   :  { %v1720_v57 = vor.u32 %v1719_v27, %v1718_v61 }
 0x4b8   :  { %1987 = vmatpush1.bf16.msra.mxu1 %v5408_v40  ;;  %v1747_v0 = vrot.slane %v1720_v57, 2 }
 0x4b9   :  { %2236 = vmatprep.subr.bf16.mxu1 %v5250_v11 }
 0x50e   :  { %v1628_v31 = vpop.f32.mrb[16].mxu1  ;;  %v1669_v55 = vpop.f32.mrb[20].mxu0 }
 0x50f   :  { %v1630_v62 = vpop.f32.mrb[17].mxu1  ;;  %v1671_v10 = vpop.f32.mrb[21].mxu0 }
 0x510   :  { %v1723_v6 = vcombine.low %v1628_v31, %v1630_v62  ;;  %v1751_v58 = vcombine.low %v1669_v55, %v1671_v10  ;;  %v1632_v4 = vpop.f32.mrb[18].mxu1  ;;  %v1673_v51 = vpop.f32.mrb[22].mxu0 }
 0x511   :  { %v1633_v53 = vpop.f32.mrb[19].mxu1  ;;  %v1674_v13 = vpop.f32.mrb[23].mxu0 }
 0x512   :  { %v1730_v23 = vrot.slane %v1723_v6, %v4999_v63  ;;  %v1758_v11 = vrot.slane %v1751_v58, %v4999_v63 }
 0x514   :  { %v1737_v59 = vrot.slane %v1730_v23, %v4999_v63  ;;  %v1765_v30 = vrot.slane %v1758_v11, %v4999_v63 }
 0x516   :  { %v1739_v40 = vadd.f32 %v1737_v59, %v1720_v57  ;;  %v1767_v62 = vadd.f32 %v1765_v30, %v1747_v0 }
 0x518   :  { %v4179_v7 = vmul.f32 -1.442695, %v1739_v40  ;;  %v4180_v55 = vmul.f32 -1.442695, %v1767_v62 }
 0x51a   :  { %4378 = vpow2.f32 %v4179_v7  ;;  %v1795_v7 = vrot.slane %v1720_v57, 4 }
 0x51b   :  { %4380 = vpow2.f32 %v4180_v55 }
 0x524   :  { %v4379_v51 = vpop.eup %4378 }
 0x525   :  { %v1743_v53 = vadd.f32 1.0, %v4379_v51  ;;  %v4381_v13 = vpop.eup %4380 }
 0x526   :  { %v1771_v23 = vadd.f32 1.0, %v4381_v13  ;;  %v5472_v13 = vld [vmem:[#allocation2 + $0x200] sm:$0xff] }
 0x527   :  { %4382 = vrcp.f32 %v1743_v53 }
 0x528   :  { %4384 = vrcp.f32 %v1771_v23  ;;  %v6814_v23 = vld [vmem:[#allocation19_spill] sm:$0xff] }
 0x531   :  { %v4383_v30 = vpop.eup %4382 }
 0x532   :  { %v4385_v62 = vpop.eup %4384 }
 0x533   :  { %v1799_v55 = vsub.f32 1.0, %v4385_v62 }
 0x54e   :  { %v1710_v4 = vpop.f32.mrb[20].mxu1 }
 0x54f   :  { %v1774_v6 = vadd.f32 %v1710_v4, %v6777_v43  ;;  %v1712_v10 = vpop.f32.mrb[21].mxu1  ;;  %v1801_v4 = vmul.f32 %v4385_v62, %v5170_v25  ;;  %v6812_v25 = vld [vmem:[#allocation50_spill] sm:$0xff] }
 0x550   :  { %v1775_v61 = vadd.f32 %v1712_v10, %v5012_v8  ;;  %v1714_v59 = vpop.f32.mrb[22].mxu1  ;;  %v6824_v62 = vld [vmem:[#allocation42_spill] sm:$0xff] }
 0x551   :  { %v1715_v58 = vpop.f32.mrb[23].mxu1 }
 0x552   :  { %v1778_v40 = vcombine.low %v1774_v6, %v1775_v61  ;;  %v6813_v58 = vld [vmem:[#allocation18_spill] sm:$0xff] }
 0x554   :  { %v1785_v11 = vrot.slane %v1778_v40, %v4999_v63  ;;  %v5475_v40 = vld [vmem:[#allocation2 + $0x238] sm:$0xff] }
 0x556   :  { %v1792_v0 = vrot.slane %v1785_v11, %v4999_v63  ;;  %v6818_v11 = vld [vmem:[#allocation37_spill] sm:$0xff] }
 0x558   :  { %v1794_v27 = vmul.f32 %v4383_v30, %v1792_v0  ;;  %v5488_v0 = vld [vmem:[#allocation2 + $0x260] sm:$0xff]  ;;  %v5491_v30 = vld [vmem:[#allocation2 + $0x298] sm:$0xff] }
 0x559   :  { %6819 = vst [vmem:[#allocation19_spill] sm:$0xff] %v5488_v0 }
 0x55a   :  { %v1797_v31 = vadd.f32 %v1795_v7, %v1794_v27  ;;  %v6820_v7 = vld [vmem:[#allocation39_spill] sm:$0xff]  ;;  %v6822_v27 = vld [vmem:[#allocation41_spill] sm:$0xff] }
 0x55c   :  { %4386 = vtanh.f32 %v1797_v31  ;;  %v5496_v31 = vld [vmem:[#allocation2 + $0x290] sm:$0xff] }
 0x55d   :  { %6823 = vst [vmem:[#allocation37_spill] sm:$0xff] %v5496_v31 }
 0x566   :  { %v4387_v51 = vpop.eup %4386 }
 0x567   :  { %v1800_v53 = vmul.f32 %v4387_v51, %v1799_v55  ;;  %v5499_v55 = vld [vmem:[#allocation2 + $0x2c8] sm:$0xff]  ;;  %v6826_v51 = vld [vmem:[#allocation43_spill] sm:$0xff] }
 0x568   :  { %6825 = vst [vmem:[#allocation39_spill] sm:$0xff] %v5499_v55 }
 0x569   :  { %v5421_v10 = vadd.f32 %v1801_v4, %v1800_v53  ;;  %v5504_v53 = vld [vmem:[#allocation2 + $0x2c0] sm:$0xff]  ;;  %v6828_v4 = vld [vmem:[#allocation44_spill] sm:$0xff] }
 0x56a   :  { %6827 = vst [vmem:[#allocation41_spill] sm:$0xff] %v5504_v53 }
 0x56b   :  { %1804 = vst.msk [vmem:[#allocation10 + $0x2] ss:$8 sm:$0x3] %vm5019_vm0, %v5421_v10  ;;  %v1814_v57 = vrot.slane %v5421_v10, %v6721_v5  ;;  %v1810_v6 = vrot.slane %v5421_v10, %v6719_v2 }
 0x56d   :  { %v1818_v61 = vpack.c.bf16 %v1814_v57, %v1814_v57  ;;  %v5430_v59 = vpack.c.bf16 %v1810_v6, %v1810_v6  ;;  %v5507_v57 = vld [vmem:[#allocation2 + $0x2f8] sm:$0xff]  ;;  %v6830_v6 = vld [vmem:[#allocation45_spill] sm:$0xff] }
 0x56e   :  { %6829 = vst [vmem:[#allocation42_spill] sm:$0xff] %v5507_v57 }
 0x56f   :  { %1947 = vmatprep.mubr.bf16.mxu0 %v1818_v61  ;;  %1988 = vmatprep.mubr.bf16.mxu1 %v1818_v61 }
 0x570   :  { %1948 = vmatmul.mubr.bf16.vlgmr.msra.gmra.mrb[24].mxu0 %v5430_v59  ;;  %1989 = vmatmul.mubr.bf16.vlgmr.msra.gmra.mrb[24].mxu1 %v5430_v59 }
 0x571   :  { %1998 = vmatpush1.bf16.msra.mxu0 %v5179_v33  ;;  %2029 = vmatprep.mubr.bf16.mxu0 %v1818_v61  ;;  %v5512_v61 = vld [vmem:[#allocation2 + $0x2f0] sm:$0xff] }
 0x572   :  { %1999 = vmatprep.subr.bf16.mxu0 %v5181_v35  ;;  %2237 = vmatpush1.bf16.msra.mxu1 %v5252_v38  ;;  %6831 = vst [vmem:[#allocation43_spill] sm:$0xff] %v5512_v61 }
 0x573   :  { %2238 = vmatprep.subr.bf16.mxu1 %v5260_v46 }
 0x575   :  { %2000 = vmatpush1.bf16.msra.mxu0 %v5185_v14 }
 0x576   :  { %2001 = vmatprep.subr.bf16.mxu0 %v5187_v36  ;;  %2239 = vmatpush1.bf16.msra.mxu1 %v5267_v50 }
 0x577   :  { %2240 = vmatprep.subr.bf16.mxu1 %v5272_v54 }
 0x579   :  { %2002 = vmatpush1.bf16.msra.mxu0 %v5191_v37 }
 0x57a   :  { %2003 = vmatprep.subr.bf16.mxu0 %v5193_v41  ;;  %2241 = vmatpush1.bf16.msra.mxu1 %v5279_v34 }
 0x57b   :  { %2242 = vmatprep.subr.bf16.mxu1 %v5284_v32 }
 0x57d   :  { %2004 = vmatpush1.bf16.msra.mxu0 %v5197_v44 }
 0x57e   :  { %2005 = vmatprep.subr.bf16.mxu0 %v5199_v45  ;;  %2243 = vmatpush1.bf16.msra.mxu1 %v5291_v21 }
 0x57f   :  { %2244 = vmatprep.subr.bf16.mxu1 %v5296_v22 }
 0x581   :  { %2006 = vmatpush1.bf16.msra.mxu0 %v5203_v47 }
 0x582   :  { %2007 = vmatprep.subr.bf16.mxu0 %v5205_v49  ;;  %2245 = vmatpush1.bf16.msra.mxu1 %v5303_v29 }
 0x583   :  { %2246 = vmatprep.subr.bf16.mxu1 %v5308_v3 }
 0x585   :  { %2008 = vmatpush1.bf16.msra.mxu0 %v5209_v15 }
 0x586   :  { %2009 = vmatprep.subr.bf16.mxu0 %v5211_v16  ;;  %2247 = vmatpush1.bf16.msra.mxu1 %v5315_v56 }
 0x587   :  { %2248 = vmatprep.subr.bf16.mxu1 %v5320_v52 }
 0x589   :  { %2010 = vmatpush1.bf16.msra.mxu0 %v5215_v17 }
 0x58a   :  { %2011 = vmatprep.subr.bf16.mxu0 %v5217_v18  ;;  %2249 = vmatpush1.bf16.msra.mxu1 %v5327_v48 }
 0x58b   :  { %2250 = vmatprep.subr.bf16.mxu1 %v5332_v9 }
 0x58d   :  { %2012 = vmatpush1.bf16.msra.mxu0 %v5221_v19 }
 0x58e   :  { %2013 = vmatprep.subr.bf16.mxu0 %v5223_v20  ;;  %2251 = vmatpush1.bf16.msra.mxu1 %v5339_v42 }
 0x58f   :  { %2252 = vmatprep.subr.bf16.mxu1 %v5110_v60  ;;  %v5480_v60 = vld [vmem:[#allocation2 + $0x230] sm:$0xff] }
 0x590   :  { %6815 = vst [vmem:[#allocation50_spill] sm:$0xff] %v5480_v60 }
 0x591   :  { %2014 = vmatpush1.bf16.msra.mxu0 %v5227_v24 }
 0x592   :  { %2015 = vmatprep.subr.bf16.mxu0 %v5229_v26  ;;  %2253 = vmatpush1.bf16.msra.mxu1 %v5113_v39  ;;  %v6816_v39 = vld [vmem:[#allocation35_spill] sm:$0xff] }
 0x593   :  { %2254 = vmatprep.subr.bf16.mxu1 %v5116_v1  ;;  %v5483_v1 = vld [vmem:[#allocation2 + $0x268] sm:$0xff]  ;;  %6821 = vst [vmem:[#allocation35_spill] sm:$0xff] %v5491_v30 }
 0x594   :  { %6817 = vst [vmem:[#allocation18_spill] sm:$0xff] %v5483_v1 }
 0x595   :  { %2016 = vmatpush1.bf16.msra.mxu0 %v5233_v28 }
 0x596   :  { %2017 = vmatprep.subr.bf16.mxu0 %v6812_v25  ;;  %2255 = vmatpush1.bf16.msra.mxu1 %v6813_v58  ;;  %v6832_v58 = vld [vmem:[#allocation46_spill] sm:$0xff] }
 0x597   :  { %2256 = vmatprep.subr.bf16.mxu1 %v6814_v23  ;;  %v6833_v23 = vld [vmem:[#allocation47_spill] sm:$0xff] }
 0x599   :  { %2018 = vmatpush1.bf16.msra.mxu0 %v5472_v13 }
 0x59a   :  { %2019 = vmatprep.subr.bf16.mxu0 %v5475_v40  ;;  %2257 = vmatpush1.bf16.msra.mxu1 %v6816_v39  ;;  %v6834_v39 = vld [vmem:[#allocation52_spill] sm:$0xff] }
 0x59b   :  { %2258 = vmatprep.subr.bf16.mxu1 %v6818_v11  ;;  %v6835_v11 = vld [vmem:[#allocation48_spill] sm:$0xff] }
 0x59d   :  { %2020 = vmatpush1.bf16.msra.mxu0 %v5480_v60 }
 0x59e   :  { %2021 = vmatprep.subr.bf16.mxu0 %v5483_v1  ;;  %2259 = vmatpush1.bf16.msra.mxu1 %v6820_v7  ;;  %v6836_v7 = vld [vmem:[#allocation49_spill] sm:$0xff] }
 0x59f   :  { %2260 = vmatprep.subr.bf16.mxu1 %v6822_v27  ;;  %v6837_v27 = vld [vmem:[#allocation53_spill] sm:$0xff] }
 0x5a1   :  { %2022 = vmatpush1.bf16.msra.mxu0 %v5488_v0 }
 0x5a2   :  { %2023 = vmatprep.subr.bf16.mxu0 %v5491_v30  ;;  %2261 = vmatpush1.bf16.msra.mxu1 %v6824_v62  ;;  %v6838_v62 = vld [vmem:[#allocation54_spill] sm:$0xff] }
 0x5a3   :  { %2262 = vmatprep.subr.bf16.mxu1 %v6826_v51  ;;  %v6839_v51 = vld [vmem:[#allocation55_spill] sm:$0xff] }
 0x5a5   :  { %2024 = vmatpush1.bf16.msra.mxu0 %v5496_v31  ;;  %v2039_v31 = vld [vmem:[#allocation3 + $0x3] ss:$8 sm:$0xf] }
 0x5a6   :  { %2025 = vmatprep.subr.bf16.mxu0 %v5499_v55  ;;  %2263 = vmatpush1.bf16.msra.mxu1 %v6828_v4  ;;  %v6840_v4 = vld [vmem:[#allocation56_spill] sm:$0xff] }
 0x5a7   :  { %2264 = vmatprep.subr.bf16.mxu1 %v6830_v6  ;;  %v6841_v6 = vld [vmem:[#allocation57_spill] sm:$0xff] }
 0x5a9   :  { %2026 = vmatpush1.bf16.msra.mxu0 %v5504_v53 }
 0x5aa   :  { %2027 = vmatprep.subr.bf16.mxu0 %v5507_v57  ;;  %2265 = vmatpush1.bf16.msra.mxu1 %v6832_v58  ;;  %v6842_v58 = vld [vmem:[#allocation20_spill] sm:$0xff] }
 0x5ab   :  { %2266 = vmatprep.subr.bf16.mxu1 %v6833_v23  ;;  %v6843_v23 = vld [vmem:[#allocation21_spill] sm:$0xff] }
 0x5ad   :  { %2028 = vmatpush1.bf16.msra.mxu0 %v5512_v61 }
 0x5ae   :  { %2277 = vmatprep.subr.bf16.mxu0 %v6834_v39  ;;  %2267 = vmatpush1.bf16.msra.mxu1 %v6835_v11  ;;  %v6844_v39 = vld [vmem:[#allocation22_spill] sm:$0xff]  ;;  %v6845_v11 = vld [vmem:[#allocation23_spill] sm:$0xff] }
 0x5af   :  { %2318 = vmatprep.subr.bf16.mxu1 %v6836_v7  ;;  %v6846_v7 = vld [vmem:[#allocation24_spill] sm:$0xff] }
 0x5b0   :  { %2030 = vmatmul.mubr.bf16.vlgmr.msra.gmra.mrb[28].mxu0 %v5430_v59  ;;  %v6847_v59 = vld [vmem:[#allocation25_spill] sm:$0xff] }
 0x5b1   :  { %2278 = vmatpush1.bf16.msra.mxu0 %v6837_v27  ;;  %v6848_v27 = vld [vmem:[#allocation26_spill] sm:$0xff] }
 0x5b2   :  { %2279 = vmatprep.subr.bf16.mxu0 %v6838_v62  ;;  %v6849_v62 = vld [vmem:[#allocation27_spill] sm:$0xff] }
 0x5b5   :  { %2280 = vmatpush1.bf16.msra.mxu0 %v6839_v51  ;;  %v6850_v51 = vld [vmem:[#allocation28_spill] sm:$0xff] }
 0x5b6   :  { %2281 = vmatprep.subr.bf16.mxu0 %v6840_v4  ;;  %v6851_v4 = vld [vmem:[#allocation29_spill] sm:$0xff] }
 0x5b9   :  { %2282 = vmatpush1.bf16.msra.mxu0 %v6841_v6  ;;  %v6852_v6 = vld [vmem:[#allocation30_spill] sm:$0xff] }
 0x5ba   :  { %2283 = vmatprep.subr.bf16.mxu0 %v6842_v58  ;;  %v6853_v58 = vld [vmem:[#allocation31_spill] sm:$0xff] }
 0x5bd   :  { %2284 = vmatpush1.bf16.msra.mxu0 %v6843_v23  ;;  %v6854_v23 = vld [vmem:[#allocation32_spill] sm:$0xff] }
 0x5be   :  { %2285 = vmatprep.subr.bf16.mxu0 %v6844_v39  ;;  %v6855_v39 = vld [vmem:[#allocation33_spill] sm:$0xff] }
 0x5c1   :  { %2286 = vmatpush1.bf16.msra.mxu0 %v6845_v11  ;;  %v6856_v11 = vld [vmem:[#allocation34_spill] sm:$0xff] }
 0x5c2   :  { %2287 = vmatprep.subr.bf16.mxu0 %v6846_v7  ;;  %v6857_v7 = vld [vmem:[#allocation36_spill] sm:$0xff] }
 0x5c5   :  { %2288 = vmatpush1.bf16.msra.mxu0 %v6847_v59  ;;  %v6858_v59 = vld [vmem:[#allocation38_spill] sm:$0xff] }
 0x5c6   :  { %2289 = vmatprep.subr.bf16.mxu0 %v6848_v27  ;;  %v6859_v27 = vld [vmem:[#allocation40_spill] sm:$0xff] }
 0x5c9   :  { %2290 = vmatpush1.bf16.msra.mxu0 %v6849_v62  ;;  %v6860_v62 = vld [vmem:[#allocation17_spill] sm:$0xff] }
 0x5ca   :  { %2291 = vmatprep.subr.bf16.mxu0 %v6850_v51  ;;  %v6861_v51 = vld [vmem:[#allocation58_spill] sm:$0xff] }
 0x5cd   :  { %2292 = vmatpush1.bf16.msra.mxu0 %v6851_v4  ;;  %v6862_v4 = vld [vmem:[#allocation59_spill] sm:$0xff] }
 0x5ce   :  { %2293 = vmatprep.subr.bf16.mxu0 %v6852_v6  ;;  %v6863_v6 = vld [vmem:[#allocation60_spill] sm:$0xff] }
 0x5d1   :  { %2294 = vmatpush1.bf16.msra.mxu0 %v6853_v58  ;;  %v6864_v58 = vld [vmem:[#allocation61_spill] sm:$0xff] }
 0x5d2   :  { %2295 = vmatprep.subr.bf16.mxu0 %v6854_v23  ;;  %v6865_v23 = vld [vmem:[#allocation62_spill] sm:$0xff] }
 0x5d5   :  { %2296 = vmatpush1.bf16.msra.mxu0 %v6855_v39  ;;  %v6866_v39 = vld [vmem:[#allocation63_spill] sm:$0xff] }
 0x5d6   :  { %2297 = vmatprep.subr.bf16.mxu0 %v6856_v11  ;;  %v6867_v11 = vld [vmem:[#allocation64_spill] sm:$0xff] }
 0x5d9   :  { %2298 = vmatpush1.bf16.msra.mxu0 %v6857_v7  ;;  %v6868_v7 = vld [vmem:[#allocation51_spill] sm:$0xff] }
 0x5da   :  { %2299 = vmatprep.subr.bf16.mxu0 %v6858_v59 }
 0x5dd   :  { %2300 = vmatpush1.bf16.msra.mxu0 %v6859_v27 }
 0x5de   :  { %2301 = vmatprep.subr.bf16.mxu0 %v6860_v62 }
 0x5e1   :  { %2302 = vmatpush1.bf16.msra.mxu0 %v6861_v51 }
 0x5e2   :  { %2303 = vmatprep.subr.bf16.mxu0 %v6862_v4 }
 0x5e5   :  { %2304 = vmatpush1.bf16.msra.mxu0 %v6863_v6 }
 0x5e6   :  { %2305 = vmatprep.subr.bf16.mxu0 %v6864_v58 }
 0x5e9   :  { %2306 = vmatpush1.bf16.msra.mxu0 %v6865_v23  ;;  %v2040_v23 = vld [vmem:[#allocation3 + $0x3] ss:$8 sm:$0x30] }
 0x5ea   :  { %2307 = vmatprep.subr.bf16.mxu0 %v6866_v39  ;;  %v2041_v30 = vor.u32 %v2040_v23, %v2039_v31 }
 0x5ec   :  { %v2068_v1 = vrot.slane %v2041_v30, 2 }
 0x5ed   :  { %2308 = vmatpush1.bf16.msra.mxu0 %v6867_v11 }
 0x5ee   :  { %2557 = vmatprep.subr.bf16.mxu0 %v6868_v7 }
 0x643   :  { %v1949_v59 = vpop.f32.mrb[24].mxu0  ;;  %v1990_v27 = vpop.f32.mrb[24].mxu1 }
 0x644   :  { %v1951_v61 = vpop.f32.mrb[25].mxu0  ;;  %v1992_v62 = vpop.f32.mrb[25].mxu1 }
 0x645   :  { %v2044_v57 = vcombine.low %v1949_v59, %v1951_v61  ;;  %v2072_v51 = vcombine.low %v1990_v27, %v1992_v62  ;;  %v1953_v53 = vpop.f32.mrb[26].mxu0  ;;  %v1994_v4 = vpop.f32.mrb[26].mxu1 }
 0x646   :  { %v1954_v55 = vpop.f32.mrb[27].mxu0  ;;  %v1995_v6 = vpop.f32.mrb[27].mxu1 }
 0x647   :  { %v2051_v58 = vrot.slane %v2044_v57, %v4999_v63  ;;  %v2079_v7 = vrot.slane %v2072_v51, %v4999_v63 }
 0x649   :  { %v2058_v39 = vrot.slane %v2051_v58, %v4999_v63  ;;  %v2086_v60 = vrot.slane %v2079_v7, %v4999_v63 }
 0x64b   :  { %v2060_v11 = vadd.f32 %v2058_v39, %v2041_v30  ;;  %v2088_v61 = vadd.f32 %v2086_v60, %v2068_v1  ;;  %v2116_v1 = vrot.slane %v2041_v30, 4 }
 0x64d   :  { %v4181_v0 = vmul.f32 -1.442695, %v2060_v11  ;;  %v4182_v53 = vmul.f32 -1.442695, %v2088_v61 }
 0x64f   :  { %4388 = vpow2.f32 %v4181_v0 }
 0x650   :  { %4390 = vpow2.f32 %v4182_v53 }
 0x659   :  { %v4389_v27 = vpop.eup %4388 }
 0x65a   :  { %v2064_v55 = vadd.f32 1.0, %v4389_v27  ;;  %v4391_v6 = vpop.eup %4390 }
 0x65b   :  { %v2092_v23 = vadd.f32 1.0, %v4391_v6  ;;  %v6905_v6 = vld [vmem:[#allocation60_spill] sm:$0xff] }
 0x65c   :  { %4392 = vrcp.f32 %v2064_v55 }
 0x65d   :  { %4394 = vrcp.f32 %v2092_v23  ;;  %v6908_v23 = vld [vmem:[#allocation63_spill] sm:$0xff] }
 0x666   :  { %v4393_v0 = vpop.eup %4392 }
 0x667   :  { %v4395_v61 = vpop.eup %4394 }
 0x668   :  { %v2120_v53 = vsub.f32 1.0, %v4395_v61 }
 0x683   :  { %v2031_v57 = vpop.f32.mrb[28].mxu0 }
 0x684   :  { %v2095_v62 = vadd.f32 %v2031_v57, %v6777_v43  ;;  %v2033_v4 = vpop.f32.mrb[29].mxu0  ;;  %v2122_v57 = vmul.f32 %v4395_v61, %v5421_v10  ;;  %v6903_v10 = vld [vmem:[#allocation58_spill] sm:$0xff]  ;;  %v5664_v61 = vld [vmem:[#allocation2 + $0x1e0] sm:$0xff] }
 0x685   :  { %v2096_v31 = vadd.f32 %v2033_v4, %v5012_v8  ;;  %v2035_v39 = vpop.f32.mrb[30].mxu0  ;;  %6912 = vst [vmem:[#allocation46_spill] sm:$0xff] %v5664_v61 }
 0x686   :  { %v2036_v51 = vpop.f32.mrb[31].mxu0 }
 0x687   :  { %v2099_v58 = vcombine.low %v2095_v62, %v2096_v31  ;;  %v6906_v51 = vld [vmem:[#allocation61_spill] sm:$0xff] }
 0x689   :  { %v2106_v11 = vrot.slane %v2099_v58, %v4999_v63  ;;  %v6907_v58 = vld [vmem:[#allocation62_spill] sm:$0xff] }
 0x68b   :  { %v2113_v60 = vrot.slane %v2106_v11, %v4999_v63  ;;  %v6909_v11 = vld [vmem:[#allocation64_spill] sm:$0xff] }
 0x68d   :  { %v2115_v59 = vmul.f32 %v4393_v0, %v2113_v60  ;;  %v5649_v60 = vld [vmem:[#allocation2 + $0x188] sm:$0xff]  ;;  %v5655_v0 = vld [vmem:[#allocation2 + $0x1b8] sm:$0xff] }
 0x68f   :  { %v2118_v7 = vadd.f32 %v2116_v1, %v2115_v59  ;;  %v5652_v1 = vld [vmem:[#allocation2 + $0x180] sm:$0xff]  ;;  %v5658_v59 = vld [vmem:[#allocation2 + $0x1b0] sm:$0xff] }
 0x690   :  { %6910 = vst [vmem:[#allocation44_spill] sm:$0xff] %v5658_v59 }
 0x691   :  { %4396 = vtanh.f32 %v2118_v7  ;;  %v5661_v7 = vld [vmem:[#allocation2 + $0x1e8] sm:$0xff] }
 0x692   :  { %6911 = vst [vmem:[#allocation45_spill] sm:$0xff] %v5661_v7 }
 0x69b   :  { %v4397_v27 = vpop.eup %4396 }
 0x69c   :  { %v2121_v55 = vmul.f32 %v4397_v27, %v2120_v53  ;;  %v5667_v53 = vld [vmem:[#allocation2 + $0x218] sm:$0xff]  ;;  %v5670_v27 = vld [vmem:[#allocation2 + $0x210] sm:$0xff] }
 0x69d   :  { %6913 = vst [vmem:[#allocation47_spill] sm:$0xff] %v5667_v53  ;;  %6914 = vst [vmem:[#allocation48_spill] sm:$0xff] %v5670_v27 }
 0x69e   :  { %v5562_v4 = vadd.f32 %v2122_v57, %v2121_v55  ;;  %v5673_v55 = vld [vmem:[#allocation2 + $0x248] sm:$0xff]  ;;  %v5676_v57 = vld [vmem:[#allocation2 + $0x240] sm:$0xff] }
 0x69f   :  { %6915 = vst [vmem:[#allocation49_spill] sm:$0xff] %v5673_v55  ;;  %6916 = vst [vmem:[#allocation51_spill] sm:$0xff] %v5676_v57 }
 0x6a0   :  { %2125 = vst.msk [vmem:[#allocation10 + $0x3] ss:$8 sm:$0x3] %vm5019_vm0, %v5562_v4  ;;  %v2135_v30 = vrot.slane %v5562_v4, %v6721_v5  ;;  %v2131_v62 = vrot.slane %v5562_v4, %v6719_v2 }
 0x6a2   :  { %v2139_v31 = vpack.c.bf16 %v2135_v30, %v2135_v30  ;;  %v2138_v39 = vpack.c.bf16 %v2131_v62, %v2131_v62  ;;  %v5678_v30 = vld [vmem:[#allocation2 + $0x278] sm:$0xff]  ;;  %v5682_v62 = vld [vmem:[#allocation2 + $0x270] sm:$0xff] }
 0x6a4   :  { %2268 = vmatprep.mubr.bf16.mxu1 %v2139_v31  ;;  %2309 = vmatprep.mubr.bf16.mxu0 %v2139_v31 }
 0x6a5   :  { %2269 = vmatmul.mubr.bf16.vlgmr.msra.gmra.mrb[28].mxu1 %v2138_v39  ;;  %2310 = vmatmul.mubr.bf16.vlgmr.msra.gmra.mrb[32].mxu0 %v2138_v39 }
 0x6a6   :  { %2319 = vmatpush1.bf16.msra.mxu1 %v5179_v33  ;;  %2350 = vmatprep.mubr.bf16.mxu1 %v2139_v31  ;;  %v6869_v33 = vld [vmem:[#allocation50_spill] sm:$0xff] }
 0x6a7   :  { %2320 = vmatprep.subr.bf16.mxu1 %v5181_v35  ;;  %2558 = vmatpush1.bf16.msra.mxu0 %v5252_v38  ;;  %v6870_v35 = vld [vmem:[#allocation18_spill] sm:$0xff]  ;;  %v6888_v38 = vld [vmem:[#allocation24_spill] sm:$0xff]  ;;  %6917 = vst [vmem:[#allocation50_spill] sm:$0xff] %v5678_v30 }
 0x6a8   :  { %2559 = vmatprep.subr.bf16.mxu0 %v5260_v46  ;;  %v6891_v46 = vld [vmem:[#allocation27_spill] sm:$0xff]  ;;  %6918 = vst [vmem:[#allocation18_spill] sm:$0xff] %v5682_v62  ;;  %v5684_v31 = vld [vmem:[#allocation2 + $0x2a8] sm:$0xff] }
 0x6aa   :  { %2321 = vmatpush1.bf16.msra.mxu1 %v5185_v14  ;;  %v6871_v14 = vld [vmem:[#allocation19_spill] sm:$0xff] }
 0x6ab   :  { %2322 = vmatprep.subr.bf16.mxu1 %v5187_v36  ;;  %2560 = vmatpush1.bf16.msra.mxu0 %v5267_v50  ;;  %v6872_v36 = vld [vmem:[#allocation35_spill] sm:$0xff]  ;;  %v6893_v50 = vld [vmem:[#allocation29_spill] sm:$0xff]  ;;  %6919 = vst [vmem:[#allocation19_spill] sm:$0xff] %v5684_v31 }
 0x6ac   :  { %2561 = vmatprep.subr.bf16.mxu0 %v5272_v54  ;;  %v6895_v54 = vld [vmem:[#allocation31_spill] sm:$0xff] }
 0x6ae   :  { %2323 = vmatpush1.bf16.msra.mxu1 %v5191_v37  ;;  %v6873_v37 = vld [vmem:[#allocation37_spill] sm:$0xff] }
 0x6af   :  { %2324 = vmatprep.subr.bf16.mxu1 %v5193_v41  ;;  %2562 = vmatpush1.bf16.msra.mxu0 %v5279_v34  ;;  %v6874_v41 = vld [vmem:[#allocation39_spill] sm:$0xff]  ;;  %v6897_v34 = vld [vmem:[#allocation33_spill] sm:$0xff] }
 0x6b0   :  { %2563 = vmatprep.subr.bf16.mxu0 %v5284_v32  ;;  %v6899_v32 = vld [vmem:[#allocation36_spill] sm:$0xff] }
 0x6b2   :  { %2325 = vmatpush1.bf16.msra.mxu1 %v5197_v44  ;;  %v6875_v44 = vld [vmem:[#allocation41_spill] sm:$0xff] }
 0x6b3   :  { %2326 = vmatprep.subr.bf16.mxu1 %v5199_v45  ;;  %2564 = vmatpush1.bf16.msra.mxu0 %v5291_v21  ;;  %v6876_v45 = vld [vmem:[#allocation42_spill] sm:$0xff] }
 0x6b4   :  { %2565 = vmatprep.subr.bf16.mxu0 %v5296_v22  ;;  %v6900_v21 = vld [vmem:[#allocation38_spill] sm:$0xff]  ;;  %v6901_v22 = vld [vmem:[#allocation40_spill] sm:$0xff] }
 0x6b6   :  { %2327 = vmatpush1.bf16.msra.mxu1 %v5203_v47  ;;  %v6877_v47 = vld [vmem:[#allocation43_spill] sm:$0xff] }
 0x6b7   :  { %2328 = vmatprep.subr.bf16.mxu1 %v5205_v49  ;;  %2566 = vmatpush1.bf16.msra.mxu0 %v5303_v29  ;;  %v6878_v49 = vld [vmem:[#allocation52_spill] sm:$0xff]  ;;  %v6902_v29 = vld [vmem:[#allocation17_spill] sm:$0xff] }
 0x6b8   :  { %2567 = vmatprep.subr.bf16.mxu0 %v5308_v3  ;;  %v6898_v3 = vld [vmem:[#allocation34_spill] sm:$0xff] }
 0x6ba   :  { %2329 = vmatpush1.bf16.msra.mxu1 %v5209_v15  ;;  %v6879_v15 = vld [vmem:[#allocation53_spill] sm:$0xff] }
 0x6bb   :  { %2330 = vmatprep.subr.bf16.mxu1 %v5211_v16  ;;  %2568 = vmatpush1.bf16.msra.mxu0 %v5315_v56  ;;  %v6880_v16 = vld [vmem:[#allocation54_spill] sm:$0xff]  ;;  %v6896_v56 = vld [vmem:[#allocation32_spill] sm:$0xff] }
 0x6bc   :  { %2569 = vmatprep.subr.bf16.mxu0 %v5320_v52  ;;  %v6894_v52 = vld [vmem:[#allocation30_spill] sm:$0xff] }
 0x6be   :  { %2331 = vmatpush1.bf16.msra.mxu1 %v5215_v17  ;;  %v6881_v17 = vld [vmem:[#allocation55_spill] sm:$0xff] }
 0x6bf   :  { %2332 = vmatprep.subr.bf16.mxu1 %v5217_v18  ;;  %2570 = vmatpush1.bf16.msra.mxu0 %v5327_v48  ;;  %v6882_v18 = vld [vmem:[#allocation56_spill] sm:$0xff] }
 0x6c0   :  { %2571 = vmatprep.subr.bf16.mxu0 %v5332_v9  ;;  %v6890_v9 = vld [vmem:[#allocation26_spill] sm:$0xff]  ;;  %v6892_v48 = vld [vmem:[#allocation28_spill] sm:$0xff] }
 0x6c2   :  { %2333 = vmatpush1.bf16.msra.mxu1 %v5221_v19  ;;  %v6883_v19 = vld [vmem:[#allocation57_spill] sm:$0xff] }
 0x6c3   :  { %2334 = vmatprep.subr.bf16.mxu1 %v5223_v20  ;;  %2572 = vmatpush1.bf16.msra.mxu0 %v5339_v42  ;;  %v6884_v20 = vld [vmem:[#allocation20_spill] sm:$0xff]  ;;  %v6889_v42 = vld [vmem:[#allocation25_spill] sm:$0xff] }
 0x6c4   :  { %2573 = vmatprep.subr.bf16.mxu0 %v5649_v60 }
 0x6c6   :  { %2335 = vmatpush1.bf16.msra.mxu1 %v5227_v24  ;;  %v6885_v24 = vld [vmem:[#allocation21_spill] sm:$0xff] }
 0x6c7   :  { %2336 = vmatprep.subr.bf16.mxu1 %v5229_v26  ;;  %v6886_v26 = vld [vmem:[#allocation22_spill] sm:$0xff]  ;;  %2574 = vmatpush1.bf16.msra.mxu0 %v5652_v1 }
 0x6c8   :  { %2575 = vmatprep.subr.bf16.mxu0 %v5655_v0 }
 0x6ca   :  { %2337 = vmatpush1.bf16.msra.mxu1 %v5233_v28  ;;  %v6887_v28 = vld [vmem:[#allocation23_spill] sm:$0xff] }
 0x6cb   :  { %2338 = vmatprep.subr.bf16.mxu1 %v6812_v25  ;;  %v6904_v25 = vld [vmem:[#allocation59_spill] sm:$0xff]  ;;  %2576 = vmatpush1.bf16.msra.mxu0 %v5658_v59 }
 0x6cc   :  { %2577 = vmatprep.subr.bf16.mxu0 %v5661_v7 }
 0x6ce   :  { %2339 = vmatpush1.bf16.msra.mxu1 %v5472_v13 }
 0x6cf   :  { %2340 = vmatprep.subr.bf16.mxu1 %v5475_v40  ;;  %2578 = vmatpush1.bf16.msra.mxu0 %v5664_v61 }
 0x6d0   :  { %2579 = vmatprep.subr.bf16.mxu0 %v5667_v53 }
 0x6d2   :  { %2341 = vmatpush1.bf16.msra.mxu1 %v6869_v33 }
 0x6d3   :  { %2342 = vmatprep.subr.bf16.mxu1 %v6870_v35  ;;  %2580 = vmatpush1.bf16.msra.mxu0 %v5670_v27 }
 0x6d4   :  { %2581 = vmatprep.subr.bf16.mxu0 %v5673_v55 }
 0x6d6   :  { %2343 = vmatpush1.bf16.msra.mxu1 %v6871_v14 }
 0x6d7   :  { %2344 = vmatprep.subr.bf16.mxu1 %v6872_v36  ;;  %2582 = vmatpush1.bf16.msra.mxu0 %v5676_v57 }
 0x6d8   :  { %2583 = vmatprep.subr.bf16.mxu0 %v5678_v30 }
 0x6da   :  { %2345 = vmatpush1.bf16.msra.mxu1 %v6873_v37 }
 0x6db   :  { %2346 = vmatprep.subr.bf16.mxu1 %v6874_v41  ;;  %2584 = vmatpush1.bf16.msra.mxu0 %v5682_v62 }
 0x6dc   :  { %2585 = vmatprep.subr.bf16.mxu0 %v5684_v31 }
 0x6de   :  { %2347 = vmatpush1.bf16.msra.mxu1 %v6875_v44 }
 0x6df   :  { %2348 = vmatprep.subr.bf16.mxu1 %v6876_v45 }
 0x6e2   :  { %2349 = vmatpush1.bf16.msra.mxu1 %v6877_v47 }
 0x6e3   :  { %2598 = vmatprep.subr.bf16.mxu1 %v6878_v49  ;;  %v5690_v49 = vld [vmem:[#allocation2 + $0x2d8] sm:$0xff] }
 0x6e4   :  { %6921 = vst [vmem:[#allocation37_spill] sm:$0xff] %v5690_v49 }
 0x6e5   :  { %2351 = vmatmul.mubr.bf16.vlgmr.msra.gmra.mrb[32].mxu1 %v2138_v39  ;;  %v5688_v39 = vld [vmem:[#allocation2 + $0x2a0] sm:$0xff] }
 0x6e6   :  { %2599 = vmatpush1.bf16.msra.mxu1 %v6879_v15  ;;  %6920 = vst [vmem:[#allocation35_spill] sm:$0xff] %v5688_v39  ;;  %2586 = vmatpush1.bf16.msra.mxu0 %v5688_v39  ;;  %v5694_v15 = vld [vmem:[#allocation2 + $0x2d0] sm:$0xff] }
 0x6e7   :  { %2600 = vmatprep.subr.bf16.mxu1 %v6880_v16  ;;  %2587 = vmatprep.subr.bf16.mxu0 %v5690_v49  ;;  %6922 = vst [vmem:[#allocation39_spill] sm:$0xff] %v5694_v15  ;;  %v5697_v16 = vld [vmem:[#allocation2 + $0x28] sm:$0xff] }
 0x6e8   :  { %6923 = vst [vmem:[#allocation41_spill] sm:$0xff] %v5697_v16 }
 0x6ea   :  { %2601 = vmatpush1.bf16.msra.mxu1 %v6881_v17  ;;  %2588 = vmatpush1.bf16.msra.mxu0 %v5694_v15 }
 0x6eb   :  { %2602 = vmatprep.subr.bf16.mxu1 %v6882_v18  ;;  %2639 = vmatprep.subr.bf16.mxu0 %v5697_v16 }
 0x6ee   :  { %2603 = vmatpush1.bf16.msra.mxu1 %v6883_v19 }
 0x6ef   :  { %2604 = vmatprep.subr.bf16.mxu1 %v6884_v20 }
 0x6f2   :  { %2605 = vmatpush1.bf16.msra.mxu1 %v6885_v24 }
 0x6f3   :  { %2606 = vmatprep.subr.bf16.mxu1 %v6886_v26 }
 0x6f6   :  { %2607 = vmatpush1.bf16.msra.mxu1 %v6887_v28 }
 0x6f7   :  { %2608 = vmatprep.subr.bf16.mxu1 %v6888_v38 }
 0x6fa   :  { %2609 = vmatpush1.bf16.msra.mxu1 %v6889_v42 }
 0x6fb   :  { %2610 = vmatprep.subr.bf16.mxu1 %v6890_v9 }
 0x6fe   :  { %2611 = vmatpush1.bf16.msra.mxu1 %v6891_v46 }
 0x6ff   :  { %2612 = vmatprep.subr.bf16.mxu1 %v6892_v48  ;;  %v2360_v48 = vld [vmem:[#allocation3 + $0x4] ss:$8 sm:$0xf] }
 0x702   :  { %2613 = vmatpush1.bf16.msra.mxu1 %v6893_v50  ;;  %v2361_v50 = vld [vmem:[#allocation3 + $0x4] ss:$8 sm:$0x30] }
 0x703   :  { %2614 = vmatprep.subr.bf16.mxu1 %v6894_v52 }
 0x706   :  { %2615 = vmatpush1.bf16.msra.mxu1 %v6895_v54  ;;  %v2362_v54 = vor.u32 %v2361_v50, %v2360_v48 }
 0x707   :  { %2616 = vmatprep.subr.bf16.mxu1 %v6896_v56 }
 0x70a   :  { %2617 = vmatpush1.bf16.msra.mxu1 %v6897_v34 }
 0x70b   :  { %2618 = vmatprep.subr.bf16.mxu1 %v6898_v3 }
 0x70e   :  { %2619 = vmatpush1.bf16.msra.mxu1 %v6899_v32  ;;  %v2389_v32 = vrot.slane %v2362_v54, 2 }
 0x70f   :  { %2620 = vmatprep.subr.bf16.mxu1 %v6900_v21 }
 0x712   :  { %2621 = vmatpush1.bf16.msra.mxu1 %v6901_v22 }
 0x713   :  { %2622 = vmatprep.subr.bf16.mxu1 %v6902_v29 }
 0x716   :  { %2623 = vmatpush1.bf16.msra.mxu1 %v6903_v10 }
 0x717   :  { %2624 = vmatprep.subr.bf16.mxu1 %v6904_v25 }
 0x71a   :  { %2625 = vmatpush1.bf16.msra.mxu1 %v6905_v6 }
 0x71b   :  { %2626 = vmatprep.subr.bf16.mxu1 %v6906_v51 }
 0x71e   :  { %2627 = vmatpush1.bf16.msra.mxu1 %v6907_v58 }
 0x71f   :  { %2628 = vmatprep.subr.bf16.mxu1 %v6908_v23 }
 0x722   :  { %2629 = vmatpush1.bf16.msra.mxu1 %v6909_v11 }
 0x778   :  { %v2270_v17 = vpop.f32.mrb[28].mxu1  ;;  %v2311_v18 = vpop.f32.mrb[32].mxu0 }
 0x779   :  { %v2272_v19 = vpop.f32.mrb[29].mxu1  ;;  %v2313_v20 = vpop.f32.mrb[33].mxu0 }
 0x77a   :  { %v2365_v24 = vcombine.low %v2270_v17, %v2272_v19  ;;  %v2393_v26 = vcombine.low %v2311_v18, %v2313_v20  ;;  %v2274_v28 = vpop.f32.mrb[30].mxu1  ;;  %v2315_v38 = vpop.f32.mrb[34].mxu0 }
 0x77b   :  { %v2275_v42 = vpop.f32.mrb[31].mxu1  ;;  %v2316_v9 = vpop.f32.mrb[35].mxu0  ;;  %v2437_v28 = vrot.slane %v2362_v54, 4 }
 0x77c   :  { %v2372_v46 = vrot.slane %v2365_v24, %v4999_v63  ;;  %v2400_v34 = vrot.slane %v2393_v26, %v4999_v63 }
 0x77e   :  { %v2379_v52 = vrot.slane %v2372_v46, %v4999_v63  ;;  %v2407_v21 = vrot.slane %v2400_v34, %v4999_v63 }
 0x780   :  { %v2381_v56 = vadd.f32 %v2379_v52, %v2362_v54  ;;  %v2409_v22 = vadd.f32 %v2407_v21, %v2389_v32 }
 0x782   :  { %v4183_v3 = vmul.f32 -1.442695, %v2381_v56  ;;  %v4184_v29 = vmul.f32 -1.442695, %v2409_v22  ;;  %v5718_v22 = vld [vmem:[#allocation2 + $0x20] sm:$0xff] }
 0x784   :  { %4398 = vpow2.f32 %v4183_v3 }
 0x785   :  { %4400 = vpow2.f32 %v4184_v29  ;;  %v5720_v29 = vld [vmem:[#allocation2 + $0x58] sm:$0xff] }
 0x78e   :  { %v4399_v10 = vpop.eup %4398 }
 0x78f   :  { %v2385_v25 = vadd.f32 1.0, %v4399_v10  ;;  %v4401_v17 = vpop.eup %4400  ;;  %v5726_v10 = vld [vmem:[#allocation2 + $0x88] sm:$0xff] }
 0x790   :  { %v2413_v20 = vadd.f32 1.0, %v4401_v17  ;;  %v5748_v17 = vld [vmem:[#allocation2 + $0x110] sm:$0xff] }
 0x791   :  { %4402 = vrcp.f32 %v2385_v25  ;;  %v5730_v25 = vld [vmem:[#allocation2 + $0x80] sm:$0xff] }
 0x792   :  { %4404 = vrcp.f32 %v2413_v20  ;;  %v5756_v20 = vld [vmem:[#allocation2 + $0x178] sm:$0xff] }
 0x79b   :  { %v4403_v38 = vpop.eup %4402 }
 0x79c   :  { %v4405_v46 = vpop.eup %4404 }
 0x79d   :  { %v2441_v48 = vsub.f32 1.0, %v4405_v46  ;;  %v2443_v56 = vmul.f32 %v4405_v46, %v5562_v4  ;;  %v5724_v4 = vld [vmem:[#allocation2 + $0x50] sm:$0xff] }
 0x79e   :  { %v5821_v46 = vld [vmem:[#allocation2 + $0x70] sm:$0xff] }
 0x79f   :  { %6931 = vst [vmem:[#allocation57_spill] sm:$0xff] %v5821_v46 }
 0x7b8   :  { %v2352_v6 = vpop.f32.mrb[32].mxu1 }
 0x7b9   :  { %v2416_v51 = vadd.f32 %v2352_v6, %v6777_v43  ;;  %v2354_v58 = vpop.f32.mrb[33].mxu1  ;;  %v5732_v6 = vld [vmem:[#allocation2 + $0xb8] sm:$0xff] }
 0x7ba   :  { %v2417_v23 = vadd.f32 %v2354_v58, %v5012_v8  ;;  %v2356_v11 = vpop.f32.mrb[34].mxu1  ;;  %v5738_v58 = vld [vmem:[#allocation2 + $0xe8] sm:$0xff] }
 0x7bb   :  { %v2357_v18 = vpop.f32.mrb[35].mxu1  ;;  %v5744_v11 = vld [vmem:[#allocation2 + $0x118] sm:$0xff] }
 0x7bc   :  { %v2420_v19 = vcombine.low %v2416_v51, %v2417_v23  ;;  %v5736_v51 = vld [vmem:[#allocation2 + $0xb0] sm:$0xff]  ;;  %v5742_v23 = vld [vmem:[#allocation2 + $0xe0] sm:$0xff]  ;;  %v5750_v18 = vld [vmem:[#allocation2 + $0x148] sm:$0xff] }
 0x7be   :  { %v2427_v24 = vrot.slane %v2420_v19, %v4999_v63  ;;  %v5754_v19 = vld [vmem:[#allocation2 + $0x140] sm:$0xff] }
 0x7c0   :  { %v2434_v26 = vrot.slane %v2427_v24, %v4999_v63  ;;  %v5760_v24 = vld [vmem:[#allocation2 + $0x170] sm:$0xff] }
 0x7c2   :  { %v2436_v42 = vmul.f32 %v4403_v38, %v2434_v26  ;;  %v5762_v26 = vld [vmem:[#allocation2 + $0x1a8] sm:$0xff]  ;;  %v5768_v38 = vld [vmem:[#allocation2 + $0x1d8] sm:$0xff] }
 0x7c4   :  { %v2439_v9 = vadd.f32 %v2437_v28, %v2436_v42  ;;  %v5766_v28 = vld [vmem:[#allocation2 + $0x1a0] sm:$0xff]  ;;  %v5772_v42 = vld [vmem:[#allocation2 + $0x1d0] sm:$0xff] }
 0x7c6   :  { %4406 = vtanh.f32 %v2439_v9  ;;  %v5774_v9 = vld [vmem:[#allocation2 + $0x208] sm:$0xff] }
 0x7c7   :  { %6924 = vst [vmem:[#allocation42_spill] sm:$0xff] %v5774_v9 }
 0x7d0   :  { %v4407_v50 = vpop.eup %4406 }
 0x7d1   :  { %v2442_v52 = vmul.f32 %v4407_v50, %v2441_v48  ;;  %v5823_v48 = vld [vmem:[#allocation2 + $0x98] sm:$0xff]  ;;  %v5825_v50 = vld [vmem:[#allocation2 + $0xa8] sm:$0xff] }
 0x7d2   :  { %6932 = vst [vmem:[#allocation20_spill] sm:$0xff] %v5825_v50 }
 0x7d3   :  { %v5709_v34 = vadd.f32 %v2443_v56, %v2442_v52  ;;  %v5830_v52 = vld [vmem:[#allocation2 + $0x90] sm:$0xff]  ;;  %v5833_v56 = vld [vmem:[#allocation2 + $0xa0] sm:$0xff] }
 0x7d4   :  { %6933 = vst [vmem:[#allocation21_spill] sm:$0xff] %v5833_v56 }
 0x7d5   :  { %2446 = vst.msk [vmem:[#allocation10 + $0x4] ss:$8 sm:$0x3] %vm5019_vm0, %v5709_v34  ;;  %v2456_v54 = vrot.slane %v5709_v34, %v6721_v5  ;;  %v2452_v3 = vrot.slane %v5709_v34, %v6719_v2 }
 0x7d7   :  { %v2460_v32 = vpack.c.bf16 %v2456_v54, %v2456_v54  ;;  %v2459_v21 = vpack.c.bf16 %v2452_v3, %v2452_v3  ;;  %v5835_v54 = vld [vmem:[#allocation2 + $0xc8] sm:$0xff]  ;;  %v5837_v3 = vld [vmem:[#allocation2 + $0xd8] sm:$0xff] }
 0x7d8   :  { %6934 = vst [vmem:[#allocation22_spill] sm:$0xff] %v5837_v3 }
 0x7d9   :  { %2589 = vmatprep.mubr.bf16.mxu0 %v2460_v32  ;;  %2630 = vmatprep.mubr.bf16.mxu1 %v2460_v32 }
 0x7da   :  { %2590 = vmatmul.mubr.bf16.vlgmr.msra.gmra.mrb[36].mxu0 %v2459_v21  ;;  %2631 = vmatmul.mubr.bf16.vlgmr.msra.gmra.mrb[36].mxu1 %v2459_v21 }
 0x7db   :  { %2640 = vmatpush1.bf16.msra.mxu0 %v5718_v22  ;;  %2671 = vmatprep.mubr.bf16.mxu0 %v2460_v32  ;;  %v5842_v32 = vld [vmem:[#allocation2 + $0xc0] sm:$0xff] }
 0x7dc   :  { %2641 = vmatprep.subr.bf16.mxu0 %v5720_v29 }
 0x7df   :  { %2642 = vmatpush1.bf16.msra.mxu0 %v5724_v4 }
 0x7e0   :  { %2643 = vmatprep.subr.bf16.mxu0 %v5726_v10 }
 0x7e3   :  { %2644 = vmatpush1.bf16.msra.mxu0 %v5730_v25 }
 0x7e4   :  { %2645 = vmatprep.subr.bf16.mxu0 %v5732_v6 }
 0x7e7   :  { %2646 = vmatpush1.bf16.msra.mxu0 %v5736_v51 }
 0x7e8   :  { %2647 = vmatprep.subr.bf16.mxu0 %v5738_v58 }
 0x7eb   :  { %2648 = vmatpush1.bf16.msra.mxu0 %v5742_v23 }
 0x7ec   :  { %2649 = vmatprep.subr.bf16.mxu0 %v5744_v11 }
 0x7ef   :  { %2650 = vmatpush1.bf16.msra.mxu0 %v5748_v17 }
 0x7f0   :  { %2651 = vmatprep.subr.bf16.mxu0 %v5750_v18 }
 0x7f3   :  { %2652 = vmatpush1.bf16.msra.mxu0 %v5754_v19 }
 0x7f4   :  { %2653 = vmatprep.subr.bf16.mxu0 %v5756_v20 }
 0x7f7   :  { %2654 = vmatpush1.bf16.msra.mxu0 %v5760_v24 }
 0x7f8   :  { %2655 = vmatprep.subr.bf16.mxu0 %v5762_v26 }
 0x7fb   :  { %2656 = vmatpush1.bf16.msra.mxu0 %v5766_v28 }
 0x7fc   :  { %2657 = vmatprep.subr.bf16.mxu0 %v5768_v38 }
 0x7ff   :  { %2658 = vmatpush1.bf16.msra.mxu0 %v5772_v42 }
 0x800   :  { %2659 = vmatprep.subr.bf16.mxu0 %v5774_v9 }
 0x803   :  { %2660 = vmatpush1.bf16.msra.mxu0 %v5472_v13  ;;  %v5789_v13 = vld [vmem:[#allocation2 + $0x8] sm:$0xff] }
 0x804   :  { %2661 = vmatprep.subr.bf16.mxu0 %v5475_v40  ;;  %6925 = vst [vmem:[#allocation43_spill] sm:$0xff] %v5789_v13  ;;  %v5791_v40 = vld [vmem:[#allocation2] sm:$0xff]  ;;  %2878 = vmatprep.subr.bf16.mxu1 %v5789_v13 }
 0x805   :  { %2879 = vmatpush1.bf16.msra.mxu1 %v5791_v40 }
 0x807   :  { %2662 = vmatpush1.bf16.msra.mxu0 %v6869_v33  ;;  %v5793_v33 = vld [vmem:[#allocation2 + $0x18] sm:$0xff] }
 0x808   :  { %2663 = vmatprep.subr.bf16.mxu0 %v6870_v35  ;;  %6926 = vst [vmem:[#allocation52_spill] sm:$0xff] %v5793_v33  ;;  %v5797_v35 = vld [vmem:[#allocation2 + $0x10] sm:$0xff] }
 0x809   :  { %6927 = vst [vmem:[#allocation53_spill] sm:$0xff] %v5797_v35 }
 0x80b   :  { %2664 = vmatpush1.bf16.msra.mxu0 %v6871_v14  ;;  %v5799_v14 = vld [vmem:[#allocation2 + $0x38] sm:$0xff] }
 0x80c   :  { %2665 = vmatprep.subr.bf16.mxu0 %v6872_v36  ;;  %v5803_v36 = vld [vmem:[#allocation2 + $0x48] sm:$0xff]  ;;  %2880 = vmatprep.subr.bf16.mxu1 %v5799_v14 }
 0x80d   :  { %6928 = vst [vmem:[#allocation54_spill] sm:$0xff] %v5803_v36 }
 0x80f   :  { %2666 = vmatpush1.bf16.msra.mxu0 %v6873_v37  ;;  %v5806_v37 = vld [vmem:[#allocation2 + $0x30] sm:$0xff] }
 0x810   :  { %2667 = vmatprep.subr.bf16.mxu0 %v6874_v41  ;;  %v5809_v41 = vld [vmem:[#allocation2 + $0x40] sm:$0xff]  ;;  %2881 = vmatpush1.bf16.msra.mxu1 %v5806_v37 }
 0x811   :  { %6929 = vst [vmem:[#allocation55_spill] sm:$0xff] %v5809_v41 }
 0x813   :  { %2668 = vmatpush1.bf16.msra.mxu0 %v6875_v44  ;;  %v5811_v44 = vld [vmem:[#allocation2 + $0x68] sm:$0xff] }
 0x814   :  { %2669 = vmatprep.subr.bf16.mxu0 %v6876_v45  ;;  %v5813_v45 = vld [vmem:[#allocation2 + $0x78] sm:$0xff]  ;;  %2882 = vmatprep.subr.bf16.mxu1 %v5811_v44 }
 0x815   :  { %6930 = vst [vmem:[#allocation56_spill] sm:$0xff] %v5813_v45 }
 0x817   :  { %2670 = vmatpush1.bf16.msra.mxu0 %v6877_v47  ;;  %v5818_v47 = vld [vmem:[#allocation2 + $0x60] sm:$0xff] }
 0x818   :  { %2919 = vmatprep.subr.bf16.mxu0 %v5793_v33  ;;  %2883 = vmatpush1.bf16.msra.mxu1 %v5818_v47  ;;  %v5878_v33 = vld [vmem:[#allocation2 + $0x150] sm:$0xff] }
 0x819   :  { %2884 = vmatprep.subr.bf16.mxu1 %v5823_v48 }
 0x81a   :  { %2672 = vmatmul.mubr.bf16.vlgmr.msra.gmra.mrb[40].mxu0 %v2459_v21  ;;  %v5845_v21 = vld [vmem:[#allocation2 + $0xd0] sm:$0xff] }
 0x81b   :  { %2920 = vmatpush1.bf16.msra.mxu0 %v5797_v35  ;;  %6935 = vst [vmem:[#allocation23_spill] sm:$0xff] %v5845_v21  ;;  %v5871_v35 = vld [vmem:[#allocation2 + $0x158] sm:$0xff] }
 0x81c   :  { %2921 = vmatprep.subr.bf16.mxu0 %v5803_v36  ;;  %2885 = vmatpush1.bf16.msra.mxu1 %v5830_v52  ;;  %v5866_v36 = vld [vmem:[#allocation2 + $0x120] sm:$0xff] }
 0x81d   :  { %2886 = vmatprep.subr.bf16.mxu1 %v5835_v54 }
 0x81f   :  { %2922 = vmatpush1.bf16.msra.mxu0 %v5809_v41  ;;  %v5859_v41 = vld [vmem:[#allocation2 + $0x128] sm:$0xff] }
 0x820   :  { %2923 = vmatprep.subr.bf16.mxu0 %v5813_v45  ;;  %2887 = vmatpush1.bf16.msra.mxu1 %v5842_v32  ;;  %v5854_v45 = vld [vmem:[#allocation2 + $0xf0] sm:$0xff] }
 0x823   :  { %2924 = vmatpush1.bf16.msra.mxu0 %v5821_v46  ;;  %v5847_v46 = vld [vmem:[#allocation2 + $0xf8] sm:$0xff] }
 0x824   :  { %2925 = vmatprep.subr.bf16.mxu0 %v5825_v50  ;;  %v5849_v50 = vld [vmem:[#allocation2 + $0x108] sm:$0xff]  ;;  %2888 = vmatprep.subr.bf16.mxu1 %v5847_v46 }
 0x825   :  { %6936 = vst [vmem:[#allocation24_spill] sm:$0xff] %v5849_v50  ;;  %2889 = vmatpush1.bf16.msra.mxu1 %v5854_v45 }
 0x826   :  { %2890 = vmatprep.subr.bf16.mxu1 %v5859_v41 }
 0x827   :  { %2926 = vmatpush1.bf16.msra.mxu0 %v5833_v56  ;;  %v5857_v56 = vld [vmem:[#allocation2 + $0x100] sm:$0xff] }
 0x828   :  { %2927 = vmatprep.subr.bf16.mxu0 %v5837_v3  ;;  %6937 = vst [vmem:[#allocation25_spill] sm:$0xff] %v5857_v56  ;;  %v5861_v3 = vld [vmem:[#allocation2 + $0x138] sm:$0xff] }
 0x829   :  { %6938 = vst [vmem:[#allocation26_spill] sm:$0xff] %v5861_v3  ;;  %2891 = vmatpush1.bf16.msra.mxu1 %v5866_v36 }
 0x82a   :  { %2892 = vmatprep.subr.bf16.mxu1 %v5871_v35 }
 0x82b   :  { %2928 = vmatpush1.bf16.msra.mxu0 %v5845_v21  ;;  %v5869_v21 = vld [vmem:[#allocation2 + $0x130] sm:$0xff] }
 0x82c   :  { %2929 = vmatprep.subr.bf16.mxu0 %v5849_v50  ;;  %6939 = vst [vmem:[#allocation27_spill] sm:$0xff] %v5869_v21  ;;  %v5873_v50 = vld [vmem:[#allocation2 + $0x168] sm:$0xff] }
 0x82d   :  { %6940 = vst [vmem:[#allocation28_spill] sm:$0xff] %v5873_v50  ;;  %2893 = vmatpush1.bf16.msra.mxu1 %v5878_v33 }
 0x82e   :  { %2894 = vmatprep.subr.bf16.mxu1 %v5649_v60 }
 0x82f   :  { %2930 = vmatpush1.bf16.msra.mxu0 %v5857_v56  ;;  %v5881_v56 = vld [vmem:[#allocation2 + $0x160] sm:$0xff] }
 0x830   :  { %2931 = vmatprep.subr.bf16.mxu0 %v5861_v3  ;;  %6941 = vst [vmem:[#allocation29_spill] sm:$0xff] %v5881_v56  ;;  %v5901_v3 = vld [vmem:[#allocation2 + $0x1c0] sm:$0xff] }
 0x831   :  { %2895 = vmatpush1.bf16.msra.mxu1 %v5652_v1  ;;  %6945 = vst [vmem:[#allocation33_spill] sm:$0xff] %v5901_v3 }
 0x832   :  { %2896 = vmatprep.subr.bf16.mxu1 %v5655_v0 }
 0x833   :  { %2932 = vmatpush1.bf16.msra.mxu0 %v5869_v21  ;;  %v5889_v21 = vld [vmem:[#allocation2 + $0x198] sm:$0xff] }
 0x834   :  { %2933 = vmatprep.subr.bf16.mxu0 %v5873_v50  ;;  %6942 = vst [vmem:[#allocation30_spill] sm:$0xff] %v5889_v21  ;;  %v5893_v50 = vld [vmem:[#allocation2 + $0x190] sm:$0xff] }
 0x835   :  { %2897 = vmatpush1.bf16.msra.mxu1 %v5658_v59  ;;  %6943 = vst [vmem:[#allocation31_spill] sm:$0xff] %v5893_v50 }
 0x836   :  { %2898 = vmatprep.subr.bf16.mxu1 %v5661_v7  ;;  %v5905_v7 = vld [vmem:[#allocation2 + $0x1f8] sm:$0xff] }
 0x837   :  { %2934 = vmatpush1.bf16.msra.mxu0 %v5881_v56  ;;  %v5897_v56 = vld [vmem:[#allocation2 + $0x1c8] sm:$0xff]  ;;  %6946 = vst [vmem:[#allocation34_spill] sm:$0xff] %v5905_v7 }
 0x838   :  { %2935 = vmatprep.subr.bf16.mxu0 %v5889_v21  ;;  %6944 = vst [vmem:[#allocation32_spill] sm:$0xff] %v5897_v56  ;;  %v5913_v21 = vld [vmem:[#allocation2 + $0x228] sm:$0xff] }
 0x839   :  { %2899 = vmatpush1.bf16.msra.mxu1 %v5664_v61  ;;  %6948 = vst [vmem:[#allocation38_spill] sm:$0xff] %v5913_v21 }
 0x83a   :  { %2900 = vmatprep.subr.bf16.mxu1 %v5667_v53 }
 0x83b   :  { %2936 = vmatpush1.bf16.msra.mxu0 %v5893_v50  ;;  %v5909_v50 = vld [vmem:[#allocation2 + $0x1f0] sm:$0xff] }
 0x83c   :  { %2937 = vmatprep.subr.bf16.mxu0 %v5897_v56  ;;  %6947 = vst [vmem:[#allocation36_spill] sm:$0xff] %v5909_v50  ;;  %v5919_v56 = vld [vmem:[#allocation2 + $0x258] sm:$0xff] }
 0x83d   :  { %2901 = vmatpush1.bf16.msra.mxu1 %v5670_v27  ;;  %6950 = vst [vmem:[#allocation17_spill] sm:$0xff] %v5919_v56 }
 0x83e   :  { %2902 = vmatprep.subr.bf16.mxu1 %v5673_v55  ;;  %v2681_v55 = vld [vmem:[#allocation3 + $0x5] ss:$8 sm:$0xf] }
 0x83f   :  { %2938 = vmatpush1.bf16.msra.mxu0 %v5901_v3  ;;  %v5917_v3 = vld [vmem:[#allocation2 + $0x220] sm:$0xff] }
 0x840   :  { %2939 = vmatprep.subr.bf16.mxu0 %v5905_v7  ;;  %6949 = vst [vmem:[#allocation40_spill] sm:$0xff] %v5917_v3  ;;  %v5923_v7 = vld [vmem:[#allocation2 + $0x250] sm:$0xff] }
 0x841   :  { %2903 = vmatpush1.bf16.msra.mxu1 %v5676_v57  ;;  %6951 = vst [vmem:[#allocation58_spill] sm:$0xff] %v5923_v7 }
 0x842   :  { %2904 = vmatprep.subr.bf16.mxu1 %v5678_v30  ;;  %v5934_v30 = vld [vmem:[#allocation2 + $0x2b8] sm:$0xff] }
 0x843   :  { %2940 = vmatpush1.bf16.msra.mxu0 %v5909_v50  ;;  %v5926_v50 = vld [vmem:[#allocation2 + $0x288] sm:$0xff]  ;;  %6954 = vst [vmem:[#allocation61_spill] sm:$0xff] %v5934_v30 }
 0x844   :  { %2941 = vmatprep.subr.bf16.mxu0 %v5913_v21  ;;  %6952 = vst [vmem:[#allocation59_spill] sm:$0xff] %v5926_v50  ;;  %v5931_v21 = vld [vmem:[#allocation2 + $0x280] sm:$0xff] }
 0x845   :  { %2905 = vmatpush1.bf16.msra.mxu1 %v5682_v62  ;;  %6953 = vst [vmem:[#allocation60_spill] sm:$0xff] %v5931_v21 }
 0x846   :  { %2906 = vmatprep.subr.bf16.mxu1 %v5684_v31 }
 0x847   :  { %2942 = vmatpush1.bf16.msra.mxu0 %v5917_v3  ;;  %v5942_v3 = vld [vmem:[#allocation2 + $0x2e8] sm:$0xff] }
 0x848   :  { %2943 = vmatprep.subr.bf16.mxu0 %v5919_v56  ;;  %v5939_v56 = vld [vmem:[#allocation2 + $0x2b0] sm:$0xff]  ;;  %6956 = vst [vmem:[#allocation63_spill] sm:$0xff] %v5942_v3 }
 0x849   :  { %2907 = vmatpush1.bf16.msra.mxu1 %v5688_v39  ;;  %6955 = vst [vmem:[#allocation62_spill] sm:$0xff] %v5939_v56 }
 0x84a   :  { %2908 = vmatprep.subr.bf16.mxu1 %v5690_v49 }
 0x84b   :  { %2944 = vmatpush1.bf16.msra.mxu0 %v5923_v7 }
 0x84c   :  { %2945 = vmatprep.subr.bf16.mxu0 %v5926_v50  ;;  %v5947_v50 = vld [vmem:[#allocation2 + $0x2e0] sm:$0xff] }
 0x84d   :  { %2909 = vmatpush1.bf16.msra.mxu1 %v5694_v15  ;;  %6957 = vst [vmem:[#allocation64_spill] sm:$0xff] %v5947_v50 }
 0x84e   :  { %2960 = vmatprep.subr.bf16.mxu1 %v5697_v16 }
 0x84f   :  { %2946 = vmatpush1.bf16.msra.mxu0 %v5931_v21 }
 0x850   :  { %2947 = vmatprep.subr.bf16.mxu0 %v5934_v30 }
 0x853   :  { %2948 = vmatpush1.bf16.msra.mxu0 %v5939_v56 }
 0x854   :  { %2949 = vmatprep.subr.bf16.mxu0 %v5942_v3  ;;  %v2682_v3 = vld [vmem:[#allocation3 + $0x5] ss:$8 sm:$0x30] }
 0x855   :  { %v2683_v53 = vor.u32 %v2682_v3, %v2681_v55 }
 0x857   :  { %2950 = vmatpush1.bf16.msra.mxu0 %v5947_v50  ;;  %v2710_v59 = vrot.slane %v2683_v53, 2 }
 0x858   :  { %3199 = vmatprep.subr.bf16.mxu0 %v5789_v13 }
 0x8ad   :  { %v2591_v21 = vpop.f32.mrb[36].mxu0  ;;  %v2632_v30 = vpop.f32.mrb[36].mxu1 }
 0x8ae   :  { %v2593_v7 = vpop.f32.mrb[37].mxu0  ;;  %v2634_v49 = vpop.f32.mrb[37].mxu1 }
 0x8af   :  { %v2686_v39 = vcombine.low %v2591_v21, %v2593_v7  ;;  %v2714_v15 = vcombine.low %v2632_v30, %v2634_v49  ;;  %v2595_v31 = vpop.f32.mrb[38].mxu0  ;;  %v2636_v62 = vpop.f32.mrb[38].mxu1 }
 0x8b0   :  { %v2596_v57 = vpop.f32.mrb[39].mxu0  ;;  %v2637_v16 = vpop.f32.mrb[39].mxu1 }
 0x8b1   :  { %v2693_v56 = vrot.slane %v2686_v39, %v4999_v63  ;;  %v2721_v13 = vrot.slane %v2714_v15, %v4999_v63 }
 0x8b3   :  { %v2700_v27 = vrot.slane %v2693_v56, %v4999_v63  ;;  %v2728_v9 = vrot.slane %v2721_v13, %v4999_v63 }
 0x8b5   :  { %v2702_v50 = vadd.f32 %v2700_v27, %v2683_v53  ;;  %v2730_v7 = vadd.f32 %v2728_v9, %v2710_v59 }
 0x8b7   :  { %v4185_v61 = vmul.f32 -1.442695, %v2702_v50  ;;  %v4186_v30 = vmul.f32 -1.442695, %v2730_v7 }
 0x8b9   :  { %4408 = vpow2.f32 %v4185_v61  ;;  %v2758_v61 = vrot.slane %v2683_v53, 4 }
 0x8ba   :  { %4410 = vpow2.f32 %v4186_v30 }
 0x8c3   :  { %v4409_v62 = vpop.eup %4408 }
 0x8c4   :  { %v2706_v57 = vadd.f32 1.0, %v4409_v62  ;;  %v4411_v16 = vpop.eup %4410 }
 0x8c5   :  { %v2734_v56 = vadd.f32 1.0, %v4411_v16  ;;  %v6011_v16 = vld [vmem:[#allocation2 + $0x200] sm:$0xff] }
 0x8c6   :  { %4412 = vrcp.f32 %v2706_v57 }
 0x8c7   :  { %4414 = vrcp.f32 %v2734_v56  ;;  %v6960_v56 = vld [vmem:[#allocation45_spill] sm:$0xff] }
 0x8d0   :  { %v4413_v9 = vpop.eup %4412 }
 0x8d1   :  { %v4415_v7 = vpop.eup %4414 }
 0x8d2   :  { %v2762_v30 = vsub.f32 1.0, %v4415_v7 }
 0x8ed   :  { %v2673_v31 = vpop.f32.mrb[40].mxu0 }
 0x8ee   :  { %v2737_v39 = vadd.f32 %v2673_v31, %v6777_v43  ;;  %v2675_v49 = vpop.f32.mrb[41].mxu0  ;;  %v2764_v31 = vmul.f32 %v4415_v7, %v5709_v34  ;;  %v6958_v34 = vld [vmem:[#allocation42_spill] sm:$0xff]  ;;  %v6970_v7 = vld [vmem:[#allocation51_spill] sm:$0xff] }
 0x8ef   :  { %v2738_v55 = vadd.f32 %v2675_v49, %v5012_v8  ;;  %v2677_v27 = vpop.f32.mrb[42].mxu0 }
 0x8f0   :  { %v2678_v15 = vpop.f32.mrb[43].mxu0 }
 0x8f1   :  { %v2741_v50 = vcombine.low %v2737_v39, %v2738_v55  ;;  %v6959_v15 = vld [vmem:[#allocation44_spill] sm:$0xff] }
 0x8f3   :  { %v2748_v13 = vrot.slane %v2741_v50, %v4999_v63  ;;  %v6014_v50 = vld [vmem:[#allocation2 + $0x238] sm:$0xff] }
 0x8f5   :  { %v2755_v59 = vrot.slane %v2748_v13, %v4999_v63  ;;  %v6964_v13 = vld [vmem:[#allocation47_spill] sm:$0xff] }
 0x8f7   :  { %v2757_v3 = vmul.f32 %v4413_v9, %v2755_v59  ;;  %v6027_v59 = vld [vmem:[#allocation2 + $0x260] sm:$0xff]  ;;  %v6030_v9 = vld [vmem:[#allocation2 + $0x298] sm:$0xff] }
 0x8f8   :  { %6965 = vst [vmem:[#allocation45_spill] sm:$0xff] %v6027_v59 }
 0x8f9   :  { %v2760_v21 = vadd.f32 %v2758_v61, %v2757_v3  ;;  %v6966_v61 = vld [vmem:[#allocation48_spill] sm:$0xff]  ;;  %v6968_v3 = vld [vmem:[#allocation49_spill] sm:$0xff] }
 0x8fb   :  { %4416 = vtanh.f32 %v2760_v21  ;;  %v6035_v21 = vld [vmem:[#allocation2 + $0x290] sm:$0xff] }
 0x8fc   :  { %6969 = vst [vmem:[#allocation47_spill] sm:$0xff] %v6035_v21 }
 0x905   :  { %v4417_v62 = vpop.eup %4416 }
 0x906   :  { %v2763_v57 = vmul.f32 %v4417_v62, %v2762_v30  ;;  %v6038_v30 = vld [vmem:[#allocation2 + $0x2c8] sm:$0xff] }
 0x907   :  { %6971 = vst [vmem:[#allocation48_spill] sm:$0xff] %v6038_v30  ;;  %v6972_v62 = vld [vmem:[#allocation50_spill] sm:$0xff] }
 0x908   :  { %v5960_v49 = vadd.f32 %v2764_v31, %v2763_v57  ;;  %v6043_v57 = vld [vmem:[#allocation2 + $0x2c0] sm:$0xff]  ;;  %v6974_v31 = vld [vmem:[#allocation18_spill] sm:$0xff] }
 0x909   :  { %6973 = vst [vmem:[#allocation49_spill] sm:$0xff] %v6043_v57 }
 0x90a   :  { %2767 = vst.msk [vmem:[#allocation10 + $0x5] ss:$8 sm:$0x3] %vm5019_vm0, %v5960_v49  ;;  %v2777_v53 = vrot.slane %v5960_v49, %v6721_v5  ;;  %v2773_v39 = vrot.slane %v5960_v49, %v6719_v2 }
 0x90c   :  { %v2781_v55 = vpack.c.bf16 %v2777_v53, %v2777_v53  ;;  %v5969_v27 = vpack.c.bf16 %v2773_v39, %v2773_v39  ;;  %v6046_v53 = vld [vmem:[#allocation2 + $0x2f8] sm:$0xff]  ;;  %v6976_v39 = vld [vmem:[#allocation19_spill] sm:$0xff] }
 0x90d   :  { %6975 = vst [vmem:[#allocation51_spill] sm:$0xff] %v6046_v53 }
 0x90e   :  { %2910 = vmatprep.mubr.bf16.mxu1 %v2781_v55  ;;  %2951 = vmatprep.mubr.bf16.mxu0 %v2781_v55 }
 0x90f   :  { %2911 = vmatmul.mubr.bf16.vlgmr.msra.gmra.mrb[40].mxu1 %v5969_v27  ;;  %2952 = vmatmul.mubr.bf16.vlgmr.msra.gmra.mrb[44].mxu0 %v5969_v27 }
 0x910   :  { %2961 = vmatpush1.bf16.msra.mxu1 %v5718_v22  ;;  %2992 = vmatprep.mubr.bf16.mxu1 %v2781_v55  ;;  %v6051_v55 = vld [vmem:[#allocation2 + $0x2f0] sm:$0xff] }
 0x911   :  { %2962 = vmatprep.subr.bf16.mxu1 %v5720_v29  ;;  %3200 = vmatpush1.bf16.msra.mxu0 %v5791_v40  ;;  %6977 = vst [vmem:[#allocation50_spill] sm:$0xff] %v6051_v55 }
 0x912   :  { %3201 = vmatprep.subr.bf16.mxu0 %v5799_v14 }
 0x914   :  { %2963 = vmatpush1.bf16.msra.mxu1 %v5724_v4 }
 0x915   :  { %2964 = vmatprep.subr.bf16.mxu1 %v5726_v10  ;;  %3202 = vmatpush1.bf16.msra.mxu0 %v5806_v37 }
 0x916   :  { %3203 = vmatprep.subr.bf16.mxu0 %v5811_v44 }
 0x918   :  { %2965 = vmatpush1.bf16.msra.mxu1 %v5730_v25 }
 0x919   :  { %2966 = vmatprep.subr.bf16.mxu1 %v5732_v6  ;;  %3204 = vmatpush1.bf16.msra.mxu0 %v5818_v47 }
 0x91a   :  { %3205 = vmatprep.subr.bf16.mxu0 %v5823_v48 }
 0x91c   :  { %2967 = vmatpush1.bf16.msra.mxu1 %v5736_v51 }
 0x91d   :  { %2968 = vmatprep.subr.bf16.mxu1 %v5738_v58  ;;  %3206 = vmatpush1.bf16.msra.mxu0 %v5830_v52 }
 0x91e   :  { %3207 = vmatprep.subr.bf16.mxu0 %v5835_v54 }
 0x920   :  { %2969 = vmatpush1.bf16.msra.mxu1 %v5742_v23 }
 0x921   :  { %2970 = vmatprep.subr.bf16.mxu1 %v5744_v11  ;;  %3208 = vmatpush1.bf16.msra.mxu0 %v5842_v32 }
 0x922   :  { %3209 = vmatprep.subr.bf16.mxu0 %v5847_v46 }
 0x924   :  { %2971 = vmatpush1.bf16.msra.mxu1 %v5748_v17 }
 0x925   :  { %2972 = vmatprep.subr.bf16.mxu1 %v5750_v18  ;;  %3210 = vmatpush1.bf16.msra.mxu0 %v5854_v45 }
 0x926   :  { %3211 = vmatprep.subr.bf16.mxu0 %v5859_v41 }
 0x928   :  { %2973 = vmatpush1.bf16.msra.mxu1 %v5754_v19 }
 0x929   :  { %2974 = vmatprep.subr.bf16.mxu1 %v5756_v20  ;;  %3212 = vmatpush1.bf16.msra.mxu0 %v5866_v36 }
 0x92a   :  { %3213 = vmatprep.subr.bf16.mxu0 %v5871_v35 }
 0x92c   :  { %2975 = vmatpush1.bf16.msra.mxu1 %v5760_v24 }
 0x92d   :  { %2976 = vmatprep.subr.bf16.mxu1 %v5762_v26  ;;  %3214 = vmatpush1.bf16.msra.mxu0 %v5878_v33 }
 0x92e   :  { %3215 = vmatprep.subr.bf16.mxu0 %v5649_v60  ;;  %v6019_v60 = vld [vmem:[#allocation2 + $0x230] sm:$0xff] }
 0x92f   :  { %6961 = vst [vmem:[#allocation42_spill] sm:$0xff] %v6019_v60 }
 0x930   :  { %2977 = vmatpush1.bf16.msra.mxu1 %v5766_v28 }
 0x931   :  { %2978 = vmatprep.subr.bf16.mxu1 %v5768_v38  ;;  %3216 = vmatpush1.bf16.msra.mxu0 %v5652_v1  ;;  %v6962_v1 = vld [vmem:[#allocation46_spill] sm:$0xff] }
 0x932   :  { %3217 = vmatprep.subr.bf16.mxu0 %v5655_v0  ;;  %v6022_v0 = vld [vmem:[#allocation2 + $0x268] sm:$0xff]  ;;  %6967 = vst [vmem:[#allocation46_spill] sm:$0xff] %v6030_v9 }
 0x933   :  { %6963 = vst [vmem:[#allocation44_spill] sm:$0xff] %v6022_v0 }
 0x934   :  { %2979 = vmatpush1.bf16.msra.mxu1 %v5772_v42 }
 0x935   :  { %2980 = vmatprep.subr.bf16.mxu1 %v6958_v34  ;;  %3218 = vmatpush1.bf16.msra.mxu0 %v6959_v15  ;;  %v6978_v15 = vld [vmem:[#allocation35_spill] sm:$0xff] }
 0x936   :  { %3219 = vmatprep.subr.bf16.mxu0 %v6960_v56  ;;  %v6979_v56 = vld [vmem:[#allocation37_spill] sm:$0xff] }
 0x938   :  { %2981 = vmatpush1.bf16.msra.mxu1 %v6011_v16 }
 0x939   :  { %2982 = vmatprep.subr.bf16.mxu1 %v6014_v50  ;;  %3220 = vmatpush1.bf16.msra.mxu0 %v6962_v1  ;;  %v6980_v1 = vld [vmem:[#allocation52_spill] sm:$0xff] }
 0x93a   :  { %3221 = vmatprep.subr.bf16.mxu0 %v6964_v13  ;;  %v6981_v13 = vld [vmem:[#allocation39_spill] sm:$0xff] }
 0x93c   :  { %2983 = vmatpush1.bf16.msra.mxu1 %v6019_v60 }
 0x93d   :  { %2984 = vmatprep.subr.bf16.mxu1 %v6022_v0  ;;  %3222 = vmatpush1.bf16.msra.mxu0 %v6966_v61  ;;  %v6982_v61 = vld [vmem:[#allocation41_spill] sm:$0xff] }
 0x93e   :  { %3223 = vmatprep.subr.bf16.mxu0 %v6968_v3  ;;  %v6983_v3 = vld [vmem:[#allocation53_spill] sm:$0xff] }
 0x940   :  { %2985 = vmatpush1.bf16.msra.mxu1 %v6027_v59 }
 0x941   :  { %2986 = vmatprep.subr.bf16.mxu1 %v6030_v9  ;;  %3224 = vmatpush1.bf16.msra.mxu0 %v6970_v7  ;;  %v6984_v7 = vld [vmem:[#allocation54_spill] sm:$0xff] }
 0x942   :  { %3225 = vmatprep.subr.bf16.mxu0 %v6972_v62  ;;  %v6985_v62 = vld [vmem:[#allocation55_spill] sm:$0xff] }
 0x944   :  { %2987 = vmatpush1.bf16.msra.mxu1 %v6035_v21  ;;  %v3002_v21 = vld [vmem:[#allocation3 + $0x6] ss:$8 sm:$0xf] }
 0x945   :  { %2988 = vmatprep.subr.bf16.mxu1 %v6038_v30  ;;  %3226 = vmatpush1.bf16.msra.mxu0 %v6974_v31  ;;  %v6986_v31 = vld [vmem:[#allocation56_spill] sm:$0xff] }
 0x946   :  { %3227 = vmatprep.subr.bf16.mxu0 %v6976_v39  ;;  %v6987_v39 = vld [vmem:[#allocation57_spill] sm:$0xff] }
 0x948   :  { %2989 = vmatpush1.bf16.msra.mxu1 %v6043_v57 }
 0x949   :  { %2990 = vmatprep.subr.bf16.mxu1 %v6046_v53  ;;  %3228 = vmatpush1.bf16.msra.mxu0 %v6978_v15  ;;  %v6988_v15 = vld [vmem:[#allocation20_spill] sm:$0xff] }
 0x94a   :  { %3229 = vmatprep.subr.bf16.mxu0 %v6979_v56  ;;  %v6989_v56 = vld [vmem:[#allocation21_spill] sm:$0xff] }
 0x94c   :  { %2991 = vmatpush1.bf16.msra.mxu1 %v6051_v55 }
 0x94d   :  { %3240 = vmatprep.subr.bf16.mxu1 %v6980_v1  ;;  %3230 = vmatpush1.bf16.msra.mxu0 %v6981_v13  ;;  %v6990_v1 = vld [vmem:[#allocation22_spill] sm:$0xff]  ;;  %v6991_v13 = vld [vmem:[#allocation23_spill] sm:$0xff] }
 0x94e   :  { %3281 = vmatprep.subr.bf16.mxu0 %v6982_v61  ;;  %v6992_v61 = vld [vmem:[#allocation24_spill] sm:$0xff] }
 0x94f   :  { %2993 = vmatmul.mubr.bf16.vlgmr.msra.gmra.mrb[44].mxu1 %v5969_v27  ;;  %v6993_v27 = vld [vmem:[#allocation25_spill] sm:$0xff] }
 0x950   :  { %3241 = vmatpush1.bf16.msra.mxu1 %v6983_v3  ;;  %v6994_v3 = vld [vmem:[#allocation26_spill] sm:$0xff] }
 0x951   :  { %3242 = vmatprep.subr.bf16.mxu1 %v6984_v7  ;;  %v6995_v7 = vld [vmem:[#allocation27_spill] sm:$0xff] }
 0x954   :  { %3243 = vmatpush1.bf16.msra.mxu1 %v6985_v62  ;;  %v6996_v62 = vld [vmem:[#allocation28_spill] sm:$0xff] }
 0x955   :  { %3244 = vmatprep.subr.bf16.mxu1 %v6986_v31  ;;  %v6997_v31 = vld [vmem:[#allocation29_spill] sm:$0xff] }
 0x958   :  { %3245 = vmatpush1.bf16.msra.mxu1 %v6987_v39  ;;  %v6998_v39 = vld [vmem:[#allocation30_spill] sm:$0xff] }
 0x959   :  { %3246 = vmatprep.subr.bf16.mxu1 %v6988_v15  ;;  %v6999_v15 = vld [vmem:[#allocation31_spill] sm:$0xff] }
 0x95c   :  { %3247 = vmatpush1.bf16.msra.mxu1 %v6989_v56  ;;  %v7000_v56 = vld [vmem:[#allocation32_spill] sm:$0xff] }
 0x95d   :  { %3248 = vmatprep.subr.bf16.mxu1 %v6990_v1  ;;  %v7001_v1 = vld [vmem:[#allocation33_spill] sm:$0xff] }
 0x960   :  { %3249 = vmatpush1.bf16.msra.mxu1 %v6991_v13  ;;  %v7002_v13 = vld [vmem:[#allocation34_spill] sm:$0xff] }
 0x961   :  { %3250 = vmatprep.subr.bf16.mxu1 %v6992_v61  ;;  %v7003_v61 = vld [vmem:[#allocation36_spill] sm:$0xff] }
 0x964   :  { %3251 = vmatpush1.bf16.msra.mxu1 %v6993_v27  ;;  %v7004_v27 = vld [vmem:[#allocation38_spill] sm:$0xff] }
 0x965   :  { %3252 = vmatprep.subr.bf16.mxu1 %v6994_v3  ;;  %v7005_v3 = vld [vmem:[#allocation40_spill] sm:$0xff] }
 0x968   :  { %3253 = vmatpush1.bf16.msra.mxu1 %v6995_v7  ;;  %v7006_v7 = vld [vmem:[#allocation17_spill] sm:$0xff] }
 0x969   :  { %3254 = vmatprep.subr.bf16.mxu1 %v6996_v62  ;;  %v7007_v62 = vld [vmem:[#allocation58_spill] sm:$0xff] }
 0x96c   :  { %3255 = vmatpush1.bf16.msra.mxu1 %v6997_v31  ;;  %v7008_v31 = vld [vmem:[#allocation59_spill] sm:$0xff] }
 0x96d   :  { %3256 = vmatprep.subr.bf16.mxu1 %v6998_v39  ;;  %v7009_v39 = vld [vmem:[#allocation60_spill] sm:$0xff] }
 0x970   :  { %3257 = vmatpush1.bf16.msra.mxu1 %v6999_v15  ;;  %v7010_v15 = vld [vmem:[#allocation61_spill] sm:$0xff] }
 0x971   :  { %3258 = vmatprep.subr.bf16.mxu1 %v7000_v56  ;;  %v7011_v56 = vld [vmem:[#allocation62_spill] sm:$0xff] }
 0x974   :  { %3259 = vmatpush1.bf16.msra.mxu1 %v7001_v1  ;;  %v7012_v1 = vld [vmem:[#allocation63_spill] sm:$0xff] }
 0x975   :  { %3260 = vmatprep.subr.bf16.mxu1 %v7002_v13  ;;  %v7013_v13 = vld [vmem:[#allocation64_spill] sm:$0xff] }
 0x978   :  { %3261 = vmatpush1.bf16.msra.mxu1 %v7003_v61  ;;  %v7014_v61 = vld [vmem:[#allocation43_spill] sm:$0xff] }
 0x979   :  { %3262 = vmatprep.subr.bf16.mxu1 %v7004_v27 }
 0x97c   :  { %3263 = vmatpush1.bf16.msra.mxu1 %v7005_v3 }
 0x97d   :  { %3264 = vmatprep.subr.bf16.mxu1 %v7006_v7 }
 0x980   :  { %3265 = vmatpush1.bf16.msra.mxu1 %v7007_v62 }
 0x981   :  { %3266 = vmatprep.subr.bf16.mxu1 %v7008_v31 }
 0x984   :  { %3267 = vmatpush1.bf16.msra.mxu1 %v7009_v39 }
 0x985   :  { %3268 = vmatprep.subr.bf16.mxu1 %v7010_v15 }
 0x988   :  { %3269 = vmatpush1.bf16.msra.mxu1 %v7011_v56  ;;  %v3003_v56 = vld [vmem:[#allocation3 + $0x6] ss:$8 sm:$0x30] }
 0x989   :  { %3270 = vmatprep.subr.bf16.mxu1 %v7012_v1  ;;  %v3004_v9 = vor.u32 %v3003_v56, %v3002_v21 }
 0x98b   :  { %v3031_v0 = vrot.slane %v3004_v9, 2 }
 0x98c   :  { %3271 = vmatpush1.bf16.msra.mxu1 %v7013_v13 }
 0x98d   :  { %3520 = vmatprep.subr.bf16.mxu1 %v7014_v61 }
 0x9e2   :  { %v2912_v27 = vpop.f32.mrb[40].mxu1  ;;  %v2953_v3 = vpop.f32.mrb[44].mxu0 }
 0x9e3   :  { %v2914_v55 = vpop.f32.mrb[41].mxu1  ;;  %v2955_v7 = vpop.f32.mrb[45].mxu0 }
 0x9e4   :  { %v3007_v53 = vcombine.low %v2912_v27, %v2914_v55  ;;  %v3035_v62 = vcombine.low %v2953_v3, %v2955_v7  ;;  %v2916_v57 = vpop.f32.mrb[42].mxu1  ;;  %v2957_v31 = vpop.f32.mrb[46].mxu0 }
 0x9e5   :  { %v2917_v30 = vpop.f32.mrb[43].mxu1  ;;  %v2958_v39 = vpop.f32.mrb[47].mxu0 }
 0x9e6   :  { %v3014_v15 = vrot.slane %v3007_v53, %v4999_v63  ;;  %v3042_v61 = vrot.slane %v3035_v62, %v4999_v63 }
 0x9e8   :  { %v3021_v1 = vrot.slane %v3014_v15, %v4999_v63  ;;  %v3049_v60 = vrot.slane %v3042_v61, %v4999_v63 }
 0x9ea   :  { %v3023_v13 = vadd.f32 %v3021_v1, %v3004_v9  ;;  %v3051_v55 = vadd.f32 %v3049_v60, %v3031_v0  ;;  %v3079_v0 = vrot.slane %v3004_v9, 4 }
 0x9ec   :  { %v4187_v59 = vmul.f32 -1.442695, %v3023_v13  ;;  %v4188_v57 = vmul.f32 -1.442695, %v3051_v55 }
 0x9ee   :  { %4418 = vpow2.f32 %v4187_v59 }
 0x9ef   :  { %4420 = vpow2.f32 %v4188_v57 }
 0x9f8   :  { %v4419_v3 = vpop.eup %4418 }
 0x9f9   :  { %v3027_v30 = vadd.f32 1.0, %v4419_v3  ;;  %v4421_v39 = vpop.eup %4420 }
 0x9fa   :  { %v3055_v56 = vadd.f32 1.0, %v4421_v39  ;;  %v7051_v39 = vld [vmem:[#allocation60_spill] sm:$0xff] }
 0x9fb   :  { %4422 = vrcp.f32 %v3027_v30 }
 0x9fc   :  { %4424 = vrcp.f32 %v3055_v56  ;;  %v7054_v56 = vld [vmem:[#allocation63_spill] sm:$0xff] }
 0xa05   :  { %v4423_v59 = vpop.eup %4422 }
 0xa06   :  { %v4425_v55 = vpop.eup %4424 }
 0xa07   :  { %v3083_v57 = vsub.f32 1.0, %v4425_v55 }
 0xa22   :  { %v2994_v53 = vpop.f32.mrb[44].mxu1 }
 0xa23   :  { %v3058_v7 = vadd.f32 %v2994_v53, %v6777_v43  ;;  %v2996_v31 = vpop.f32.mrb[45].mxu1  ;;  %v3085_v53 = vmul.f32 %v4425_v55, %v5960_v49  ;;  %v7049_v49 = vld [vmem:[#allocation58_spill] sm:$0xff]  ;;  %v6203_v55 = vld [vmem:[#allocation2 + $0x1e0] sm:$0xff] }
 0xa24   :  { %v3059_v21 = vadd.f32 %v2996_v31, %v5012_v8  ;;  %v2998_v1 = vpop.f32.mrb[46].mxu1 }
 0xa25   :  { %v2999_v62 = vpop.f32.mrb[47].mxu1 }
 0xa26   :  { %v3062_v15 = vcombine.low %v3058_v7, %v3059_v21  ;;  %v7052_v62 = vld [vmem:[#allocation61_spill] sm:$0xff] }
 0xa28   :  { %v3069_v13 = vrot.slane %v3062_v15, %v4999_v63  ;;  %v7053_v15 = vld [vmem:[#allocation62_spill] sm:$0xff] }
 0xa2a   :  { %v3076_v60 = vrot.slane %v3069_v13, %v4999_v63  ;;  %v7055_v13 = vld [vmem:[#allocation64_spill] sm:$0xff] }
 0xa2c   :  { %v3078_v27 = vmul.f32 %v4423_v59, %v3076_v60  ;;  %v6188_v60 = vld [vmem:[#allocation2 + $0x188] sm:$0xff]  ;;  %v6194_v59 = vld [vmem:[#allocation2 + $0x1b8] sm:$0xff] }
 0xa2e   :  { %v3081_v61 = vadd.f32 %v3079_v0, %v3078_v27  ;;  %v6191_v0 = vld [vmem:[#allocation2 + $0x180] sm:$0xff]  ;;  %v6197_v27 = vld [vmem:[#allocation2 + $0x1b0] sm:$0xff] }
 0xa30   :  { %4426 = vtanh.f32 %v3081_v61  ;;  %v6200_v61 = vld [vmem:[#allocation2 + $0x1e8] sm:$0xff] }
 0xa3a   :  { %v4427_v3 = vpop.eup %4426 }
 0xa3b   :  { %v3084_v30 = vmul.f32 %v4427_v3, %v3083_v57  ;;  %v6206_v57 = vld [vmem:[#allocation2 + $0x218] sm:$0xff]  ;;  %v6209_v3 = vld [vmem:[#allocation2 + $0x210] sm:$0xff] }
 0xa3d   :  { %v6101_v31 = vadd.f32 %v3085_v53, %v3084_v30  ;;  %v6212_v30 = vld [vmem:[#allocation2 + $0x248] sm:$0xff]  ;;  %v6215_v53 = vld [vmem:[#allocation2 + $0x240] sm:$0xff] }
 0xa3f   :  { %3088 = vst.msk [vmem:[#allocation10 + $0x6] ss:$8 sm:$0x3] %vm5019_vm0, %v6101_v31  ;;  %v3098_v9 = vrot.slane %v6101_v31, %v6721_v5  ;;  %v3094_v7 = vrot.slane %v6101_v31, %v6719_v2 }
 0xa41   :  { %v3102_v21 = vpack.c.bf16 %v3098_v9, %v3098_v9  ;;  %v3101_v1 = vpack.c.bf16 %v3094_v7, %v3094_v7  ;;  %v6217_v9 = vld [vmem:[#allocation2 + $0x278] sm:$0xff]  ;;  %v6221_v7 = vld [vmem:[#allocation2 + $0x270] sm:$0xff] }
 0xa43   :  { %3231 = vmatprep.mubr.bf16.mxu0 %v3102_v21  ;;  %3272 = vmatprep.mubr.bf16.mxu1 %v3102_v21 }
 0xa44   :  { %3232 = vmatmul.mubr.bf16.vlgmr.msra.gmra.mrb[48].mxu0 %v3101_v1  ;;  %3273 = vmatmul.mubr.bf16.vlgmr.msra.gmra.mrb[48].mxu1 %v3101_v1 }
 0xa45   :  { %3282 = vmatpush1.bf16.msra.mxu0 %v5718_v22  ;;  %3313 = vmatprep.mubr.bf16.mxu0 %v3102_v21  ;;  %v7015_v22 = vld [vmem:[#allocation42_spill] sm:$0xff] }
 0xa46   :  { %3283 = vmatprep.subr.bf16.mxu0 %v5720_v29  ;;  %3521 = vmatpush1.bf16.msra.mxu1 %v5791_v40  ;;  %v7016_v29 = vld [vmem:[#allocation44_spill] sm:$0xff]  ;;  %v6223_v21 = vld [vmem:[#allocation2 + $0x2a8] sm:$0xff] }
 0xa47   :  { %3522 = vmatprep.subr.bf16.mxu1 %v5799_v14  ;;  %v7034_v40 = vld [vmem:[#allocation24_spill] sm:$0xff]  ;;  %v7037_v14 = vld [vmem:[#allocation27_spill] sm:$0xff] }
 0xa49   :  { %3284 = vmatpush1.bf16.msra.mxu0 %v5724_v4  ;;  %v7017_v4 = vld [vmem:[#allocation45_spill] sm:$0xff] }
 0xa4a   :  { %3285 = vmatprep.subr.bf16.mxu0 %v5726_v10  ;;  %3523 = vmatpush1.bf16.msra.mxu1 %v5806_v37  ;;  %v7018_v10 = vld [vmem:[#allocation46_spill] sm:$0xff]  ;;  %v7039_v37 = vld [vmem:[#allocation29_spill] sm:$0xff] }
 0xa4b   :  { %3524 = vmatprep.subr.bf16.mxu1 %v5811_v44  ;;  %v7041_v44 = vld [vmem:[#allocation31_spill] sm:$0xff] }
 0xa4d   :  { %3286 = vmatpush1.bf16.msra.mxu0 %v5730_v25  ;;  %v7019_v25 = vld [vmem:[#allocation47_spill] sm:$0xff] }
 0xa4e   :  { %3287 = vmatprep.subr.bf16.mxu0 %v5732_v6  ;;  %3525 = vmatpush1.bf16.msra.mxu1 %v5818_v47  ;;  %v7020_v6 = vld [vmem:[#allocation48_spill] sm:$0xff]  ;;  %v7043_v47 = vld [vmem:[#allocation33_spill] sm:$0xff] }
 0xa4f   :  { %3526 = vmatprep.subr.bf16.mxu1 %v5823_v48  ;;  %v7045_v48 = vld [vmem:[#allocation36_spill] sm:$0xff] }
 0xa51   :  { %3288 = vmatpush1.bf16.msra.mxu0 %v5736_v51  ;;  %v7021_v51 = vld [vmem:[#allocation49_spill] sm:$0xff] }
 0xa52   :  { %3289 = vmatprep.subr.bf16.mxu0 %v5738_v58  ;;  %3527 = vmatpush1.bf16.msra.mxu1 %v5830_v52  ;;  %v7022_v58 = vld [vmem:[#allocation51_spill] sm:$0xff]  ;;  %v7046_v52 = vld [vmem:[#allocation38_spill] sm:$0xff] }
 0xa53   :  { %3528 = vmatprep.subr.bf16.mxu1 %v5835_v54  ;;  %v7047_v54 = vld [vmem:[#allocation40_spill] sm:$0xff] }
 0xa55   :  { %3290 = vmatpush1.bf16.msra.mxu0 %v5742_v23  ;;  %v7023_v23 = vld [vmem:[#allocation50_spill] sm:$0xff] }
 0xa56   :  { %3291 = vmatprep.subr.bf16.mxu0 %v5744_v11  ;;  %3529 = vmatpush1.bf16.msra.mxu1 %v5842_v32  ;;  %v7024_v11 = vld [vmem:[#allocation52_spill] sm:$0xff]  ;;  %v7048_v32 = vld [vmem:[#allocation17_spill] sm:$0xff] }
 0xa57   :  { %3530 = vmatprep.subr.bf16.mxu1 %v5847_v46  ;;  %v7044_v46 = vld [vmem:[#allocation34_spill] sm:$0xff] }
 0xa59   :  { %3292 = vmatpush1.bf16.msra.mxu0 %v5748_v17  ;;  %v7025_v17 = vld [vmem:[#allocation53_spill] sm:$0xff] }
 0xa5a   :  { %3293 = vmatprep.subr.bf16.mxu0 %v5750_v18  ;;  %3531 = vmatpush1.bf16.msra.mxu1 %v5854_v45  ;;  %v7026_v18 = vld [vmem:[#allocation54_spill] sm:$0xff]  ;;  %v7042_v45 = vld [vmem:[#allocation32_spill] sm:$0xff] }
 0xa5b   :  { %3532 = vmatprep.subr.bf16.mxu1 %v5859_v41  ;;  %v7040_v41 = vld [vmem:[#allocation30_spill] sm:$0xff] }
 0xa5d   :  { %3294 = vmatpush1.bf16.msra.mxu0 %v5754_v19  ;;  %v7027_v19 = vld [vmem:[#allocation55_spill] sm:$0xff] }
 0xa5e   :  { %3295 = vmatprep.subr.bf16.mxu0 %v5756_v20  ;;  %3533 = vmatpush1.bf16.msra.mxu1 %v5866_v36  ;;  %v7028_v20 = vld [vmem:[#allocation56_spill] sm:$0xff] }
 0xa5f   :  { %3534 = vmatprep.subr.bf16.mxu1 %v5871_v35  ;;  %v7036_v35 = vld [vmem:[#allocation26_spill] sm:$0xff]  ;;  %v7038_v36 = vld [vmem:[#allocation28_spill] sm:$0xff] }
 0xa61   :  { %3296 = vmatpush1.bf16.msra.mxu0 %v5760_v24  ;;  %v7029_v24 = vld [vmem:[#allocation57_spill] sm:$0xff] }
 0xa62   :  { %3297 = vmatprep.subr.bf16.mxu0 %v5762_v26  ;;  %3535 = vmatpush1.bf16.msra.mxu1 %v5878_v33  ;;  %v7030_v26 = vld [vmem:[#allocation20_spill] sm:$0xff]  ;;  %v7035_v33 = vld [vmem:[#allocation25_spill] sm:$0xff] }
 0xa63   :  { %3536 = vmatprep.subr.bf16.mxu1 %v6188_v60 }
 0xa65   :  { %3298 = vmatpush1.bf16.msra.mxu0 %v5766_v28  ;;  %v7031_v28 = vld [vmem:[#allocation21_spill] sm:$0xff] }
 0xa66   :  { %3299 = vmatprep.subr.bf16.mxu0 %v5768_v38  ;;  %v7032_v38 = vld [vmem:[#allocation22_spill] sm:$0xff]  ;;  %3537 = vmatpush1.bf16.msra.mxu1 %v6191_v0 }
 0xa67   :  { %3538 = vmatprep.subr.bf16.mxu1 %v6194_v59 }
 0xa69   :  { %3300 = vmatpush1.bf16.msra.mxu0 %v5772_v42  ;;  %v7033_v42 = vld [vmem:[#allocation23_spill] sm:$0xff] }
 0xa6a   :  { %3301 = vmatprep.subr.bf16.mxu0 %v6958_v34  ;;  %v7050_v34 = vld [vmem:[#allocation59_spill] sm:$0xff]  ;;  %3539 = vmatpush1.bf16.msra.mxu1 %v6197_v27 }
 0xa6b   :  { %3540 = vmatprep.subr.bf16.mxu1 %v6200_v61 }
 0xa6d   :  { %3302 = vmatpush1.bf16.msra.mxu0 %v6011_v16 }
 0xa6e   :  { %3303 = vmatprep.subr.bf16.mxu0 %v6014_v50  ;;  %3541 = vmatpush1.bf16.msra.mxu1 %v6203_v55 }
 0xa6f   :  { %3542 = vmatprep.subr.bf16.mxu1 %v6206_v57 }
 0xa71   :  { %3304 = vmatpush1.bf16.msra.mxu0 %v7015_v22 }
 0xa72   :  { %3305 = vmatprep.subr.bf16.mxu0 %v7016_v29  ;;  %3543 = vmatpush1.bf16.msra.mxu1 %v6209_v3 }
 0xa73   :  { %3544 = vmatprep.subr.bf16.mxu1 %v6212_v30 }
 0xa75   :  { %3306 = vmatpush1.bf16.msra.mxu0 %v7017_v4 }
 0xa76   :  { %3307 = vmatprep.subr.bf16.mxu0 %v7018_v10  ;;  %3545 = vmatpush1.bf16.msra.mxu1 %v6215_v53 }
 0xa77   :  { %3546 = vmatprep.subr.bf16.mxu1 %v6217_v9 }
 0xa79   :  { %3308 = vmatpush1.bf16.msra.mxu0 %v7019_v25 }
 0xa7a   :  { %3309 = vmatprep.subr.bf16.mxu0 %v7020_v6  ;;  %3547 = vmatpush1.bf16.msra.mxu1 %v6221_v7 }
 0xa7b   :  { %3548 = vmatprep.subr.bf16.mxu1 %v6223_v21 }
 0xa7d   :  { %3310 = vmatpush1.bf16.msra.mxu0 %v7021_v51 }
 0xa7e   :  { %3311 = vmatprep.subr.bf16.mxu0 %v7022_v58 }
 0xa81   :  { %3312 = vmatpush1.bf16.msra.mxu0 %v7023_v23 }
 0xa82   :  { %3561 = vmatprep.subr.bf16.mxu0 %v7024_v11  ;;  %v6229_v11 = vld [vmem:[#allocation2 + $0x2d8] sm:$0xff] }
 0xa84   :  { %3314 = vmatmul.mubr.bf16.vlgmr.msra.gmra.mrb[52].mxu0 %v3101_v1  ;;  %v6227_v1 = vld [vmem:[#allocation2 + $0x2a0] sm:$0xff] }
 0xa85   :  { %3562 = vmatpush1.bf16.msra.mxu0 %v7025_v17  ;;  %3549 = vmatpush1.bf16.msra.mxu1 %v6227_v1  ;;  %v6233_v17 = vld [vmem:[#allocation2 + $0x2d0] sm:$0xff] }
 0xa86   :  { %3563 = vmatprep.subr.bf16.mxu0 %v7026_v18  ;;  %3550 = vmatprep.subr.bf16.mxu1 %v6229_v11  ;;  %v6236_v18 = vld [vmem:[#allocation2 + $0x28] sm:$0xff] }
 0xa89   :  { %3564 = vmatpush1.bf16.msra.mxu0 %v7027_v19  ;;  %3551 = vmatpush1.bf16.msra.mxu1 %v6233_v17 }
 0xa8a   :  { %3565 = vmatprep.subr.bf16.mxu0 %v7028_v20  ;;  %3602 = vmatprep.subr.bf16.mxu1 %v6236_v18 }
 0xa8d   :  { %3566 = vmatpush1.bf16.msra.mxu0 %v7029_v24 }
 0xa8e   :  { %3567 = vmatprep.subr.bf16.mxu0 %v7030_v26 }
 0xa91   :  { %3568 = vmatpush1.bf16.msra.mxu0 %v7031_v28 }
 0xa92   :  { %3569 = vmatprep.subr.bf16.mxu0 %v7032_v38 }
 0xa95   :  { %3570 = vmatpush1.bf16.msra.mxu0 %v7033_v42 }
 0xa96   :  { %3571 = vmatprep.subr.bf16.mxu0 %v7034_v40 }
 0xa99   :  { %3572 = vmatpush1.bf16.msra.mxu0 %v7035_v33 }
 0xa9a   :  { %3573 = vmatprep.subr.bf16.mxu0 %v7036_v35 }
 0xa9d   :  { %3574 = vmatpush1.bf16.msra.mxu0 %v7037_v14 }
 0xa9e   :  { %3575 = vmatprep.subr.bf16.mxu0 %v7038_v36  ;;  %v3323_v36 = vld [vmem:[#allocation3 + $0x7] ss:$8 sm:$0xf] }
 0xaa1   :  { %3576 = vmatpush1.bf16.msra.mxu0 %v7039_v37  ;;  %v3324_v37 = vld [vmem:[#allocation3 + $0x7] ss:$8 sm:$0x30] }
 0xaa2   :  { %3577 = vmatprep.subr.bf16.mxu0 %v7040_v41 }
 0xaa5   :  { %3578 = vmatpush1.bf16.msra.mxu0 %v7041_v44  ;;  %v3325_v44 = vor.u32 %v3324_v37, %v3323_v36 }
 0xaa6   :  { %3579 = vmatprep.subr.bf16.mxu0 %v7042_v45 }
 0xaa9   :  { %3580 = vmatpush1.bf16.msra.mxu0 %v7043_v47 }
 0xaaa   :  { %3581 = vmatprep.subr.bf16.mxu0 %v7044_v46 }
 0xaad   :  { %3582 = vmatpush1.bf16.msra.mxu0 %v7045_v48  ;;  %v3352_v48 = vrot.slane %v3325_v44, 2 }
 0xaae   :  { %3583 = vmatprep.subr.bf16.mxu0 %v7046_v52 }
 0xab1   :  { %3584 = vmatpush1.bf16.msra.mxu0 %v7047_v54 }
 0xab2   :  { %3585 = vmatprep.subr.bf16.mxu0 %v7048_v32 }
 0xab5   :  { %3586 = vmatpush1.bf16.msra.mxu0 %v7049_v49 }
 0xab6   :  { %3587 = vmatprep.subr.bf16.mxu0 %v7050_v34 }
 0xab9   :  { %3588 = vmatpush1.bf16.msra.mxu0 %v7051_v39 }
 0xaba   :  { %3589 = vmatprep.subr.bf16.mxu0 %v7052_v62 }
 0xabd   :  { %3590 = vmatpush1.bf16.msra.mxu0 %v7053_v15 }
 0xabe   :  { %3591 = vmatprep.subr.bf16.mxu0 %v7054_v56 }
 0xac1   :  { %3592 = vmatpush1.bf16.msra.mxu0 %v7055_v13 }
 0xb17   :  { %v3233_v19 = vpop.f32.mrb[48].mxu0  ;;  %v3274_v20 = vpop.f32.mrb[48].mxu1 }
 0xb18   :  { %v3235_v24 = vpop.f32.mrb[49].mxu0  ;;  %v3276_v26 = vpop.f32.mrb[49].mxu1 }
 0xb19   :  { %v3328_v28 = vcombine.low %v3233_v19, %v3235_v24  ;;  %v3356_v38 = vcombine.low %v3274_v20, %v3276_v26  ;;  %v3237_v42 = vpop.f32.mrb[50].mxu0  ;;  %v3278_v40 = vpop.f32.mrb[50].mxu1 }
 0xb1a   :  { %v3238_v33 = vpop.f32.mrb[51].mxu0  ;;  %v3279_v35 = vpop.f32.mrb[51].mxu1  ;;  %v3400_v42 = vrot.slane %v3325_v44, 4 }
 0xb1b   :  { %v3335_v14 = vrot.slane %v3328_v28, %v4999_v63  ;;  %v3363_v47 = vrot.slane %v3356_v38, %v4999_v63 }
 0xb1d   :  { %v3342_v41 = vrot.slane %v3335_v14, %v4999_v63  ;;  %v3370_v52 = vrot.slane %v3363_v47, %v4999_v63 }
 0xb1f   :  { %v3344_v45 = vadd.f32 %v3342_v41, %v3325_v44  ;;  %v3372_v54 = vadd.f32 %v3370_v52, %v3352_v48 }
 0xb21   :  { %v4189_v46 = vmul.f32 -1.442695, %v3344_v45  ;;  %v4190_v32 = vmul.f32 -1.442695, %v3372_v54  ;;  %v6257_v54 = vld [vmem:[#allocation2 + $0x20] sm:$0xff] }
 0xb23   :  { %4428 = vpow2.f32 %v4189_v46 }
 0xb24   :  { %4430 = vpow2.f32 %v4190_v32  ;;  %v6259_v32 = vld [vmem:[#allocation2 + $0x58] sm:$0xff] }
 0xb2d   :  { %v4429_v49 = vpop.eup %4428 }
 0xb2e   :  { %v3348_v34 = vadd.f32 1.0, %v4429_v49  ;;  %v4431_v19 = vpop.eup %4430  ;;  %v6265_v49 = vld [vmem:[#allocation2 + $0x88] sm:$0xff] }
 0xb2f   :  { %v3376_v26 = vadd.f32 1.0, %v4431_v19  ;;  %v6287_v19 = vld [vmem:[#allocation2 + $0x110] sm:$0xff] }
 0xb30   :  { %4432 = vrcp.f32 %v3348_v34  ;;  %v6269_v34 = vld [vmem:[#allocation2 + $0x80] sm:$0xff] }
 0xb31   :  { %4434 = vrcp.f32 %v3376_v26  ;;  %v6295_v26 = vld [vmem:[#allocation2 + $0x178] sm:$0xff] }
 0xb3a   :  { %v4433_v40 = vpop.eup %4432 }
 0xb3b   :  { %v4435_v14 = vpop.eup %4434 }
 0xb3c   :  { %v3404_v36 = vsub.f32 1.0, %v4435_v14  ;;  %v3406_v45 = vmul.f32 %v4435_v14, %v6101_v31  ;;  %v6263_v31 = vld [vmem:[#allocation2 + $0x50] sm:$0xff]  ;;  %v3760_v14 = vld [vmem:[#allocation2 + $0x78] sm:$0xff] }
 0xb57   :  { %v3315_v39 = vpop.f32.mrb[52].mxu0 }
 0xb58   :  { %v3379_v62 = vadd.f32 %v3315_v39, %v6777_v43  ;;  %v3317_v15 = vpop.f32.mrb[53].mxu0  ;;  %v6271_v39 = vld [vmem:[#allocation2 + $0xb8] sm:$0xff] }
 0xb59   :  { %v3380_v56 = vadd.f32 %v3317_v15, %v5012_v8  ;;  %v3319_v13 = vpop.f32.mrb[54].mxu0  ;;  %v6277_v15 = vld [vmem:[#allocation2 + $0xe8] sm:$0xff] }
 0xb5a   :  { %v3320_v20 = vpop.f32.mrb[55].mxu0  ;;  %v6283_v13 = vld [vmem:[#allocation2 + $0x118] sm:$0xff] }
 0xb5b   :  { %v3383_v24 = vcombine.low %v3379_v62, %v3380_v56  ;;  %v6275_v62 = vld [vmem:[#allocation2 + $0xb0] sm:$0xff]  ;;  %v6281_v56 = vld [vmem:[#allocation2 + $0xe0] sm:$0xff]  ;;  %v6289_v20 = vld [vmem:[#allocation2 + $0x148] sm:$0xff] }
 0xb5d   :  { %v3390_v28 = vrot.slane %v3383_v24, %v4999_v63  ;;  %v6293_v24 = vld [vmem:[#allocation2 + $0x140] sm:$0xff] }
 0xb5f   :  { %v3397_v38 = vrot.slane %v3390_v28, %v4999_v63  ;;  %v6299_v28 = vld [vmem:[#allocation2 + $0x170] sm:$0xff] }
 0xb61   :  { %v3399_v33 = vmul.f32 %v4433_v40, %v3397_v38  ;;  %v6301_v38 = vld [vmem:[#allocation2 + $0x1a8] sm:$0xff]  ;;  %v6307_v40 = vld [vmem:[#allocation2 + $0x1d8] sm:$0xff] }
 0xb63   :  { %v3402_v35 = vadd.f32 %v3400_v42, %v3399_v33  ;;  %v6305_v42 = vld [vmem:[#allocation2 + $0x1a0] sm:$0xff]  ;;  %v6311_v33 = vld [vmem:[#allocation2 + $0x1d0] sm:$0xff] }
 0xb65   :  { %4436 = vtanh.f32 %v3402_v35  ;;  %v6313_v35 = vld [vmem:[#allocation2 + $0x208] sm:$0xff] }
 0xb6f   :  { %v4437_v37 = vpop.eup %4436 }
 0xb70   :  { %v3405_v41 = vmul.f32 %v4437_v37, %v3404_v36  ;;  %v3764_v36 = vld [vmem:[#allocation2 + $0x98] sm:$0xff]  ;;  %v3766_v37 = vld [vmem:[#allocation2 + $0xa8] sm:$0xff] }
 0xb72   :  { %v6248_v47 = vadd.f32 %v3406_v45, %v3405_v41  ;;  %v3763_v41 = vld [vmem:[#allocation2 + $0x90] sm:$0xff]  ;;  %v3765_v45 = vld [vmem:[#allocation2 + $0xa0] sm:$0xff] }
 0xb74   :  { %3409 = vst.msk [vmem:[#allocation10 + $0x7] ss:$8 sm:$0x3] %vm5019_vm0, %v6248_v47  ;;  %v3419_v44 = vrot.slane %v6248_v47, %v6721_v5  ;;  %v3415_v46 = vrot.slane %v6248_v47, %v6719_v2 }
 0xb76   :  { %v3423_v48 = vpack.c.bf16 %v3419_v44, %v3419_v44  ;;  %v3422_v52 = vpack.c.bf16 %v3415_v46, %v3415_v46  ;;  %v3770_v44 = vld [vmem:[#allocation2 + $0xc8] sm:$0xff]  ;;  %v3772_v46 = vld [vmem:[#allocation2 + $0xd8] sm:$0xff] }
 0xb78   :  { %3552 = vmatprep.mubr.bf16.mxu1 %v3423_v48  ;;  %3593 = vmatprep.mubr.bf16.mxu0 %v3423_v48 }
 0xb79   :  { %3553 = vmatmul.mubr.bf16.vlgmr.msra.gmra.mrb[52].mxu1 %v3422_v52  ;;  %3594 = vmatmul.mubr.bf16.vlgmr.msra.gmra.mrb[56].mxu0 %v3422_v52 }
 0xb7a   :  { %3603 = vmatpush1.bf16.msra.mxu1 %v6257_v54  ;;  %3634 = vmatprep.mubr.bf16.mxu1 %v3423_v48  ;;  %v3769_v48 = vld [vmem:[#allocation2 + $0xc0] sm:$0xff] }
 0xb7b   :  { %3604 = vmatprep.subr.bf16.mxu1 %v6259_v32 }
 0xb7e   :  { %3605 = vmatpush1.bf16.msra.mxu1 %v6263_v31 }
 0xb7f   :  { %3606 = vmatprep.subr.bf16.mxu1 %v6265_v49 }
 0xb82   :  { %3607 = vmatpush1.bf16.msra.mxu1 %v6269_v34 }
 0xb83   :  { %3608 = vmatprep.subr.bf16.mxu1 %v6271_v39 }
 0xb86   :  { %3609 = vmatpush1.bf16.msra.mxu1 %v6275_v62 }
 0xb87   :  { %3610 = vmatprep.subr.bf16.mxu1 %v6277_v15 }
 0xb8a   :  { %3611 = vmatpush1.bf16.msra.mxu1 %v6281_v56 }
 0xb8b   :  { %3612 = vmatprep.subr.bf16.mxu1 %v6283_v13 }
 0xb8e   :  { %3613 = vmatpush1.bf16.msra.mxu1 %v6287_v19 }
 0xb8f   :  { %3614 = vmatprep.subr.bf16.mxu1 %v6289_v20 }
 0xb92   :  { %3615 = vmatpush1.bf16.msra.mxu1 %v6293_v24 }
 0xb93   :  { %3616 = vmatprep.subr.bf16.mxu1 %v6295_v26 }
 0xb96   :  { %3617 = vmatpush1.bf16.msra.mxu1 %v6299_v28 }
 0xb97   :  { %3618 = vmatprep.subr.bf16.mxu1 %v6301_v38 }
 0xb9a   :  { %3619 = vmatpush1.bf16.msra.mxu1 %v6305_v42 }
 0xb9b   :  { %3620 = vmatprep.subr.bf16.mxu1 %v6307_v40 }
 0xb9e   :  { %3621 = vmatpush1.bf16.msra.mxu1 %v6311_v33 }
 0xb9f   :  { %3622 = vmatprep.subr.bf16.mxu1 %v6313_v35 }
 0xba2   :  { %3623 = vmatpush1.bf16.msra.mxu1 %v6011_v16  ;;  %v3746_v16 = vld [vmem:[#allocation2 + $0x8] sm:$0xff] }
 0xba3   :  { %3624 = vmatprep.subr.bf16.mxu1 %v6014_v50  ;;  %v3745_v50 = vld [vmem:[#allocation2] sm:$0xff]  ;;  %3841 = vmatprep.subr.bf16.mxu0 %v3746_v16  ;;  %v3776_v16 = vld [vmem:[#allocation2 + $0xf8] sm:$0xff] }
 0xba4   :  { %3842 = vmatpush1.bf16.msra.mxu0 %v3745_v50  ;;  %v3778_v50 = vld [vmem:[#allocation2 + $0x108] sm:$0xff] }
 0xba6   :  { %3625 = vmatpush1.bf16.msra.mxu1 %v7015_v22  ;;  %v3748_v22 = vld [vmem:[#allocation2 + $0x18] sm:$0xff] }
 0xba7   :  { %3626 = vmatprep.subr.bf16.mxu1 %v7016_v29  ;;  %v3747_v29 = vld [vmem:[#allocation2 + $0x10] sm:$0xff] }
 0xbaa   :  { %3627 = vmatpush1.bf16.msra.mxu1 %v7017_v4  ;;  %v3752_v4 = vld [vmem:[#allocation2 + $0x38] sm:$0xff] }
 0xbab   :  { %3628 = vmatprep.subr.bf16.mxu1 %v7018_v10  ;;  %v3754_v10 = vld [vmem:[#allocation2 + $0x48] sm:$0xff]  ;;  %3843 = vmatprep.subr.bf16.mxu0 %v3752_v4 }
 0xbac   :  { %v3782_v4 = vld [vmem:[#allocation2 + $0x128] sm:$0xff] }
 0xbae   :  { %3629 = vmatpush1.bf16.msra.mxu1 %v7019_v25  ;;  %v3751_v25 = vld [vmem:[#allocation2 + $0x30] sm:$0xff] }
 0xbaf   :  { %3630 = vmatprep.subr.bf16.mxu1 %v7020_v6  ;;  %v3753_v6 = vld [vmem:[#allocation2 + $0x40] sm:$0xff]  ;;  %3844 = vmatpush1.bf16.msra.mxu0 %v3751_v25 }
 0xbb0   :  { %v3781_v25 = vld [vmem:[#allocation2 + $0x120] sm:$0xff] }
 0xbb2   :  { %3631 = vmatpush1.bf16.msra.mxu1 %v7021_v51  ;;  %v3758_v51 = vld [vmem:[#allocation2 + $0x68] sm:$0xff] }
 0xbb3   :  { %3632 = vmatprep.subr.bf16.mxu1 %v7022_v58  ;;  %3845 = vmatprep.subr.bf16.mxu0 %v3758_v51  ;;  %v3757_v58 = vld [vmem:[#allocation2 + $0x60] sm:$0xff]  ;;  %v3788_v51 = vld [vmem:[#allocation2 + $0x158] sm:$0xff] }
 0xbb4   :  { %3846 = vmatpush1.bf16.msra.mxu0 %v3757_v58  ;;  %v3787_v58 = vld [vmem:[#allocation2 + $0x150] sm:$0xff] }
 0xbb5   :  { %3847 = vmatprep.subr.bf16.mxu0 %v3764_v36  ;;  %v3796_v36 = vld [vmem:[#allocation2 + $0x198] sm:$0xff] }
 0xbb6   :  { %3633 = vmatpush1.bf16.msra.mxu1 %v7023_v23  ;;  %v3759_v23 = vld [vmem:[#allocation2 + $0x70] sm:$0xff] }
 0xbb7   :  { %3882 = vmatprep.subr.bf16.mxu1 %v3748_v22  ;;  %v3775_v22 = vld [vmem:[#allocation2 + $0xf0] sm:$0xff] }
 0xbb8   :  { %3848 = vmatpush1.bf16.msra.mxu0 %v3763_v41  ;;  %v3802_v41 = vld [vmem:[#allocation2 + $0x1c8] sm:$0xff] }
 0xbb9   :  { %3635 = vmatmul.mubr.bf16.vlgmr.msra.gmra.mrb[56].mxu1 %v3422_v52  ;;  %3849 = vmatprep.subr.bf16.mxu0 %v3770_v44  ;;  %v3771_v52 = vld [vmem:[#allocation2 + $0xd0] sm:$0xff] }
 0xbba   :  { %3883 = vmatpush1.bf16.msra.mxu1 %v3747_v29  ;;  %v3777_v29 = vld [vmem:[#allocation2 + $0x100] sm:$0xff] }
 0xbbb   :  { %3884 = vmatprep.subr.bf16.mxu1 %v3754_v10  ;;  %v3784_v10 = vld [vmem:[#allocation2 + $0x138] sm:$0xff] }
 0xbbc   :  { %3850 = vmatpush1.bf16.msra.mxu0 %v3769_v48 }
 0xbbd   :  { %3851 = vmatprep.subr.bf16.mxu0 %v3776_v16 }
 0xbbe   :  { %3885 = vmatpush1.bf16.msra.mxu1 %v3753_v6  ;;  %v3783_v6 = vld [vmem:[#allocation2 + $0x130] sm:$0xff] }
 0xbbf   :  { %3886 = vmatprep.subr.bf16.mxu1 %v3760_v14  ;;  %v3790_v14 = vld [vmem:[#allocation2 + $0x168] sm:$0xff] }
 0xbc0   :  { %3852 = vmatpush1.bf16.msra.mxu0 %v3775_v22 }
 0xbc1   :  { %3853 = vmatprep.subr.bf16.mxu0 %v3782_v4  ;;  %v3645_v4 = vld [vmem:[#allocation3 + $0x30] ss:$8 sm:$0x30] }
 0xbc2   :  { %3887 = vmatpush1.bf16.msra.mxu1 %v3759_v23  ;;  %v3789_v23 = vld [vmem:[#allocation2 + $0x160] sm:$0xff] }
 0xbc3   :  { %3888 = vmatprep.subr.bf16.mxu1 %v3766_v37  ;;  %v3795_v37 = vld [vmem:[#allocation2 + $0x190] sm:$0xff] }
 0xbc4   :  { %3854 = vmatpush1.bf16.msra.mxu0 %v3781_v25 }
 0xbc5   :  { %3855 = vmatprep.subr.bf16.mxu0 %v3788_v51 }
 0xbc6   :  { %3889 = vmatpush1.bf16.msra.mxu1 %v3765_v45  ;;  %v3801_v45 = vld [vmem:[#allocation2 + $0x1c0] sm:$0xff] }
 0xbc7   :  { %3890 = vmatprep.subr.bf16.mxu1 %v3772_v46 }
 0xbc8   :  { %3856 = vmatpush1.bf16.msra.mxu0 %v3787_v58 }
 0xbc9   :  { %3857 = vmatprep.subr.bf16.mxu0 %v6188_v60  ;;  %v3808_v60 = vld [vmem:[#allocation2 + $0x1f8] sm:$0xff] }
 0xbca   :  { %3891 = vmatpush1.bf16.msra.mxu1 %v3771_v52 }
 0xbcb   :  { %3892 = vmatprep.subr.bf16.mxu1 %v3778_v50 }
 0xbcc   :  { %3858 = vmatpush1.bf16.msra.mxu0 %v6191_v0  ;;  %v3807_v0 = vld [vmem:[#allocation2 + $0x1f0] sm:$0xff] }
 0xbcd   :  { %3859 = vmatprep.subr.bf16.mxu0 %v6194_v59  ;;  %v3814_v59 = vld [vmem:[#allocation2 + $0x228] sm:$0xff] }
 0xbce   :  { %3893 = vmatpush1.bf16.msra.mxu1 %v3777_v29 }
 0xbcf   :  { %3894 = vmatprep.subr.bf16.mxu1 %v3784_v10 }
 0xbd0   :  { %3860 = vmatpush1.bf16.msra.mxu0 %v6197_v27  ;;  %v3813_v27 = vld [vmem:[#allocation2 + $0x220] sm:$0xff] }
 0xbd1   :  { %3861 = vmatprep.subr.bf16.mxu0 %v6200_v61  ;;  %v3820_v61 = vld [vmem:[#allocation2 + $0x258] sm:$0xff] }
 0xbd2   :  { %3895 = vmatpush1.bf16.msra.mxu1 %v3783_v6 }
 0xbd3   :  { %3896 = vmatprep.subr.bf16.mxu1 %v3790_v14 }
 0xbd4   :  { %3862 = vmatpush1.bf16.msra.mxu0 %v6203_v55  ;;  %v3819_v55 = vld [vmem:[#allocation2 + $0x250] sm:$0xff] }
 0xbd5   :  { %3863 = vmatprep.subr.bf16.mxu0 %v6206_v57  ;;  %v3826_v57 = vld [vmem:[#allocation2 + $0x288] sm:$0xff] }
 0xbd6   :  { %3897 = vmatpush1.bf16.msra.mxu1 %v3789_v23 }
 0xbd7   :  { %3898 = vmatprep.subr.bf16.mxu1 %v3796_v36 }
 0xbd8   :  { %3864 = vmatpush1.bf16.msra.mxu0 %v6209_v3  ;;  %v3825_v3 = vld [vmem:[#allocation2 + $0x280] sm:$0xff] }
 0xbd9   :  { %3865 = vmatprep.subr.bf16.mxu0 %v6212_v30  ;;  %v3832_v30 = vld [vmem:[#allocation2 + $0x2b8] sm:$0xff] }
 0xbda   :  { %3899 = vmatpush1.bf16.msra.mxu1 %v3795_v37 }
 0xbdb   :  { %3900 = vmatprep.subr.bf16.mxu1 %v3802_v41 }
 0xbdc   :  { %3866 = vmatpush1.bf16.msra.mxu0 %v6215_v53  ;;  %v3831_v53 = vld [vmem:[#allocation2 + $0x2b0] sm:$0xff] }
 0xbdd   :  { %3867 = vmatprep.subr.bf16.mxu0 %v6217_v9  ;;  %v3838_v9 = vld [vmem:[#allocation2 + $0x2e8] sm:$0xff] }
 0xbde   :  { %3901 = vmatpush1.bf16.msra.mxu1 %v3801_v45 }
 0xbdf   :  { %3902 = vmatprep.subr.bf16.mxu1 %v3808_v60 }
 0xbe0   :  { %3868 = vmatpush1.bf16.msra.mxu0 %v6221_v7  ;;  %v3837_v7 = vld [vmem:[#allocation2 + $0x2e0] sm:$0xff] }
 0xbe1   :  { %3869 = vmatprep.subr.bf16.mxu0 %v6223_v21 }
 0xbe2   :  { %3903 = vmatpush1.bf16.msra.mxu1 %v3807_v0 }
 0xbe3   :  { %3904 = vmatprep.subr.bf16.mxu1 %v3814_v59 }
 0xbe4   :  { %3870 = vmatpush1.bf16.msra.mxu0 %v6227_v1 }
 0xbe5   :  { %3871 = vmatprep.subr.bf16.mxu0 %v6229_v11 }
 0xbe6   :  { %3905 = vmatpush1.bf16.msra.mxu1 %v3813_v27 }
 0xbe7   :  { %3906 = vmatprep.subr.bf16.mxu1 %v3820_v61 }
 0xbe8   :  { %3872 = vmatpush1.bf16.msra.mxu0 %v6233_v17  ;;  %v3644_v17 = vld [vmem:[#allocation3 + $0x30] ss:$8 sm:$0xf] }
 0xbe9   :  { %3923 = vmatprep.subr.bf16.mxu0 %v6236_v18  ;;  %v3646_v10 = vor.u32 %v3645_v4, %v3644_v17  ;;  %v3966_v4 = vld [vmem:[#allocation3 + $0x31] ss:$8 sm:$0x30] }
 0xbea   :  { %3907 = vmatpush1.bf16.msra.mxu1 %v3819_v55 }
 0xbeb   :  { %3908 = vmatprep.subr.bf16.mxu1 %v3826_v57  ;;  %v3673_v14 = vrot.slane %v3646_v10, 2 }
 0xbee   :  { %3909 = vmatpush1.bf16.msra.mxu1 %v3825_v3 }
 0xbef   :  { %3910 = vmatprep.subr.bf16.mxu1 %v3832_v30 }
 0xbf2   :  { %3911 = vmatpush1.bf16.msra.mxu1 %v3831_v53 }
 0xbf3   :  { %3912 = vmatprep.subr.bf16.mxu1 %v3838_v9  ;;  %v3721_v9 = vrot.slane %v3646_v10, 4 }
 0xbf6   :  { %3913 = vmatpush1.bf16.msra.mxu1 %v3837_v7 }
 0xc4c   :  { %v3554_v21 = vpop.f32.mrb[52].mxu1  ;;  %v3595_v44 = vpop.f32.mrb[56].mxu0 }
 0xc4d   :  { %v3556_v46 = vpop.f32.mrb[53].mxu1  ;;  %v3597_v48 = vpop.f32.mrb[57].mxu0 }
 0xc4e   :  { %v3649_v1 = vcombine.low %v3554_v21, %v3556_v46  ;;  %v3677_v52 = vcombine.low %v3595_v44, %v3597_v48  ;;  %v3558_v16 = vpop.f32.mrb[54].mxu1  ;;  %v3599_v11 = vpop.f32.mrb[58].mxu0 }
 0xc4f   :  { %v3559_v50 = vpop.f32.mrb[55].mxu1  ;;  %v3600_v22 = vpop.f32.mrb[59].mxu0 }
 0xc50   :  { %v3656_v29 = vrot.slane %v3649_v1, %v4999_v63  ;;  %v3684_v6 = vrot.slane %v3677_v52, %v4999_v63 }
 0xc52   :  { %v3663_v18 = vrot.slane %v3656_v29, %v4999_v63  ;;  %v3691_v58 = vrot.slane %v3684_v6, %v4999_v63 }
 0xc54   :  { %v3665_v25 = vadd.f32 %v3663_v18, %v3646_v10  ;;  %v3693_v23 = vadd.f32 %v3691_v58, %v3673_v14 }
 0xc56   :  { %v4191_v51 = vmul.f32 -1.442695, %v3665_v25  ;;  %v4192_v36 = vmul.f32 -1.442695, %v3693_v23 }
 0xc58   :  { %4438 = vpow2.f32 %v4191_v51 }
 0xc59   :  { %4440 = vpow2.f32 %v4192_v36 }
 0xc62   :  { %v4439_v37 = vpop.eup %4438 }
 0xc63   :  { %v3669_v41 = vadd.f32 1.0, %v4439_v37  ;;  %v4441_v61 = vpop.eup %4440 }
 0xc64   :  { %v3697_v3 = vadd.f32 1.0, %v4441_v61 }
 0xc65   :  { %4442 = vrcp.f32 %v3669_v41 }
 0xc66   :  { %4444 = vrcp.f32 %v3697_v3 }
 0xc6f   :  { %v4443_v7 = vpop.eup %4442 }
 0xc70   :  { %v4445_v46 = vpop.eup %4444 }
 0xc71   :  { %v3725_v48 = vsub.f32 1.0, %v4445_v46  ;;  %v3727_v16 = vmul.f32 %v4445_v46, %v6248_v47  ;;  %v3815_v47 = vld [vmem:[#allocation2 + $0x230] sm:$0xff] }
 0xc8c   :  { %v3636_v45 = vpop.f32.mrb[56].mxu1 }
 0xc8d   :  { %v3700_v60 = vadd.f32 %v3636_v45, %v6777_v43  ;;  %v3638_v0 = vpop.f32.mrb[57].mxu1 }
 0xc8e   :  { %v3701_v59 = vadd.f32 %v3638_v0, %v5012_v8  ;;  %v3640_v27 = vpop.f32.mrb[58].mxu1 }
 0xc8f   :  { %v3641_v55 = vpop.f32.mrb[59].mxu1 }
 0xc90   :  { %v3704_v57 = vcombine.low %v3700_v60, %v3701_v59 }
 0xc92   :  { %v3711_v30 = vrot.slane %v3704_v57, %v4999_v63 }
 0xc94   :  { %v3718_v53 = vrot.slane %v3711_v30, %v4999_v63 }
 0xc96   :  { %v3720_v21 = vmul.f32 %v4443_v7, %v3718_v53 }
 0xc98   :  { %v3723_v44 = vadd.f32 %v3721_v9, %v3720_v21 }
 0xc9a   :  { %4446 = vtanh.f32 %v3723_v44 }
 0xca4   :  { %v4447_v1 = vpop.eup %4446 }
 0xca5   :  { %v3726_v52 = vmul.f32 %v4447_v1, %v3725_v48 }
 0xca7   :  { %v6354_v11 = vadd.f32 %v3727_v16, %v3726_v52 }
 0xca9   :  { %3730 = vst.msk [vmem:[#allocation10 + $0x10] ss:$8 sm:$0x3] %vm5019_vm0, %v6354_v11  ;;  %v3740_v50 = vrot.slane %v6354_v11, %v6721_v5  ;;  %v3736_v22 = vrot.slane %v6354_v11, %v6719_v2  ;;  %v3809_v2 = vld [vmem:[#allocation2 + $0x200] sm:$0xff]  ;;  %v3816_v5 = vld [vmem:[#allocation2 + $0x238] sm:$0xff] }
 0xcab   :  { %v3744_v29 = vpack.c.bf16 %v3740_v50, %v3740_v50  ;;  %v3743_v17 = vpack.c.bf16 %v3736_v22, %v3736_v22 }
 0xcad   :  { %3873 = vmatprep.mubr.bf16.mxu0 %v3744_v29  ;;  %3914 = vmatprep.mubr.bf16.mxu1 %v3744_v29 }
 0xcae   :  { %3874 = vmatmul.mubr.bf16.vlgmr.msra.gmra.mrb[60].mxu0 %v3743_v17  ;;  %3915 = vmatmul.mubr.bf16.vlgmr.msra.gmra.mrb[60].mxu1 %v3743_v17 }
 0xcaf   :  { %3924 = vmatpush1.bf16.msra.mxu0 %v6257_v54  ;;  %3955 = vmatprep.mubr.bf16.mxu0 %v3744_v29  ;;  %v3822_v54 = vld [vmem:[#allocation2 + $0x268] sm:$0xff] }
 0xcb0   :  { %3925 = vmatprep.subr.bf16.mxu0 %v6259_v32  ;;  %v3821_v32 = vld [vmem:[#allocation2 + $0x260] sm:$0xff] }
 0xcb3   :  { %3926 = vmatpush1.bf16.msra.mxu0 %v6263_v31  ;;  %v3828_v31 = vld [vmem:[#allocation2 + $0x298] sm:$0xff] }
 0xcb4   :  { %3927 = vmatprep.subr.bf16.mxu0 %v6265_v49  ;;  %v3827_v49 = vld [vmem:[#allocation2 + $0x290] sm:$0xff] }
 0xcb7   :  { %3928 = vmatpush1.bf16.msra.mxu0 %v6269_v34  ;;  %v3834_v34 = vld [vmem:[#allocation2 + $0x2c8] sm:$0xff] }
 0xcb8   :  { %3929 = vmatprep.subr.bf16.mxu0 %v6271_v39  ;;  %v3833_v39 = vld [vmem:[#allocation2 + $0x2c0] sm:$0xff] }
 0xcbb   :  { %3930 = vmatpush1.bf16.msra.mxu0 %v6275_v62  ;;  %v3840_v62 = vld [vmem:[#allocation2 + $0x2f8] sm:$0xff] }
 0xcbc   :  { %3931 = vmatprep.subr.bf16.mxu0 %v6277_v15  ;;  %v3839_v15 = vld [vmem:[#allocation2 + $0x2f0] sm:$0xff] }
 0xcbf   :  { %3932 = vmatpush1.bf16.msra.mxu0 %v6281_v56 }
 0xcc0   :  { %3933 = vmatprep.subr.bf16.mxu0 %v6283_v13 }
 0xcc3   :  { %3934 = vmatpush1.bf16.msra.mxu0 %v6287_v19 }
 0xcc4   :  { %3935 = vmatprep.subr.bf16.mxu0 %v6289_v20 }
 0xcc7   :  { %3936 = vmatpush1.bf16.msra.mxu0 %v6293_v24 }
 0xcc8   :  { %3937 = vmatprep.subr.bf16.mxu0 %v6295_v26 }
 0xccb   :  { %3938 = vmatpush1.bf16.msra.mxu0 %v6299_v28 }
 0xccc   :  { %3939 = vmatprep.subr.bf16.mxu0 %v6301_v38 }
 0xccf   :  { %3940 = vmatpush1.bf16.msra.mxu0 %v6305_v42 }
 0xcd0   :  { %3941 = vmatprep.subr.bf16.mxu0 %v6307_v40 }
 0xcd3   :  { %3942 = vmatpush1.bf16.msra.mxu0 %v6311_v33 }
 0xcd4   :  { %3943 = vmatprep.subr.bf16.mxu0 %v6313_v35  ;;  %v3965_v35 = vld [vmem:[#allocation3 + $0x31] ss:$8 sm:$0xf] }
 0xcd5   :  { %v3967_v10 = vor.u32 %v3966_v4, %v3965_v35 }
 0xcd7   :  { %3944 = vmatpush1.bf16.msra.mxu0 %v3809_v2  ;;  %v3994_v14 = vrot.slane %v3967_v10, 2  ;;  %v4042_v9 = vrot.slane %v3967_v10, 4 }
 0xcd8   :  { %3945 = vmatprep.subr.bf16.mxu0 %v3816_v5 }
 0xcdb   :  { %3946 = vmatpush1.bf16.msra.mxu0 %v3815_v47 }
 0xcdc   :  { %3947 = vmatprep.subr.bf16.mxu0 %v3822_v54 }
 0xcdf   :  { %3948 = vmatpush1.bf16.msra.mxu0 %v3821_v32 }
 0xce0   :  { %3949 = vmatprep.subr.bf16.mxu0 %v3828_v31 }
 0xce3   :  { %3950 = vmatpush1.bf16.msra.mxu0 %v3827_v49 }
 0xce4   :  { %3951 = vmatprep.subr.bf16.mxu0 %v3834_v34 }
 0xce7   :  { %3952 = vmatpush1.bf16.msra.mxu0 %v3833_v39 }
 0xce8   :  { %3953 = vmatprep.subr.bf16.mxu0 %v3840_v62 }
 0xceb   :  { %3954 = vmatpush1.bf16.msra.mxu0 %v3839_v15 }
 0xcee   :  { %3956 = vmatmul.mubr.bf16.vlgmr.msra.gmra.mrb[64].mxu0 %v3743_v17 }
 0xd81   :  { %v3875_v56 = vpop.f32.mrb[60].mxu0  ;;  %v3916_v13 = vpop.f32.mrb[60].mxu1 }
 0xd82   :  { %v3877_v19 = vpop.f32.mrb[61].mxu0  ;;  %v3918_v20 = vpop.f32.mrb[61].mxu1 }
 0xd83   :  { %v3970_v24 = vcombine.low %v3875_v56, %v3877_v19  ;;  %v3998_v26 = vcombine.low %v3916_v13, %v3918_v20  ;;  %v3879_v28 = vpop.f32.mrb[62].mxu0  ;;  %v3920_v38 = vpop.f32.mrb[62].mxu1 }
 0xd84   :  { %v3880_v42 = vpop.f32.mrb[63].mxu0  ;;  %v3921_v40 = vpop.f32.mrb[63].mxu1 }
 0xd85   :  { %v3977_v33 = vrot.slane %v3970_v24, %v4999_v63  ;;  %v4005_v6 = vrot.slane %v3998_v26, %v4999_v63 }
 0xd87   :  { %v3984_v18 = vrot.slane %v3977_v33, %v4999_v63  ;;  %v4012_v58 = vrot.slane %v4005_v6, %v4999_v63 }
 0xd89   :  { %v3986_v25 = vadd.f32 %v3984_v18, %v3967_v10  ;;  %v4014_v23 = vadd.f32 %v4012_v58, %v3994_v14 }
 0xd8b   :  { %v4193_v51 = vmul.f32 -1.442695, %v3986_v25  ;;  %v4194_v36 = vmul.f32 -1.442695, %v4014_v23 }
 0xd8d   :  { %4448 = vpow2.f32 %v4193_v51 }
 0xd8e   :  { %4450 = vpow2.f32 %v4194_v36 }
 0xd97   :  { %v4449_v37 = vpop.eup %4448 }
 0xd98   :  { %v3990_v41 = vadd.f32 1.0, %v4449_v37  ;;  %v4451_v61 = vpop.eup %4450 }
 0xd99   :  { %v4018_v3 = vadd.f32 1.0, %v4451_v61 }
 0xd9a   :  { %4452 = vrcp.f32 %v3990_v41 }
 0xd9b   :  { %4454 = vrcp.f32 %v4018_v3 }
 0xda4   :  { %v4453_v7 = vpop.eup %4452 }
 0xda5   :  { %v4455_v46 = vpop.eup %4454 }
 0xdc1   :  { %v3957_v45 = vpop.f32.mrb[64].mxu0 }
 0xdc2   :  { %v4021_v60 = vadd.f32 %v3957_v45, %v6777_v43  ;;  %v3959_v0 = vpop.f32.mrb[65].mxu0  ;;  %v4046_v43 = vsub.f32 1.0, %v4455_v46 }
 0xdc3   :  { %v4022_v59 = vadd.f32 %v3959_v0, %v5012_v8  ;;  %v3961_v27 = vpop.f32.mrb[66].mxu0  ;;  %v4048_v8 = vmul.f32 %v4455_v46, %v6354_v11 }
 0xdc4   :  { %v3962_v55 = vpop.f32.mrb[67].mxu0 }
 0xdc5   :  { %v4025_v57 = vcombine.low %v4021_v60, %v4022_v59 }
 0xdc7   :  { %v4032_v30 = vrot.slane %v4025_v57, %v4999_v63 }
 0xdc9   :  { %v4039_v53 = vrot.slane %v4032_v30, %v4999_v63 }
 0xdcb   :  { %v4041_v21 = vmul.f32 %v4453_v7, %v4039_v53 }
 0xdcd   :  { %v4044_v44 = vadd.f32 %v4042_v9, %v4041_v21 }
 0xdcf   :  { %4456 = vtanh.f32 %v4044_v44 }
 0xdd9   :  { %v4457_v48 = vpop.eup %4456 }
 0xdda   :  { %v4047_v1 = vmul.f32 %v4457_v48, %v4046_v43 }
 0xddc   :  { %v4049_v52 = vadd.f32 %v4048_v8, %v4047_v1 }
 0xdde   :  { %4051 = vst.msk [vmem:[#allocation10 + $0x11] ss:$8 sm:$0x3] %vm5019_vm0, %v4049_v52 }
 0xddf   :  { %4513 = shalt.err (!%p4510_p6)
}
 0xde0   :  { %s4514_s0 = scalar_lea.hbm %s6414_s5, 512 }
 0xde1   :  { %p4515_p7 = scmp.ne.s32.totalorder %s6414_s5, %s4514_s0  ;;  %p4518_p8 = scmp.lt.u32.totalorder %s4514_s0, %s6414_s5 }
 0xde3   :  { %p4520_p9 = pnand %p4518_p8, %p4515_p7 }
 0xde5   :  { %4523 = shalt.err (!%p4520_p9)
}
 0xde6   :  { %4064 = dma.vmem_to_hbm [thread:$0]  %s4059_s13, 512, %s6414_s5, [#allocation7], %s4533_s28, %s4533_s28, %s4534_s29  }
 0xde7   :  { %4530 = dma.done.wait [#allocation7], 512  }
 0xde8   :  { %4531 = vsyncadd [#allocation7], 4294966784 }
 0xde9   :  { %4068 = vsyncpa [#allocation6], 1 }
 0xdea   :  { %4069 = vsyncpa [#allocation9], 1 }
 0xdeb   :  { %4070 = vsyncpa [#allocation7], 1 }
 0xdec   :  { %4071 = vsyncmov [#allocation4] }
 0xdef   :  { %s4072_s23 = vpop.sfrf %4071 }
 0xdf0   :  { %p4195_p10 = scmp.ne.s32.totalorder %s4072_s23, 0 }
 0xdf2   :  { %4076 = shalt.err (%p4195_p10)  }

</bundles_post_ra>
